<compile_context>
chip_gen: v5e
topology: v5e:2x2
jax: 0.10.0
libtpu: 0.0.40
codegen_flags: <defaults>
</compile_context>

<pallas_src>
import jax
import jax.numpy as jnp
from jax import lax
from jax.experimental import pallas as pl
from jax.experimental.pallas import tpu as pltpu


def _sigmoid(x):
    # sigmoid(x) == 0.5 * (tanh(x/2) + 1); tanh lowers to the EUP slot.
    return 0.5 * (jnp.tanh(0.5 * x) + 1.0)


def make_seq2seq_encoder_kernel(T, B, H, num_layers):
    TB = T * B

    def kernel(*refs):
        tok_ref, emb_ref = refs[0], refs[1]
        layer_refs = refs[2:2 + 4 * num_layers]
        out_ref = refs[2 + 4 * num_layers]      # (T*B, H)  last-layer outputs
        state_ref = refs[3 + 4 * num_layers]    # (L, B, H) final hidden states
        gx_ref = refs[4 + 4 * num_layers]       # (T*B, 3H) scratch (hoisted proj)
        seq_ref = refs[5 + 4 * num_layers]      # (T*B, H)  scratch (layer output)

        # ---- Embedding (time-major) as a one-hot matmul on the MXU ----------
        # TODO(synk): for large vocabularies replace the one-hot matmul with a
        # scalar-prefetch / DMA row gather of the embedding table.
        vocab = emb_ref.shape[0]
        tok = tok_ref[...]                                          # (TB, 1) i32
        ids = lax.broadcasted_iota(jnp.int32, (TB, vocab), 1)
        onehot = (ids == tok).astype(jnp.float32)                   # (TB, V)
        x = jnp.dot(onehot, emb_ref[...],
                    preferred_element_type=jnp.float32)             # (TB, E)

        # ---- Stacked GRU layers ---------------------------------------------
        for l in range(num_layers):
            w_ih = layer_refs[4 * l + 0][...]   # (in_dim, 3H) == torch W_ih^T
            w_hh = layer_refs[4 * l + 1][...]   # (H, 3H)      == torch W_hh^T
            b_ih = layer_refs[4 * l + 2][...]   # (1, 3H)
            b_hh = layer_refs[4 * l + 3][...]   # (1, 3H)

            # Hoisted input projection for the whole sequence (one big matmul).
            gx_ref[...] = jnp.dot(x, w_ih,
                                  preferred_element_type=jnp.float32) + b_ih

            dst = out_ref if l == num_layers - 1 else seq_ref

            def step(t, h):
                row = t * B
                gxt = gx_ref[pl.ds(row, B), :]                      # (B, 3H)
                gh = jnp.dot(h, w_hh,
                             preferred_element_type=jnp.float32) + b_hh
                r = _sigmoid(gxt[:, 0:H] + gh[:, 0:H])
                z = _sigmoid(gxt[:, H:2 * H] + gh[:, H:2 * H])
                n = jnp.tanh(gxt[:, 2 * H:3 * H] + r * gh[:, 2 * H:3 * H])
                h_new = (1.0 - z) * n + z * h
                dst[pl.ds(row, B), :] = h_new
                return h_new

            h_last = lax.fori_loop(0, T, step,
                                   jnp.zeros((B, H), jnp.float32),
                                   unroll=True)
            state_ref[l] = h_last

            if l < num_layers - 1:
                # TODO(synk): inter-layer dropout omitted (module default
                # dropout=0 / eval-mode identity).
                x = seq_ref[...]                                    # (TB, H)

    return kernel


def seq2seq_encoder(tokens, embedding, layer_params):
    """Forward pass of Seq2SeqEncoder.

    tokens       : (B, T) int token ids.
    embedding    : (V, E) float32 embedding table (nn.Embedding.weight).
    layer_params : per-layer tuples (w_ih, w_hh, b_ih, b_hh) in torch layout:
                   w_ih (3H, in_dim), w_hh (3H, H), biases (3H,), gates (r,z,n).
    Returns (output (T, B, H), state (L, B, H)) as torch.nn.GRU does.
    """
    B, T = tokens.shape
    H = layer_params[0][1].shape[1]
    L = len(layer_params)
    TB = T * B

    # Time-major flatten of the token ids == the X.permute(1, 0, 2) of the spec.
    tok_tb = jnp.transpose(tokens).reshape(TB, 1).astype(jnp.int32)

    flat_params = []
    for (w_ih, w_hh, b_ih, b_hh) in layer_params:
        flat_params += [
            jnp.transpose(w_ih).astype(jnp.float32),   # (in_dim, 3H)
            jnp.transpose(w_hh).astype(jnp.float32),   # (H, 3H)
            b_ih.reshape(1, 3 * H).astype(jnp.float32),
            b_hh.reshape(1, 3 * H).astype(jnp.float32),
        ]

    kernel = make_seq2seq_encoder_kernel(T, B, H, L)

    out_flat, state = pl.pallas_call(
        kernel,
        out_shape=(jax.ShapeDtypeStruct((TB, H), jnp.float32),
                   jax.ShapeDtypeStruct((L, B, H), jnp.float32)),
        scratch_shapes=[pltpu.VMEM((TB, 3 * H), jnp.float32),
                        pltpu.VMEM((TB, H), jnp.float32)],
    )(tok_tb, embedding.astype(jnp.float32), *flat_params)

    return out_flat.reshape(T, B, H), state


def reference_seq2seq_encoder(tokens, embedding, layer_params):
    """Pure-JAX reference matching torch: Embedding -> permute -> stacked GRU."""
    B, T = tokens.shape
    H = layer_params[0][1].shape[1]
    x = embedding[tokens]                        # (B, T, E)
    x = jnp.transpose(x, (1, 0, 2))              # (T, B, E)
    finals = []
    for (w_ih, w_hh, b_ih, b_hh) in layer_params:
        h = jnp.zeros((B, H), jnp.float32)
        outs = []
        for t in range(T):
            gx = x[t] @ w_ih.T + b_ih
            gh = h @ w_hh.T + b_hh
            r = jax.nn.sigmoid(gx[:, :H] + gh[:, :H])
            z = jax.nn.sigmoid(gx[:, H:2 * H] + gh[:, H:2 * H])
            n = jnp.tanh(gx[:, 2 * H:] + r * gh[:, 2 * H:])
            h = (1.0 - z) * n + z * h
            outs.append(h)
        x = jnp.stack(outs, axis=0)
        finals.append(h)
    return x, jnp.stack(finals, axis=0)


if __name__ == "__main__":
    # Small shapes consistent with the module's hyperparameters, chosen
    # lane-dense (multiples of 128) per the performance review.
    vocab_size, embed_size, num_hiddens, num_layers = 128, 128, 128, 2
    batch, seq_len = 8, 8

    key = jax.random.PRNGKey(0)
    keys = jax.random.split(key, 2 + 4 * num_layers)

    tokens = jax.random.randint(keys[0], (batch, seq_len), 0, vocab_size,
                                dtype=jnp.int32)
    embedding = jax.random.normal(keys[1], (vocab_size, embed_size),
                                  dtype=jnp.float32)

    scale = num_hiddens ** -0.5
    layer_params = []
    for l in range(num_layers):
        in_dim = embed_size if l == 0 else num_hiddens
        k0, k1, k2, k3 = keys[2 + 4 * l: 6 + 4 * l]
        layer_params.append((
            jax.random.normal(k0, (3 * num_hiddens, in_dim), jnp.float32) * scale,
            jax.random.normal(k1, (3 * num_hiddens, num_hiddens), jnp.float32) * scale,
            jax.random.normal(k2, (3 * num_hiddens,), jnp.float32) * scale,
            jax.random.normal(k3, (3 * num_hiddens,), jnp.float32) * scale,
        ))

    output, state = seq2seq_encoder(tokens, embedding, layer_params)
    output = jax.block_until_ready(output)
    state = jax.block_until_ready(state)

    ref_out, ref_state = reference_seq2seq_encoder(tokens, embedding, layer_params)

    assert output.shape == (seq_len, batch, num_hiddens)
    assert state.shape == (num_layers, batch, num_hiddens)
    assert jnp.allclose(output, ref_out, atol=2e-3, rtol=2e-3), "output mismatch"
    assert jnp.allclose(state, ref_state, atol=2e-3, rtol=2e-3), "state mismatch"

    print("KERNEL_OK")
</pallas_src>

<mosaic_0001>
module attributes {stable_mosaic.version = 11 : i64} {
  func.func @kernel(%arg0: memref<64x1xi32, #tpu.memory_space<vmem>>, %arg1: memref<128x128xf32, #tpu.memory_space<vmem>>, %arg2: memref<128x384xf32, #tpu.memory_space<vmem>>, %arg3: memref<128x384xf32, #tpu.memory_space<vmem>>, %arg4: memref<1x384xf32, #tpu.memory_space<vmem>>, %arg5: memref<1x384xf32, #tpu.memory_space<vmem>>, %arg6: memref<128x384xf32, #tpu.memory_space<vmem>>, %arg7: memref<128x384xf32, #tpu.memory_space<vmem>>, %arg8: memref<1x384xf32, #tpu.memory_space<vmem>>, %arg9: memref<1x384xf32, #tpu.memory_space<vmem>>, %arg10: memref<64x128xf32, #tpu.memory_space<vmem>>, %arg11: memref<2x8x128xf32, #tpu.memory_space<vmem>>, %arg12: memref<64x384xf32, #tpu.memory_space<vmem>>, %arg13: memref<64x128xf32, #tpu.memory_space<vmem>>) attributes {dimension_semantics = [], scalar_prefetch = 0 : i64, scratch_operands = 2 : i64, tpu.core_type = #tpu.core_type<tc>} {
    %c0 = arith.constant 0 : index
    %c0_0 = arith.constant 0 : index
    %0 = vector.load %arg0[%c0, %c0_0] : memref<64x1xi32, #tpu.memory_space<vmem>>, vector<64x1xi32>
    %1 = tpu.iota {dimensions = array<i32: 1>} : vector<64x128xi32>
    %2 = vector.broadcast %0 : vector<64x1xi32> to vector<64x128xi32>
    %3 = arith.cmpi eq, %1, %2 : vector<64x128xi32>
    %4 = arith.extui %3 : vector<64x128xi1> to vector<64x128xi32>
    %5 = arith.sitofp %4 : vector<64x128xi32> to vector<64x128xf32>
    %c0_1 = arith.constant 0 : index
    %c0_2 = arith.constant 0 : index
    %6 = vector.load %arg1[%c0_1, %c0_2] : memref<128x128xf32, #tpu.memory_space<vmem>>, vector<128x128xf32>
    %cst = arith.constant dense<0.000000e+00> : vector<64x128xf32>
    %7 = tpu.matmul %5, %6, %cst {dimension_numbers = #tpu.dot_dimension_numbers<[1], [0], [0], [1], [0, 0, 1, 1], [], []>} : vector<64x128xf32>, vector<128x128xf32>, vector<64x128xf32> -> vector<64x128xf32>
    %c0_3 = arith.constant 0 : index
    %c0_4 = arith.constant 0 : index
    %8 = vector.load %arg2[%c0_3, %c0_4] : memref<128x384xf32, #tpu.memory_space<vmem>>, vector<128x384xf32>
    %c0_5 = arith.constant 0 : index
    %c0_6 = arith.constant 0 : index
    %9 = vector.load %arg3[%c0_5, %c0_6] : memref<128x384xf32, #tpu.memory_space<vmem>>, vector<128x384xf32>
    %c0_7 = arith.constant 0 : index
    %c0_8 = arith.constant 0 : index
    %10 = vector.load %arg4[%c0_7, %c0_8] : memref<1x384xf32, #tpu.memory_space<vmem>>, vector<1x384xf32>
    %c0_9 = arith.constant 0 : index
    %c0_10 = arith.constant 0 : index
    %11 = vector.load %arg5[%c0_9, %c0_10] : memref<1x384xf32, #tpu.memory_space<vmem>>, vector<1x384xf32>
    %cst_11 = arith.constant dense<0.000000e+00> : vector<64x384xf32>
    %12 = tpu.matmul %7, %8, %cst_11 {dimension_numbers = #tpu.dot_dimension_numbers<[1], [0], [0], [1], [0, 0, 1, 1], [], []>} : vector<64x128xf32>, vector<128x384xf32>, vector<64x384xf32> -> vector<64x384xf32>
    %13 = vector.broadcast %10 : vector<1x384xf32> to vector<64x384xf32>
    %14 = arith.addf %12, %13 : vector<64x384xf32>
    %c0_12 = arith.constant 0 : index
    %c0_13 = arith.constant 0 : index
    %15 = vector.load %arg12[%c0_12, %c0_13] : memref<64x384xf32, #tpu.memory_space<vmem>>, vector<64x384xf32>
    tpu.vector_store %arg12[%c0_12, %c0_13], %14 {strides = array<i32>} : memref<64x384xf32, #tpu.memory_space<vmem>>, vector<64x384xf32>,
    %cst_14 = arith.constant 0.000000e+00 : f32
    %16 = vector.broadcast %cst_14 : f32 to vector<8x128xf32>
    %c0_i32 = arith.constant 0 : i32
    %c8_i32 = arith.constant 8 : i32
    %17 = arith.muli %c0_i32, %c8_i32 : i32
    %18 = arith.index_cast %17 : i32 to index
    %c0_15 = arith.constant 0 : index
    %19 = vector.load %arg12[%18, %c0_15] : memref<64x384xf32, #tpu.memory_space<vmem>>, vector<8x384xf32>
    %cst_16 = arith.constant dense<0.000000e+00> : vector<8x384xf32>
    %20 = tpu.matmul %16, %9, %cst_16 {dimension_numbers = #tpu.dot_dimension_numbers<[1], [0], [0], [1], [0, 0, 1, 1], [], []>} : vector<8x128xf32>, vector<128x384xf32>, vector<8x384xf32> -> vector<8x384xf32>
    %21 = vector.broadcast %11 : vector<1x384xf32> to vector<8x384xf32>
    %22 = arith.addf %20, %21 : vector<8x384xf32>
    %23 = vector.extract_strided_slice %19 {offsets = [0, 0], sizes = [8, 128], strides = [1, 1]} : vector<8x384xf32> to vector<8x128xf32>
    %24 = vector.extract_strided_slice %22 {offsets = [0, 0], sizes = [8, 128], strides = [1, 1]} : vector<8x384xf32> to vector<8x128xf32>
    %25 = arith.addf %23, %24 : vector<8x128xf32>
    %cst_17 = arith.constant 5.000000e-01 : f32
    %26 = vector.broadcast %cst_17 : f32 to vector<8x128xf32>
    %27 = arith.mulf %26, %25 : vector<8x128xf32>
    %28 = math.tanh %27 : vector<8x128xf32>
    %cst_18 = arith.constant 1.000000e+00 : f32
    %29 = vector.broadcast %cst_18 : f32 to vector<8x128xf32>
    %30 = arith.addf %28, %29 : vector<8x128xf32>
    %cst_19 = arith.constant 5.000000e-01 : f32
    %31 = vector.broadcast %cst_19 : f32 to vector<8x128xf32>
    %32 = arith.mulf %31, %30 : vector<8x128xf32>
    %33 = vector.extract_strided_slice %19 {offsets = [0, 128], sizes = [8, 128], strides = [1, 1]} : vector<8x384xf32> to vector<8x128xf32>
    %34 = vector.extract_strided_slice %22 {offsets = [0, 128], sizes = [8, 128], strides = [1, 1]} : vector<8x384xf32> to vector<8x128xf32>
    %35 = arith.addf %33, %34 : vector<8x128xf32>
    %cst_20 = arith.constant 5.000000e-01 : f32
    %36 = vector.broadcast %cst_20 : f32 to vector<8x128xf32>
    %37 = arith.mulf %36, %35 : vector<8x128xf32>
    %38 = math.tanh %37 : vector<8x128xf32>
    %cst_21 = arith.constant 1.000000e+00 : f32
    %39 = vector.broadcast %cst_21 : f32 to vector<8x128xf32>
    %40 = arith.addf %38, %39 : vector<8x128xf32>
    %cst_22 = arith.constant 5.000000e-01 : f32
    %41 = vector.broadcast %cst_22 : f32 to vector<8x128xf32>
    %42 = arith.mulf %41, %40 : vector<8x128xf32>
    %43 = vector.extract_strided_slice %19 {offsets = [0, 256], sizes = [8, 128], strides = [1, 1]} : vector<8x384xf32> to vector<8x128xf32>
    %44 = vector.extract_strided_slice %22 {offsets = [0, 256], sizes = [8, 128], strides = [1, 1]} : vector<8x384xf32> to vector<8x128xf32>
    %45 = arith.mulf %32, %44 : vector<8x128xf32>
    %46 = arith.addf %43, %45 : vector<8x128xf32>
    %47 = math.tanh %46 : vector<8x128xf32>
    %cst_23 = arith.constant 1.000000e+00 : f32
    %48 = vector.broadcast %cst_23 : f32 to vector<8x128xf32>
    %49 = arith.subf %48, %42 : vector<8x128xf32>
    %50 = arith.mulf %49, %47 : vector<8x128xf32>
    %51 = arith.mulf %42, %16 : vector<8x128xf32>
    %52 = arith.addf %50, %51 : vector<8x128xf32>
    %53 = arith.index_cast %17 : i32 to index
    %c0_24 = arith.constant 0 : index
    %54 = vector.load %arg13[%53, %c0_24] : memref<64x128xf32, #tpu.memory_space<vmem>>, vector<8x128xf32>
    tpu.vector_store %arg13[%53, %c0_24], %52 {strides = array<i32>} : memref<64x128xf32, #tpu.memory_space<vmem>>, vector<8x128xf32>,
    %c1_i32 = arith.constant 1 : i32
    %c8_i32_25 = arith.constant 8 : i32
    %55 = arith.muli %c1_i32, %c8_i32_25 : i32
    %56 = arith.index_cast %55 : i32 to index
    %c0_26 = arith.constant 0 : index
    %57 = vector.load %arg12[%56, %c0_26] : memref<64x384xf32, #tpu.memory_space<vmem>>, vector<8x384xf32>
    %cst_27 = arith.constant dense<0.000000e+00> : vector<8x384xf32>
    %58 = tpu.matmul %52, %9, %cst_27 {dimension_numbers = #tpu.dot_dimension_numbers<[1], [0], [0], [1], [0, 0, 1, 1], [], []>} : vector<8x128xf32>, vector<128x384xf32>, vector<8x384xf32> -> vector<8x384xf32>
    %59 = vector.broadcast %11 : vector<1x384xf32> to vector<8x384xf32>
    %60 = arith.addf %58, %59 : vector<8x384xf32>
    %61 = vector.extract_strided_slice %57 {offsets = [0, 0], sizes = [8, 128], strides = [1, 1]} : vector<8x384xf32> to vector<8x128xf32>
    %62 = vector.extract_strided_slice %60 {offsets = [0, 0], sizes = [8, 128], strides = [1, 1]} : vector<8x384xf32> to vector<8x128xf32>
    %63 = arith.addf %61, %62 : vector<8x128xf32>
    %cst_28 = arith.constant 5.000000e-01 : f32
    %64 = vector.broadcast %cst_28 : f32 to vector<8x128xf32>
    %65 = arith.mulf %64, %63 : vector<8x128xf32>
    %66 = math.tanh %65 : vector<8x128xf32>
    %cst_29 = arith.constant 1.000000e+00 : f32
    %67 = vector.broadcast %cst_29 : f32 to vector<8x128xf32>
    %68 = arith.addf %66, %67 : vector<8x128xf32>
    %cst_30 = arith.constant 5.000000e-01 : f32
    %69 = vector.broadcast %cst_30 : f32 to vector<8x128xf32>
    %70 = arith.mulf %69, %68 : vector<8x128xf32>
    %71 = vector.extract_strided_slice %57 {offsets = [0, 128], sizes = [8, 128], strides = [1, 1]} : vector<8x384xf32> to vector<8x128xf32>
    %72 = vector.extract_strided_slice %60 {offsets = [0, 128], sizes = [8, 128], strides = [1, 1]} : vector<8x384xf32> to vector<8x128xf32>
    %73 = arith.addf %71, %72 : vector<8x128xf32>
    %cst_31 = arith.constant 5.000000e-01 : f32
    %74 = vector.broadcast %cst_31 : f32 to vector<8x128xf32>
    %75 = arith.mulf %74, %73 : vector<8x128xf32>
    %76 = math.tanh %75 : vector<8x128xf32>
    %cst_32 = arith.constant 1.000000e+00 : f32
    %77 = vector.broadcast %cst_32 : f32 to vector<8x128xf32>
    %78 = arith.addf %76, %77 : vector<8x128xf32>
    %cst_33 = arith.constant 5.000000e-01 : f32
    %79 = vector.broadcast %cst_33 : f32 to vector<8x128xf32>
    %80 = arith.mulf %79, %78 : vector<8x128xf32>
    %81 = vector.extract_strided_slice %57 {offsets = [0, 256], sizes = [8, 128], strides = [1, 1]} : vector<8x384xf32> to vector<8x128xf32>
    %82 = vector.extract_strided_slice %60 {offsets = [0, 256], sizes = [8, 128], strides = [1, 1]} : vector<8x384xf32> to vector<8x128xf32>
    %83 = arith.mulf %70, %82 : vector<8x128xf32>
    %84 = arith.addf %81, %83 : vector<8x128xf32>
    %85 = math.tanh %84 : vector<8x128xf32>
    %cst_34 = arith.constant 1.000000e+00 : f32
    %86 = vector.broadcast %cst_34 : f32 to vector<8x128xf32>
    %87 = arith.subf %86, %80 : vector<8x128xf32>
    %88 = arith.mulf %87, %85 : vector<8x128xf32>
    %89 = arith.mulf %80, %52 : vector<8x128xf32>
    %90 = arith.addf %88, %89 : vector<8x128xf32>
    %91 = arith.index_cast %55 : i32 to index
    %c0_35 = arith.constant 0 : index
    %92 = vector.load %arg13[%91, %c0_35] : memref<64x128xf32, #tpu.memory_space<vmem>>, vector<8x128xf32>
    tpu.vector_store %arg13[%91, %c0_35], %90 {strides = array<i32>} : memref<64x128xf32, #tpu.memory_space<vmem>>, vector<8x128xf32>,
    %c2_i32 = arith.constant 2 : i32
    %c8_i32_36 = arith.constant 8 : i32
    %93 = arith.muli %c2_i32, %c8_i32_36 : i32
    %94 = arith.index_cast %93 : i32 to index
    %c0_37 = arith.constant 0 : index
    %95 = vector.load %arg12[%94, %c0_37] : memref<64x384xf32, #tpu.memory_space<vmem>>, vector<8x384xf32>
    %cst_38 = arith.constant dense<0.000000e+00> : vector<8x384xf32>
    %96 = tpu.matmul %90, %9, %cst_38 {dimension_numbers = #tpu.dot_dimension_numbers<[1], [0], [0], [1], [0, 0, 1, 1], [], []>} : vector<8x128xf32>, vector<128x384xf32>, vector<8x384xf32> -> vector<8x384xf32>
    %97 = vector.broadcast %11 : vector<1x384xf32> to vector<8x384xf32>
    %98 = arith.addf %96, %97 : vector<8x384xf32>
    %99 = vector.extract_strided_slice %95 {offsets = [0, 0], sizes = [8, 128], strides = [1, 1]} : vector<8x384xf32> to vector<8x128xf32>
    %100 = vector.extract_strided_slice %98 {offsets = [0, 0], sizes = [8, 128], strides = [1, 1]} : vector<8x384xf32> to vector<8x128xf32>
    %101 = arith.addf %99, %100 : vector<8x128xf32>
    %cst_39 = arith.constant 5.000000e-01 : f32
    %102 = vector.broadcast %cst_39 : f32 to vector<8x128xf32>
    %103 = arith.mulf %102, %101 : vector<8x128xf32>
    %104 = math.tanh %103 : vector<8x128xf32>
    %cst_40 = arith.constant 1.000000e+00 : f32
    %105 = vector.broadcast %cst_40 : f32 to vector<8x128xf32>
    %106 = arith.addf %104, %105 : vector<8x128xf32>
    %cst_41 = arith.constant 5.000000e-01 : f32
    %107 = vector.broadcast %cst_41 : f32 to vector<8x128xf32>
    %108 = arith.mulf %107, %106 : vector<8x128xf32>
    %109 = vector.extract_strided_slice %95 {offsets = [0, 128], sizes = [8, 128], strides = [1, 1]} : vector<8x384xf32> to vector<8x128xf32>
    %110 = vector.extract_strided_slice %98 {offsets = [0, 128], sizes = [8, 128], strides = [1, 1]} : vector<8x384xf32> to vector<8x128xf32>
    %111 = arith.addf %109, %110 : vector<8x128xf32>
    %cst_42 = arith.constant 5.000000e-01 : f32
    %112 = vector.broadcast %cst_42 : f32 to vector<8x128xf32>
    %113 = arith.mulf %112, %111 : vector<8x128xf32>
    %114 = math.tanh %113 : vector<8x128xf32>
    %cst_43 = arith.constant 1.000000e+00 : f32
    %115 = vector.broadcast %cst_43 : f32 to vector<8x128xf32>
    %116 = arith.addf %114, %115 : vector<8x128xf32>
    %cst_44 = arith.constant 5.000000e-01 : f32
    %117 = vector.broadcast %cst_44 : f32 to vector<8x128xf32>
    %118 = arith.mulf %117, %116 : vector<8x128xf32>
    %119 = vector.extract_strided_slice %95 {offsets = [0, 256], sizes = [8, 128], strides = [1, 1]} : vector<8x384xf32> to vector<8x128xf32>
    %120 = vector.extract_strided_slice %98 {offsets = [0, 256], sizes = [8, 128], strides = [1, 1]} : vector<8x384xf32> to vector<8x128xf32>
    %121 = arith.mulf %108, %120 : vector<8x128xf32>
    %122 = arith.addf %119, %121 : vector<8x128xf32>
    %123 = math.tanh %122 : vector<8x128xf32>
    %cst_45 = arith.constant 1.000000e+00 : f32
    %124 = vector.broadcast %cst_45 : f32 to vector<8x128xf32>
    %125 = arith.subf %124, %118 : vector<8x128xf32>
    %126 = arith.mulf %125, %123 : vector<8x128xf32>
    %127 = arith.mulf %118, %90 : vector<8x128xf32>
    %128 = arith.addf %126, %127 : vector<8x128xf32>
    %129 = arith.index_cast %93 : i32 to index
    %c0_46 = arith.constant 0 : index
    %130 = vector.load %arg13[%129, %c0_46] : memref<64x128xf32, #tpu.memory_space<vmem>>, vector<8x128xf32>
    tpu.vector_store %arg13[%129, %c0_46], %128 {strides = array<i32>} : memref<64x128xf32, #tpu.memory_space<vmem>>, vector<8x128xf32>,
    %c3_i32 = arith.constant 3 : i32
    %c8_i32_47 = arith.constant 8 : i32
    %131 = arith.muli %c3_i32, %c8_i32_47 : i32
    %132 = arith.index_cast %131 : i32 to index
    %c0_48 = arith.constant 0 : index
    %133 = vector.load %arg12[%132, %c0_48] : memref<64x384xf32, #tpu.memory_space<vmem>>, vector<8x384xf32>
    %cst_49 = arith.constant dense<0.000000e+00> : vector<8x384xf32>
    %134 = tpu.matmul %128, %9, %cst_49 {dimension_numbers = #tpu.dot_dimension_numbers<[1], [0], [0], [1], [0, 0, 1, 1], [], []>} : vector<8x128xf32>, vector<128x384xf32>, vector<8x384xf32> -> vector<8x384xf32>
    %135 = vector.broadcast %11 : vector<1x384xf32> to vector<8x384xf32>
    %136 = arith.addf %134, %135 : vector<8x384xf32>
    %137 = vector.extract_strided_slice %133 {offsets = [0, 0], sizes = [8, 128], strides = [1, 1]} : vector<8x384xf32> to vector<8x128xf32>
    %138 = vector.extract_strided_slice %136 {offsets = [0, 0], sizes = [8, 128], strides = [1, 1]} : vector<8x384xf32> to vector<8x128xf32>
    %139 = arith.addf %137, %138 : vector<8x128xf32>
    %cst_50 = arith.constant 5.000000e-01 : f32
    %140 = vector.broadcast %cst_50 : f32 to vector<8x128xf32>
    %141 = arith.mulf %140, %139 : vector<8x128xf32>
    %142 = math.tanh %141 : vector<8x128xf32>
    %cst_51 = arith.constant 1.000000e+00 : f32
    %143 = vector.broadcast %cst_51 : f32 to vector<8x128xf32>
    %144 = arith.addf %142, %143 : vector<8x128xf32>
    %cst_52 = arith.constant 5.000000e-01 : f32
    %145 = vector.broadcast %cst_52 : f32 to vector<8x128xf32>
    %146 = arith.mulf %145, %144 : vector<8x128xf32>
    %147 = vector.extract_strided_slice %133 {offsets = [0, 128], sizes = [8, 128], strides = [1, 1]} : vector<8x384xf32> to vector<8x128xf32>
    %148 = vector.extract_strided_slice %136 {offsets = [0, 128], sizes = [8, 128], strides = [1, 1]} : vector<8x384xf32> to vector<8x128xf32>
    %149 = arith.addf %147, %148 : vector<8x128xf32>
    %cst_53 = arith.constant 5.000000e-01 : f32
    %150 = vector.broadcast %cst_53 : f32 to vector<8x128xf32>
    %151 = arith.mulf %150, %149 : vector<8x128xf32>
    %152 = math.tanh %151 : vector<8x128xf32>
    %cst_54 = arith.constant 1.000000e+00 : f32
    %153 = vector.broadcast %cst_54 : f32 to vector<8x128xf32>
    %154 = arith.addf %152, %153 : vector<8x128xf32>
    %cst_55 = arith.constant 5.000000e-01 : f32
    %155 = vector.broadcast %cst_55 : f32 to vector<8x128xf32>
    %156 = arith.mulf %155, %154 : vector<8x128xf32>
    %157 = vector.extract_strided_slice %133 {offsets = [0, 256], sizes = [8, 128], strides = [1, 1]} : vector<8x384xf32> to vector<8x128xf32>
    %158 = vector.extract_strided_slice %136 {offsets = [0, 256], sizes = [8, 128], strides = [1, 1]} : vector<8x384xf32> to vector<8x128xf32>
    %159 = arith.mulf %146, %158 : vector<8x128xf32>
    %160 = arith.addf %157, %159 : vector<8x128xf32>
    %161 = math.tanh %160 : vector<8x128xf32>
    %cst_56 = arith.constant 1.000000e+00 : f32
    %162 = vector.broadcast %cst_56 : f32 to vector<8x128xf32>
    %163 = arith.subf %162, %156 : vector<8x128xf32>
    %164 = arith.mulf %163, %161 : vector<8x128xf32>
    %165 = arith.mulf %156, %128 : vector<8x128xf32>
    %166 = arith.addf %164, %165 : vector<8x128xf32>
    %167 = arith.index_cast %131 : i32 to index
    %c0_57 = arith.constant 0 : index
    %168 = vector.load %arg13[%167, %c0_57] : memref<64x128xf32, #tpu.memory_space<vmem>>, vector<8x128xf32>
    tpu.vector_store %arg13[%167, %c0_57], %166 {strides = array<i32>} : memref<64x128xf32, #tpu.memory_space<vmem>>, vector<8x128xf32>,
    %c4_i32 = arith.constant 4 : i32
    %c8_i32_58 = arith.constant 8 : i32
    %169 = arith.muli %c4_i32, %c8_i32_58 : i32
    %170 = arith.index_cast %169 : i32 to index
    %c0_59 = arith.constant 0 : index
    %171 = vector.load %arg12[%170, %c0_59] : memref<64x384xf32, #tpu.memory_space<vmem>>, vector<8x384xf32>
    %cst_60 = arith.constant dense<0.000000e+00> : vector<8x384xf32>
    %172 = tpu.matmul %166, %9, %cst_60 {dimension_numbers = #tpu.dot_dimension_numbers<[1], [0], [0], [1], [0, 0, 1, 1], [], []>} : vector<8x128xf32>, vector<128x384xf32>, vector<8x384xf32> -> vector<8x384xf32>
    %173 = vector.broadcast %11 : vector<1x384xf32> to vector<8x384xf32>
    %174 = arith.addf %172, %173 : vector<8x384xf32>
    %175 = vector.extract_strided_slice %171 {offsets = [0, 0], sizes = [8, 128], strides = [1, 1]} : vector<8x384xf32> to vector<8x128xf32>
    %176 = vector.extract_strided_slice %174 {offsets = [0, 0], sizes = [8, 128], strides = [1, 1]} : vector<8x384xf32> to vector<8x128xf32>
    %177 = arith.addf %175, %176 : vector<8x128xf32>
    %cst_61 = arith.constant 5.000000e-01 : f32
    %178 = vector.broadcast %cst_61 : f32 to vector<8x128xf32>
    %179 = arith.mulf %178, %177 : vector<8x128xf32>
    %180 = math.tanh %179 : vector<8x128xf32>
    %cst_62 = arith.constant 1.000000e+00 : f32
    %181 = vector.broadcast %cst_62 : f32 to vector<8x128xf32>
    %182 = arith.addf %180, %181 : vector<8x128xf32>
    %cst_63 = arith.constant 5.000000e-01 : f32
    %183 = vector.broadcast %cst_63 : f32 to vector<8x128xf32>
    %184 = arith.mulf %183, %182 : vector<8x128xf32>
    %185 = vector.extract_strided_slice %171 {offsets = [0, 128], sizes = [8, 128], strides = [1, 1]} : vector<8x384xf32> to vector<8x128xf32>
    %186 = vector.extract_strided_slice %174 {offsets = [0, 128], sizes = [8, 128], strides = [1, 1]} : vector<8x384xf32> to vector<8x128xf32>
    %187 = arith.addf %185, %186 : vector<8x128xf32>
    %cst_64 = arith.constant 5.000000e-01 : f32
    %188 = vector.broadcast %cst_64 : f32 to vector<8x128xf32>
    %189 = arith.mulf %188, %187 : vector<8x128xf32>
    %190 = math.tanh %189 : vector<8x128xf32>
    %cst_65 = arith.constant 1.000000e+00 : f32
    %191 = vector.broadcast %cst_65 : f32 to vector<8x128xf32>
    %192 = arith.addf %190, %191 : vector<8x128xf32>
    %cst_66 = arith.constant 5.000000e-01 : f32
    %193 = vector.broadcast %cst_66 : f32 to vector<8x128xf32>
    %194 = arith.mulf %193, %192 : vector<8x128xf32>
    %195 = vector.extract_strided_slice %171 {offsets = [0, 256], sizes = [8, 128], strides = [1, 1]} : vector<8x384xf32> to vector<8x128xf32>
    %196 = vector.extract_strided_slice %174 {offsets = [0, 256], sizes = [8, 128], strides = [1, 1]} : vector<8x384xf32> to vector<8x128xf32>
    %197 = arith.mulf %184, %196 : vector<8x128xf32>
    %198 = arith.addf %195, %197 : vector<8x128xf32>
    %199 = math.tanh %198 : vector<8x128xf32>
    %cst_67 = arith.constant 1.000000e+00 : f32
    %200 = vector.broadcast %cst_67 : f32 to vector<8x128xf32>
    %201 = arith.subf %200, %194 : vector<8x128xf32>
    %202 = arith.mulf %201, %199 : vector<8x128xf32>
    %203 = arith.mulf %194, %166 : vector<8x128xf32>
    %204 = arith.addf %202, %203 : vector<8x128xf32>
    %205 = arith.index_cast %169 : i32 to index
    %c0_68 = arith.constant 0 : index
    %206 = vector.load %arg13[%205, %c0_68] : memref<64x128xf32, #tpu.memory_space<vmem>>, vector<8x128xf32>
    tpu.vector_store %arg13[%205, %c0_68], %204 {strides = array<i32>} : memref<64x128xf32, #tpu.memory_space<vmem>>, vector<8x128xf32>,
    %c5_i32 = arith.constant 5 : i32
    %c8_i32_69 = arith.constant 8 : i32
    %207 = arith.muli %c5_i32, %c8_i32_69 : i32
    %208 = arith.index_cast %207 : i32 to index
    %c0_70 = arith.constant 0 : index
    %209 = vector.load %arg12[%208, %c0_70] : memref<64x384xf32, #tpu.memory_space<vmem>>, vector<8x384xf32>
    %cst_71 = arith.constant dense<0.000000e+00> : vector<8x384xf32>
    %210 = tpu.matmul %204, %9, %cst_71 {dimension_numbers = #tpu.dot_dimension_numbers<[1], [0], [0], [1], [0, 0, 1, 1], [], []>} : vector<8x128xf32>, vector<128x384xf32>, vector<8x384xf32> -> vector<8x384xf32>
    %211 = vector.broadcast %11 : vector<1x384xf32> to vector<8x384xf32>
    %212 = arith.addf %210, %211 : vector<8x384xf32>
    %213 = vector.extract_strided_slice %209 {offsets = [0, 0], sizes = [8, 128], strides = [1, 1]} : vector<8x384xf32> to vector<8x128xf32>
    %214 = vector.extract_strided_slice %212 {offsets = [0, 0], sizes = [8, 128], strides = [1, 1]} : vector<8x384xf32> to vector<8x128xf32>
    %215 = arith.addf %213, %214 : vector<8x128xf32>
    %cst_72 = arith.constant 5.000000e-01 : f32
    %216 = vector.broadcast %cst_72 : f32 to vector<8x128xf32>
    %217 = arith.mulf %216, %215 : vector<8x128xf32>
    %218 = math.tanh %217 : vector<8x128xf32>
    %cst_73 = arith.constant 1.000000e+00 : f32
    %219 = vector.broadcast %cst_73 : f32 to vector<8x128xf32>
    %220 = arith.addf %218, %219 : vector<8x128xf32>
    %cst_74 = arith.constant 5.000000e-01 : f32
    %221 = vector.broadcast %cst_74 : f32 to vector<8x128xf32>
    %222 = arith.mulf %221, %220 : vector<8x128xf32>
    %223 = vector.extract_strided_slice %209 {offsets = [0, 128], sizes = [8, 128], strides = [1, 1]} : vector<8x384xf32> to vector<8x128xf32>
    %224 = vector.extract_strided_slice %212 {offsets = [0, 128], sizes = [8, 128], strides = [1, 1]} : vector<8x384xf32> to vector<8x128xf32>
    %225 = arith.addf %223, %224 : vector<8x128xf32>
    %cst_75 = arith.constant 5.000000e-01 : f32
    %226 = vector.broadcast %cst_75 : f32 to vector<8x128xf32>
    %227 = arith.mulf %226, %225 : vector<8x128xf32>
    %228 = math.tanh %227 : vector<8x128xf32>
    %cst_76 = arith.constant 1.000000e+00 : f32
    %229 = vector.broadcast %cst_76 : f32 to vector<8x128xf32>
    %230 = arith.addf %228, %229 : vector<8x128xf32>
    %cst_77 = arith.constant 5.000000e-01 : f32
    %231 = vector.broadcast %cst_77 : f32 to vector<8x128xf32>
    %232 = arith.mulf %231, %230 : vector<8x128xf32>
    %233 = vector.extract_strided_slice %209 {offsets = [0, 256], sizes = [8, 128], strides = [1, 1]} : vector<8x384xf32> to vector<8x128xf32>
    %234 = vector.extract_strided_slice %212 {offsets = [0, 256], sizes = [8, 128], strides = [1, 1]} : vector<8x384xf32> to vector<8x128xf32>
    %235 = arith.mulf %222, %234 : vector<8x128xf32>
    %236 = arith.addf %233, %235 : vector<8x128xf32>
    %237 = math.tanh %236 : vector<8x128xf32>
    %cst_78 = arith.constant 1.000000e+00 : f32
    %238 = vector.broadcast %cst_78 : f32 to vector<8x128xf32>
    %239 = arith.subf %238, %232 : vector<8x128xf32>
    %240 = arith.mulf %239, %237 : vector<8x128xf32>
    %241 = arith.mulf %232, %204 : vector<8x128xf32>
    %242 = arith.addf %240, %241 : vector<8x128xf32>
    %243 = arith.index_cast %207 : i32 to index
    %c0_79 = arith.constant 0 : index
    %244 = vector.load %arg13[%243, %c0_79] : memref<64x128xf32, #tpu.memory_space<vmem>>, vector<8x128xf32>
    tpu.vector_store %arg13[%243, %c0_79], %242 {strides = array<i32>} : memref<64x128xf32, #tpu.memory_space<vmem>>, vector<8x128xf32>,
    %c6_i32 = arith.constant 6 : i32
    %c8_i32_80 = arith.constant 8 : i32
    %245 = arith.muli %c6_i32, %c8_i32_80 : i32
    %246 = arith.index_cast %245 : i32 to index
    %c0_81 = arith.constant 0 : index
    %247 = vector.load %arg12[%246, %c0_81] : memref<64x384xf32, #tpu.memory_space<vmem>>, vector<8x384xf32>
    %cst_82 = arith.constant dense<0.000000e+00> : vector<8x384xf32>
    %248 = tpu.matmul %242, %9, %cst_82 {dimension_numbers = #tpu.dot_dimension_numbers<[1], [0], [0], [1], [0, 0, 1, 1], [], []>} : vector<8x128xf32>, vector<128x384xf32>, vector<8x384xf32> -> vector<8x384xf32>
    %249 = vector.broadcast %11 : vector<1x384xf32> to vector<8x384xf32>
    %250 = arith.addf %248, %249 : vector<8x384xf32>
    %251 = vector.extract_strided_slice %247 {offsets = [0, 0], sizes = [8, 128], strides = [1, 1]} : vector<8x384xf32> to vector<8x128xf32>
    %252 = vector.extract_strided_slice %250 {offsets = [0, 0], sizes = [8, 128], strides = [1, 1]} : vector<8x384xf32> to vector<8x128xf32>
    %253 = arith.addf %251, %252 : vector<8x128xf32>
    %cst_83 = arith.constant 5.000000e-01 : f32
    %254 = vector.broadcast %cst_83 : f32 to vector<8x128xf32>
    %255 = arith.mulf %254, %253 : vector<8x128xf32>
    %256 = math.tanh %255 : vector<8x128xf32>
    %cst_84 = arith.constant 1.000000e+00 : f32
    %257 = vector.broadcast %cst_84 : f32 to vector<8x128xf32>
    %258 = arith.addf %256, %257 : vector<8x128xf32>
    %cst_85 = arith.constant 5.000000e-01 : f32
    %259 = vector.broadcast %cst_85 : f32 to vector<8x128xf32>
    %260 = arith.mulf %259, %258 : vector<8x128xf32>
    %261 = vector.extract_strided_slice %247 {offsets = [0, 128], sizes = [8, 128], strides = [1, 1]} : vector<8x384xf32> to vector<8x128xf32>
    %262 = vector.extract_strided_slice %250 {offsets = [0, 128], sizes = [8, 128], strides = [1, 1]} : vector<8x384xf32> to vector<8x128xf32>
    %263 = arith.addf %261, %262 : vector<8x128xf32>
    %cst_86 = arith.constant 5.000000e-01 : f32
    %264 = vector.broadcast %cst_86 : f32 to vector<8x128xf32>
    %265 = arith.mulf %264, %263 : vector<8x128xf32>
    %266 = math.tanh %265 : vector<8x128xf32>
    %cst_87 = arith.constant 1.000000e+00 : f32
    %267 = vector.broadcast %cst_87 : f32 to vector<8x128xf32>
    %268 = arith.addf %266, %267 : vector<8x128xf32>
    %cst_88 = arith.constant 5.000000e-01 : f32
    %269 = vector.broadcast %cst_88 : f32 to vector<8x128xf32>
    %270 = arith.mulf %269, %268 : vector<8x128xf32>
    %271 = vector.extract_strided_slice %247 {offsets = [0, 256], sizes = [8, 128], strides = [1, 1]} : vector<8x384xf32> to vector<8x128xf32>
    %272 = vector.extract_strided_slice %250 {offsets = [0, 256], sizes = [8, 128], strides = [1, 1]} : vector<8x384xf32> to vector<8x128xf32>
    %273 = arith.mulf %260, %272 : vector<8x128xf32>
    %274 = arith.addf %271, %273 : vector<8x128xf32>
    %275 = math.tanh %274 : vector<8x128xf32>
    %cst_89 = arith.constant 1.000000e+00 : f32
    %276 = vector.broadcast %cst_89 : f32 to vector<8x128xf32>
    %277 = arith.subf %276, %270 : vector<8x128xf32>
    %278 = arith.mulf %277, %275 : vector<8x128xf32>
    %279 = arith.mulf %270, %242 : vector<8x128xf32>
    %280 = arith.addf %278, %279 : vector<8x128xf32>
    %281 = arith.index_cast %245 : i32 to index
    %c0_90 = arith.constant 0 : index
    %282 = vector.load %arg13[%281, %c0_90] : memref<64x128xf32, #tpu.memory_space<vmem>>, vector<8x128xf32>
    tpu.vector_store %arg13[%281, %c0_90], %280 {strides = array<i32>} : memref<64x128xf32, #tpu.memory_space<vmem>>, vector<8x128xf32>,
    %c7_i32 = arith.constant 7 : i32
    %c8_i32_91 = arith.constant 8 : i32
    %283 = arith.muli %c7_i32, %c8_i32_91 : i32
    %284 = arith.index_cast %283 : i32 to index
    %c0_92 = arith.constant 0 : index
    %285 = vector.load %arg12[%284, %c0_92] : memref<64x384xf32, #tpu.memory_space<vmem>>, vector<8x384xf32>
    %cst_93 = arith.constant dense<0.000000e+00> : vector<8x384xf32>
    %286 = tpu.matmul %280, %9, %cst_93 {dimension_numbers = #tpu.dot_dimension_numbers<[1], [0], [0], [1], [0, 0, 1, 1], [], []>} : vector<8x128xf32>, vector<128x384xf32>, vector<8x384xf32> -> vector<8x384xf32>
    %287 = vector.broadcast %11 : vector<1x384xf32> to vector<8x384xf32>
    %288 = arith.addf %286, %287 : vector<8x384xf32>
    %289 = vector.extract_strided_slice %285 {offsets = [0, 0], sizes = [8, 128], strides = [1, 1]} : vector<8x384xf32> to vector<8x128xf32>
    %290 = vector.extract_strided_slice %288 {offsets = [0, 0], sizes = [8, 128], strides = [1, 1]} : vector<8x384xf32> to vector<8x128xf32>
    %291 = arith.addf %289, %290 : vector<8x128xf32>
    %cst_94 = arith.constant 5.000000e-01 : f32
    %292 = vector.broadcast %cst_94 : f32 to vector<8x128xf32>
    %293 = arith.mulf %292, %291 : vector<8x128xf32>
    %294 = math.tanh %293 : vector<8x128xf32>
    %cst_95 = arith.constant 1.000000e+00 : f32
    %295 = vector.broadcast %cst_95 : f32 to vector<8x128xf32>
    %296 = arith.addf %294, %295 : vector<8x128xf32>
    %cst_96 = arith.constant 5.000000e-01 : f32
    %297 = vector.broadcast %cst_96 : f32 to vector<8x128xf32>
    %298 = arith.mulf %297, %296 : vector<8x128xf32>
    %299 = vector.extract_strided_slice %285 {offsets = [0, 128], sizes = [8, 128], strides = [1, 1]} : vector<8x384xf32> to vector<8x128xf32>
    %300 = vector.extract_strided_slice %288 {offsets = [0, 128], sizes = [8, 128], strides = [1, 1]} : vector<8x384xf32> to vector<8x128xf32>
    %301 = arith.addf %299, %300 : vector<8x128xf32>
    %cst_97 = arith.constant 5.000000e-01 : f32
    %302 = vector.broadcast %cst_97 : f32 to vector<8x128xf32>
    %303 = arith.mulf %302, %301 : vector<8x128xf32>
    %304 = math.tanh %303 : vector<8x128xf32>
    %cst_98 = arith.constant 1.000000e+00 : f32
    %305 = vector.broadcast %cst_98 : f32 to vector<8x128xf32>
    %306 = arith.addf %304, %305 : vector<8x128xf32>
    %cst_99 = arith.constant 5.000000e-01 : f32
    %307 = vector.broadcast %cst_99 : f32 to vector<8x128xf32>
    %308 = arith.mulf %307, %306 : vector<8x128xf32>
    %309 = vector.extract_strided_slice %285 {offsets = [0, 256], sizes = [8, 128], strides = [1, 1]} : vector<8x384xf32> to vector<8x128xf32>
    %310 = vector.extract_strided_slice %288 {offsets = [0, 256], sizes = [8, 128], strides = [1, 1]} : vector<8x384xf32> to vector<8x128xf32>
    %311 = arith.mulf %298, %310 : vector<8x128xf32>
    %312 = arith.addf %309, %311 : vector<8x128xf32>
    %313 = math.tanh %312 : vector<8x128xf32>
    %cst_100 = arith.constant 1.000000e+00 : f32
    %314 = vector.broadcast %cst_100 : f32 to vector<8x128xf32>
    %315 = arith.subf %314, %308 : vector<8x128xf32>
    %316 = arith.mulf %315, %313 : vector<8x128xf32>
    %317 = arith.mulf %308, %280 : vector<8x128xf32>
    %318 = arith.addf %316, %317 : vector<8x128xf32>
    %319 = arith.index_cast %283 : i32 to index
    %c0_101 = arith.constant 0 : index
    %320 = vector.load %arg13[%319, %c0_101] : memref<64x128xf32, #tpu.memory_space<vmem>>, vector<8x128xf32>
    tpu.vector_store %arg13[%319, %c0_101], %318 {strides = array<i32>} : memref<64x128xf32, #tpu.memory_space<vmem>>, vector<8x128xf32>,
    %c8_i32_102 = arith.constant 8 : i32
    %c0_103 = arith.constant 0 : index
    %c0_104 = arith.constant 0 : index
    %c0_105 = arith.constant 0 : index
    %321 = vector.load %arg11[%c0_103, %c0_104, %c0_105] : memref<2x8x128xf32, #tpu.memory_space<vmem>>, vector<1x8x128xf32>
    %322 = vector.shape_cast %321 : vector<1x8x128xf32> to vector<8x128xf32>
    %323 = vector.shape_cast %318 : vector<8x128xf32> to vector<1x8x128xf32>
    tpu.vector_store %arg11[%c0_103, %c0_104, %c0_105], %323 {strides = array<i32>} : memref<2x8x128xf32, #tpu.memory_space<vmem>>, vector<1x8x128xf32>,
    %c0_106 = arith.constant 0 : index
    %c0_107 = arith.constant 0 : index
    %324 = vector.load %arg13[%c0_106, %c0_107] : memref<64x128xf32, #tpu.memory_space<vmem>>, vector<64x128xf32>
    %c0_108 = arith.constant 0 : index
    %c0_109 = arith.constant 0 : index
    %325 = vector.load %arg6[%c0_108, %c0_109] : memref<128x384xf32, #tpu.memory_space<vmem>>, vector<128x384xf32>
    %c0_110 = arith.constant 0 : index
    %c0_111 = arith.constant 0 : index
    %326 = vector.load %arg7[%c0_110, %c0_111] : memref<128x384xf32, #tpu.memory_space<vmem>>, vector<128x384xf32>
    %c0_112 = arith.constant 0 : index
    %c0_113 = arith.constant 0 : index
    %327 = vector.load %arg8[%c0_112, %c0_113] : memref<1x384xf32, #tpu.memory_space<vmem>>, vector<1x384xf32>
    %c0_114 = arith.constant 0 : index
    %c0_115 = arith.constant 0 : index
    %328 = vector.load %arg9[%c0_114, %c0_115] : memref<1x384xf32, #tpu.memory_space<vmem>>, vector<1x384xf32>
    %cst_116 = arith.constant dense<0.000000e+00> : vector<64x384xf32>
    %329 = tpu.matmul %324, %325, %cst_116 {dimension_numbers = #tpu.dot_dimension_numbers<[1], [0], [0], [1], [0, 0, 1, 1], [], []>} : vector<64x128xf32>, vector<128x384xf32>, vector<64x384xf32> -> vector<64x384xf32>
    %330 = vector.broadcast %327 : vector<1x384xf32> to vector<64x384xf32>
    %331 = arith.addf %329, %330 : vector<64x384xf32>
    %c0_117 = arith.constant 0 : index
    %c0_118 = arith.constant 0 : index
    %332 = vector.load %arg12[%c0_117, %c0_118] : memref<64x384xf32, #tpu.memory_space<vmem>>, vector<64x384xf32>
    tpu.vector_store %arg12[%c0_117, %c0_118], %331 {strides = array<i32>} : memref<64x384xf32, #tpu.memory_space<vmem>>, vector<64x384xf32>,
    %cst_119 = arith.constant 0.000000e+00 : f32
    %333 = vector.broadcast %cst_119 : f32 to vector<8x128xf32>
    %c0_i32_120 = arith.constant 0 : i32
    %c8_i32_121 = arith.constant 8 : i32
    %334 = arith.muli %c0_i32_120, %c8_i32_121 : i32
    %335 = arith.index_cast %334 : i32 to index
    %c0_122 = arith.constant 0 : index
    %336 = vector.load %arg12[%335, %c0_122] : memref<64x384xf32, #tpu.memory_space<vmem>>, vector<8x384xf32>
    %cst_123 = arith.constant dense<0.000000e+00> : vector<8x384xf32>
    %337 = tpu.matmul %333, %326, %cst_123 {dimension_numbers = #tpu.dot_dimension_numbers<[1], [0], [0], [1], [0, 0, 1, 1], [], []>} : vector<8x128xf32>, vector<128x384xf32>, vector<8x384xf32> -> vector<8x384xf32>
    %338 = vector.broadcast %328 : vector<1x384xf32> to vector<8x384xf32>
    %339 = arith.addf %337, %338 : vector<8x384xf32>
    %340 = vector.extract_strided_slice %336 {offsets = [0, 0], sizes = [8, 128], strides = [1, 1]} : vector<8x384xf32> to vector<8x128xf32>
    %341 = vector.extract_strided_slice %339 {offsets = [0, 0], sizes = [8, 128], strides = [1, 1]} : vector<8x384xf32> to vector<8x128xf32>
    %342 = arith.addf %340, %341 : vector<8x128xf32>
    %cst_124 = arith.constant 5.000000e-01 : f32
    %343 = vector.broadcast %cst_124 : f32 to vector<8x128xf32>
    %344 = arith.mulf %343, %342 : vector<8x128xf32>
    %345 = math.tanh %344 : vector<8x128xf32>
    %cst_125 = arith.constant 1.000000e+00 : f32
    %346 = vector.broadcast %cst_125 : f32 to vector<8x128xf32>
    %347 = arith.addf %345, %346 : vector<8x128xf32>
    %cst_126 = arith.constant 5.000000e-01 : f32
    %348 = vector.broadcast %cst_126 : f32 to vector<8x128xf32>
    %349 = arith.mulf %348, %347 : vector<8x128xf32>
    %350 = vector.extract_strided_slice %336 {offsets = [0, 128], sizes = [8, 128], strides = [1, 1]} : vector<8x384xf32> to vector<8x128xf32>
    %351 = vector.extract_strided_slice %339 {offsets = [0, 128], sizes = [8, 128], strides = [1, 1]} : vector<8x384xf32> to vector<8x128xf32>
    %352 = arith.addf %350, %351 : vector<8x128xf32>
    %cst_127 = arith.constant 5.000000e-01 : f32
    %353 = vector.broadcast %cst_127 : f32 to vector<8x128xf32>
    %354 = arith.mulf %353, %352 : vector<8x128xf32>
    %355 = math.tanh %354 : vector<8x128xf32>
    %cst_128 = arith.constant 1.000000e+00 : f32
    %356 = vector.broadcast %cst_128 : f32 to vector<8x128xf32>
    %357 = arith.addf %355, %356 : vector<8x128xf32>
    %cst_129 = arith.constant 5.000000e-01 : f32
    %358 = vector.broadcast %cst_129 : f32 to vector<8x128xf32>
    %359 = arith.mulf %358, %357 : vector<8x128xf32>
    %360 = vector.extract_strided_slice %336 {offsets = [0, 256], sizes = [8, 128], strides = [1, 1]} : vector<8x384xf32> to vector<8x128xf32>
    %361 = vector.extract_strided_slice %339 {offsets = [0, 256], sizes = [8, 128], strides = [1, 1]} : vector<8x384xf32> to vector<8x128xf32>
    %362 = arith.mulf %349, %361 : vector<8x128xf32>
    %363 = arith.addf %360, %362 : vector<8x128xf32>
    %364 = math.tanh %363 : vector<8x128xf32>
    %cst_130 = arith.constant 1.000000e+00 : f32
    %365 = vector.broadcast %cst_130 : f32 to vector<8x128xf32>
    %366 = arith.subf %365, %359 : vector<8x128xf32>
    %367 = arith.mulf %366, %364 : vector<8x128xf32>
    %368 = arith.mulf %359, %333 : vector<8x128xf32>
    %369 = arith.addf %367, %368 : vector<8x128xf32>
    %370 = arith.index_cast %334 : i32 to index
    %c0_131 = arith.constant 0 : index
    %371 = vector.load %arg10[%370, %c0_131] : memref<64x128xf32, #tpu.memory_space<vmem>>, vector<8x128xf32>
    tpu.vector_store %arg10[%370, %c0_131], %369 {strides = array<i32>} : memref<64x128xf32, #tpu.memory_space<vmem>>, vector<8x128xf32>,
    %c1_i32_132 = arith.constant 1 : i32
    %c8_i32_133 = arith.constant 8 : i32
    %372 = arith.muli %c1_i32_132, %c8_i32_133 : i32
    %373 = arith.index_cast %372 : i32 to index
    %c0_134 = arith.constant 0 : index
    %374 = vector.load %arg12[%373, %c0_134] : memref<64x384xf32, #tpu.memory_space<vmem>>, vector<8x384xf32>
    %cst_135 = arith.constant dense<0.000000e+00> : vector<8x384xf32>
    %375 = tpu.matmul %369, %326, %cst_135 {dimension_numbers = #tpu.dot_dimension_numbers<[1], [0], [0], [1], [0, 0, 1, 1], [], []>} : vector<8x128xf32>, vector<128x384xf32>, vector<8x384xf32> -> vector<8x384xf32>
    %376 = vector.broadcast %328 : vector<1x384xf32> to vector<8x384xf32>
    %377 = arith.addf %375, %376 : vector<8x384xf32>
    %378 = vector.extract_strided_slice %374 {offsets = [0, 0], sizes = [8, 128], strides = [1, 1]} : vector<8x384xf32> to vector<8x128xf32>
    %379 = vector.extract_strided_slice %377 {offsets = [0, 0], sizes = [8, 128], strides = [1, 1]} : vector<8x384xf32> to vector<8x128xf32>
    %380 = arith.addf %378, %379 : vector<8x128xf32>
    %cst_136 = arith.constant 5.000000e-01 : f32
    %381 = vector.broadcast %cst_136 : f32 to vector<8x128xf32>
    %382 = arith.mulf %381, %380 : vector<8x128xf32>
    %383 = math.tanh %382 : vector<8x128xf32>
    %cst_137 = arith.constant 1.000000e+00 : f32
    %384 = vector.broadcast %cst_137 : f32 to vector<8x128xf32>
    %385 = arith.addf %383, %384 : vector<8x128xf32>
    %cst_138 = arith.constant 5.000000e-01 : f32
    %386 = vector.broadcast %cst_138 : f32 to vector<8x128xf32>
    %387 = arith.mulf %386, %385 : vector<8x128xf32>
    %388 = vector.extract_strided_slice %374 {offsets = [0, 128], sizes = [8, 128], strides = [1, 1]} : vector<8x384xf32> to vector<8x128xf32>
    %389 = vector.extract_strided_slice %377 {offsets = [0, 128], sizes = [8, 128], strides = [1, 1]} : vector<8x384xf32> to vector<8x128xf32>
    %390 = arith.addf %388, %389 : vector<8x128xf32>
    %cst_139 = arith.constant 5.000000e-01 : f32
    %391 = vector.broadcast %cst_139 : f32 to vector<8x128xf32>
    %392 = arith.mulf %391, %390 : vector<8x128xf32>
    %393 = math.tanh %392 : vector<8x128xf32>
    %cst_140 = arith.constant 1.000000e+00 : f32
    %394 = vector.broadcast %cst_140 : f32 to vector<8x128xf32>
    %395 = arith.addf %393, %394 : vector<8x128xf32>
    %cst_141 = arith.constant 5.000000e-01 : f32
    %396 = vector.broadcast %cst_141 : f32 to vector<8x128xf32>
    %397 = arith.mulf %396, %395 : vector<8x128xf32>
    %398 = vector.extract_strided_slice %374 {offsets = [0, 256], sizes = [8, 128], strides = [1, 1]} : vector<8x384xf32> to vector<8x128xf32>
    %399 = vector.extract_strided_slice %377 {offsets = [0, 256], sizes = [8, 128], strides = [1, 1]} : vector<8x384xf32> to vector<8x128xf32>
    %400 = arith.mulf %387, %399 : vector<8x128xf32>
    %401 = arith.addf %398, %400 : vector<8x128xf32>
    %402 = math.tanh %401 : vector<8x128xf32>
    %cst_142 = arith.constant 1.000000e+00 : f32
    %403 = vector.broadcast %cst_142 : f32 to vector<8x128xf32>
    %404 = arith.subf %403, %397 : vector<8x128xf32>
    %405 = arith.mulf %404, %402 : vector<8x128xf32>
    %406 = arith.mulf %397, %369 : vector<8x128xf32>
    %407 = arith.addf %405, %406 : vector<8x128xf32>
    %408 = arith.index_cast %372 : i32 to index
    %c0_143 = arith.constant 0 : index
    %409 = vector.load %arg10[%408, %c0_143] : memref<64x128xf32, #tpu.memory_space<vmem>>, vector<8x128xf32>
    tpu.vector_store %arg10[%408, %c0_143], %407 {strides = array<i32>} : memref<64x128xf32, #tpu.memory_space<vmem>>, vector<8x128xf32>,
    %c2_i32_144 = arith.constant 2 : i32
    %c8_i32_145 = arith.constant 8 : i32
    %410 = arith.muli %c2_i32_144, %c8_i32_145 : i32
    %411 = arith.index_cast %410 : i32 to index
    %c0_146 = arith.constant 0 : index
    %412 = vector.load %arg12[%411, %c0_146] : memref<64x384xf32, #tpu.memory_space<vmem>>, vector<8x384xf32>
    %cst_147 = arith.constant dense<0.000000e+00> : vector<8x384xf32>
    %413 = tpu.matmul %407, %326, %cst_147 {dimension_numbers = #tpu.dot_dimension_numbers<[1], [0], [0], [1], [0, 0, 1, 1], [], []>} : vector<8x128xf32>, vector<128x384xf32>, vector<8x384xf32> -> vector<8x384xf32>
    %414 = vector.broadcast %328 : vector<1x384xf32> to vector<8x384xf32>
    %415 = arith.addf %413, %414 : vector<8x384xf32>
    %416 = vector.extract_strided_slice %412 {offsets = [0, 0], sizes = [8, 128], strides = [1, 1]} : vector<8x384xf32> to vector<8x128xf32>
    %417 = vector.extract_strided_slice %415 {offsets = [0, 0], sizes = [8, 128], strides = [1, 1]} : vector<8x384xf32> to vector<8x128xf32>
    %418 = arith.addf %416, %417 : vector<8x128xf32>
    %cst_148 = arith.constant 5.000000e-01 : f32
    %419 = vector.broadcast %cst_148 : f32 to vector<8x128xf32>
    %420 = arith.mulf %419, %418 : vector<8x128xf32>
    %421 = math.tanh %420 : vector<8x128xf32>
    %cst_149 = arith.constant 1.000000e+00 : f32
    %422 = vector.broadcast %cst_149 : f32 to vector<8x128xf32>
    %423 = arith.addf %421, %422 : vector<8x128xf32>
    %cst_150 = arith.constant 5.000000e-01 : f32
    %424 = vector.broadcast %cst_150 : f32 to vector<8x128xf32>
    %425 = arith.mulf %424, %423 : vector<8x128xf32>
    %426 = vector.extract_strided_slice %412 {offsets = [0, 128], sizes = [8, 128], strides = [1, 1]} : vector<8x384xf32> to vector<8x128xf32>
    %427 = vector.extract_strided_slice %415 {offsets = [0, 128], sizes = [8, 128], strides = [1, 1]} : vector<8x384xf32> to vector<8x128xf32>
    %428 = arith.addf %426, %427 : vector<8x128xf32>
    %cst_151 = arith.constant 5.000000e-01 : f32
    %429 = vector.broadcast %cst_151 : f32 to vector<8x128xf32>
    %430 = arith.mulf %429, %428 : vector<8x128xf32>
    %431 = math.tanh %430 : vector<8x128xf32>
    %cst_152 = arith.constant 1.000000e+00 : f32
    %432 = vector.broadcast %cst_152 : f32 to vector<8x128xf32>
    %433 = arith.addf %431, %432 : vector<8x128xf32>
    %cst_153 = arith.constant 5.000000e-01 : f32
    %434 = vector.broadcast %cst_153 : f32 to vector<8x128xf32>
    %435 = arith.mulf %434, %433 : vector<8x128xf32>
    %436 = vector.extract_strided_slice %412 {offsets = [0, 256], sizes = [8, 128], strides = [1, 1]} : vector<8x384xf32> to vector<8x128xf32>
    %437 = vector.extract_strided_slice %415 {offsets = [0, 256], sizes = [8, 128], strides = [1, 1]} : vector<8x384xf32> to vector<8x128xf32>
    %438 = arith.mulf %425, %437 : vector<8x128xf32>
    %439 = arith.addf %436, %438 : vector<8x128xf32>
    %440 = math.tanh %439 : vector<8x128xf32>
    %cst_154 = arith.constant 1.000000e+00 : f32
    %441 = vector.broadcast %cst_154 : f32 to vector<8x128xf32>
    %442 = arith.subf %441, %435 : vector<8x128xf32>
    %443 = arith.mulf %442, %440 : vector<8x128xf32>
    %444 = arith.mulf %435, %407 : vector<8x128xf32>
    %445 = arith.addf %443, %444 : vector<8x128xf32>
    %446 = arith.index_cast %410 : i32 to index
    %c0_155 = arith.constant 0 : index
    %447 = vector.load %arg10[%446, %c0_155] : memref<64x128xf32, #tpu.memory_space<vmem>>, vector<8x128xf32>
    tpu.vector_store %arg10[%446, %c0_155], %445 {strides = array<i32>} : memref<64x128xf32, #tpu.memory_space<vmem>>, vector<8x128xf32>,
    %c3_i32_156 = arith.constant 3 : i32
    %c8_i32_157 = arith.constant 8 : i32
    %448 = arith.muli %c3_i32_156, %c8_i32_157 : i32
    %449 = arith.index_cast %448 : i32 to index
    %c0_158 = arith.constant 0 : index
    %450 = vector.load %arg12[%449, %c0_158] : memref<64x384xf32, #tpu.memory_space<vmem>>, vector<8x384xf32>
    %cst_159 = arith.constant dense<0.000000e+00> : vector<8x384xf32>
    %451 = tpu.matmul %445, %326, %cst_159 {dimension_numbers = #tpu.dot_dimension_numbers<[1], [0], [0], [1], [0, 0, 1, 1], [], []>} : vector<8x128xf32>, vector<128x384xf32>, vector<8x384xf32> -> vector<8x384xf32>
    %452 = vector.broadcast %328 : vector<1x384xf32> to vector<8x384xf32>
    %453 = arith.addf %451, %452 : vector<8x384xf32>
    %454 = vector.extract_strided_slice %450 {offsets = [0, 0], sizes = [8, 128], strides = [1, 1]} : vector<8x384xf32> to vector<8x128xf32>
    %455 = vector.extract_strided_slice %453 {offsets = [0, 0], sizes = [8, 128], strides = [1, 1]} : vector<8x384xf32> to vector<8x128xf32>
    %456 = arith.addf %454, %455 : vector<8x128xf32>
    %cst_160 = arith.constant 5.000000e-01 : f32
    %457 = vector.broadcast %cst_160 : f32 to vector<8x128xf32>
    %458 = arith.mulf %457, %456 : vector<8x128xf32>
    %459 = math.tanh %458 : vector<8x128xf32>
    %cst_161 = arith.constant 1.000000e+00 : f32
    %460 = vector.broadcast %cst_161 : f32 to vector<8x128xf32>
    %461 = arith.addf %459, %460 : vector<8x128xf32>
    %cst_162 = arith.constant 5.000000e-01 : f32
    %462 = vector.broadcast %cst_162 : f32 to vector<8x128xf32>
    %463 = arith.mulf %462, %461 : vector<8x128xf32>
    %464 = vector.extract_strided_slice %450 {offsets = [0, 128], sizes = [8, 128], strides = [1, 1]} : vector<8x384xf32> to vector<8x128xf32>
    %465 = vector.extract_strided_slice %453 {offsets = [0, 128], sizes = [8, 128], strides = [1, 1]} : vector<8x384xf32> to vector<8x128xf32>
    %466 = arith.addf %464, %465 : vector<8x128xf32>
    %cst_163 = arith.constant 5.000000e-01 : f32
    %467 = vector.broadcast %cst_163 : f32 to vector<8x128xf32>
    %468 = arith.mulf %467, %466 : vector<8x128xf32>
    %469 = math.tanh %468 : vector<8x128xf32>
    %cst_164 = arith.constant 1.000000e+00 : f32
    %470 = vector.broadcast %cst_164 : f32 to vector<8x128xf32>
    %471 = arith.addf %469, %470 : vector<8x128xf32>
    %cst_165 = arith.constant 5.000000e-01 : f32
    %472 = vector.broadcast %cst_165 : f32 to vector<8x128xf32>
    %473 = arith.mulf %472, %471 : vector<8x128xf32>
    %474 = vector.extract_strided_slice %450 {offsets = [0, 256], sizes = [8, 128], strides = [1, 1]} : vector<8x384xf32> to vector<8x128xf32>
    %475 = vector.extract_strided_slice %453 {offsets = [0, 256], sizes = [8, 128], strides = [1, 1]} : vector<8x384xf32> to vector<8x128xf32>
    %476 = arith.mulf %463, %475 : vector<8x128xf32>
    %477 = arith.addf %474, %476 : vector<8x128xf32>
    %478 = math.tanh %477 : vector<8x128xf32>
    %cst_166 = arith.constant 1.000000e+00 : f32
    %479 = vector.broadcast %cst_166 : f32 to vector<8x128xf32>
    %480 = arith.subf %479, %473 : vector<8x128xf32>
    %481 = arith.mulf %480, %478 : vector<8x128xf32>
    %482 = arith.mulf %473, %445 : vector<8x128xf32>
    %483 = arith.addf %481, %482 : vector<8x128xf32>
    %484 = arith.index_cast %448 : i32 to index
    %c0_167 = arith.constant 0 : index
    %485 = vector.load %arg10[%484, %c0_167] : memref<64x128xf32, #tpu.memory_space<vmem>>, vector<8x128xf32>
    tpu.vector_store %arg10[%484, %c0_167], %483 {strides = array<i32>} : memref<64x128xf32, #tpu.memory_space<vmem>>, vector<8x128xf32>,
    %c4_i32_168 = arith.constant 4 : i32
    %c8_i32_169 = arith.constant 8 : i32
    %486 = arith.muli %c4_i32_168, %c8_i32_169 : i32
    %487 = arith.index_cast %486 : i32 to index
    %c0_170 = arith.constant 0 : index
    %488 = vector.load %arg12[%487, %c0_170] : memref<64x384xf32, #tpu.memory_space<vmem>>, vector<8x384xf32>
    %cst_171 = arith.constant dense<0.000000e+00> : vector<8x384xf32>
    %489 = tpu.matmul %483, %326, %cst_171 {dimension_numbers = #tpu.dot_dimension_numbers<[1], [0], [0], [1], [0, 0, 1, 1], [], []>} : vector<8x128xf32>, vector<128x384xf32>, vector<8x384xf32> -> vector<8x384xf32>
    %490 = vector.broadcast %328 : vector<1x384xf32> to vector<8x384xf32>
    %491 = arith.addf %489, %490 : vector<8x384xf32>
    %492 = vector.extract_strided_slice %488 {offsets = [0, 0], sizes = [8, 128], strides = [1, 1]} : vector<8x384xf32> to vector<8x128xf32>
    %493 = vector.extract_strided_slice %491 {offsets = [0, 0], sizes = [8, 128], strides = [1, 1]} : vector<8x384xf32> to vector<8x128xf32>
    %494 = arith.addf %492, %493 : vector<8x128xf32>
    %cst_172 = arith.constant 5.000000e-01 : f32
    %495 = vector.broadcast %cst_172 : f32 to vector<8x128xf32>
    %496 = arith.mulf %495, %494 : vector<8x128xf32>
    %497 = math.tanh %496 : vector<8x128xf32>
    %cst_173 = arith.constant 1.000000e+00 : f32
    %498 = vector.broadcast %cst_173 : f32 to vector<8x128xf32>
    %499 = arith.addf %497, %498 : vector<8x128xf32>
    %cst_174 = arith.constant 5.000000e-01 : f32
    %500 = vector.broadcast %cst_174 : f32 to vector<8x128xf32>
    %501 = arith.mulf %500, %499 : vector<8x128xf32>
    %502 = vector.extract_strided_slice %488 {offsets = [0, 128], sizes = [8, 128], strides = [1, 1]} : vector<8x384xf32> to vector<8x128xf32>
    %503 = vector.extract_strided_slice %491 {offsets = [0, 128], sizes = [8, 128], strides = [1, 1]} : vector<8x384xf32> to vector<8x128xf32>
    %504 = arith.addf %502, %503 : vector<8x128xf32>
    %cst_175 = arith.constant 5.000000e-01 : f32
    %505 = vector.broadcast %cst_175 : f32 to vector<8x128xf32>
    %506 = arith.mulf %505, %504 : vector<8x128xf32>
    %507 = math.tanh %506 : vector<8x128xf32>
    %cst_176 = arith.constant 1.000000e+00 : f32
    %508 = vector.broadcast %cst_176 : f32 to vector<8x128xf32>
    %509 = arith.addf %507, %508 : vector<8x128xf32>
    %cst_177 = arith.constant 5.000000e-01 : f32
    %510 = vector.broadcast %cst_177 : f32 to vector<8x128xf32>
    %511 = arith.mulf %510, %509 : vector<8x128xf32>
    %512 = vector.extract_strided_slice %488 {offsets = [0, 256], sizes = [8, 128], strides = [1, 1]} : vector<8x384xf32> to vector<8x128xf32>
    %513 = vector.extract_strided_slice %491 {offsets = [0, 256], sizes = [8, 128], strides = [1, 1]} : vector<8x384xf32> to vector<8x128xf32>
    %514 = arith.mulf %501, %513 : vector<8x128xf32>
    %515 = arith.addf %512, %514 : vector<8x128xf32>
    %516 = math.tanh %515 : vector<8x128xf32>
    %cst_178 = arith.constant 1.000000e+00 : f32
    %517 = vector.broadcast %cst_178 : f32 to vector<8x128xf32>
    %518 = arith.subf %517, %511 : vector<8x128xf32>
    %519 = arith.mulf %518, %516 : vector<8x128xf32>
    %520 = arith.mulf %511, %483 : vector<8x128xf32>
    %521 = arith.addf %519, %520 : vector<8x128xf32>
    %522 = arith.index_cast %486 : i32 to index
    %c0_179 = arith.constant 0 : index
    %523 = vector.load %arg10[%522, %c0_179] : memref<64x128xf32, #tpu.memory_space<vmem>>, vector<8x128xf32>
    tpu.vector_store %arg10[%522, %c0_179], %521 {strides = array<i32>} : memref<64x128xf32, #tpu.memory_space<vmem>>, vector<8x128xf32>,
    %c5_i32_180 = arith.constant 5 : i32
    %c8_i32_181 = arith.constant 8 : i32
    %524 = arith.muli %c5_i32_180, %c8_i32_181 : i32
    %525 = arith.index_cast %524 : i32 to index
    %c0_182 = arith.constant 0 : index
    %526 = vector.load %arg12[%525, %c0_182] : memref<64x384xf32, #tpu.memory_space<vmem>>, vector<8x384xf32>
    %cst_183 = arith.constant dense<0.000000e+00> : vector<8x384xf32>
    %527 = tpu.matmul %521, %326, %cst_183 {dimension_numbers = #tpu.dot_dimension_numbers<[1], [0], [0], [1], [0, 0, 1, 1], [], []>} : vector<8x128xf32>, vector<128x384xf32>, vector<8x384xf32> -> vector<8x384xf32>
    %528 = vector.broadcast %328 : vector<1x384xf32> to vector<8x384xf32>
    %529 = arith.addf %527, %528 : vector<8x384xf32>
    %530 = vector.extract_strided_slice %526 {offsets = [0, 0], sizes = [8, 128], strides = [1, 1]} : vector<8x384xf32> to vector<8x128xf32>
    %531 = vector.extract_strided_slice %529 {offsets = [0, 0], sizes = [8, 128], strides = [1, 1]} : vector<8x384xf32> to vector<8x128xf32>
    %532 = arith.addf %530, %531 : vector<8x128xf32>
    %cst_184 = arith.constant 5.000000e-01 : f32
    %533 = vector.broadcast %cst_184 : f32 to vector<8x128xf32>
    %534 = arith.mulf %533, %532 : vector<8x128xf32>
    %535 = math.tanh %534 : vector<8x128xf32>
    %cst_185 = arith.constant 1.000000e+00 : f32
    %536 = vector.broadcast %cst_185 : f32 to vector<8x128xf32>
    %537 = arith.addf %535, %536 : vector<8x128xf32>
    %cst_186 = arith.constant 5.000000e-01 : f32
    %538 = vector.broadcast %cst_186 : f32 to vector<8x128xf32>
    %539 = arith.mulf %538, %537 : vector<8x128xf32>
    %540 = vector.extract_strided_slice %526 {offsets = [0, 128], sizes = [8, 128], strides = [1, 1]} : vector<8x384xf32> to vector<8x128xf32>
    %541 = vector.extract_strided_slice %529 {offsets = [0, 128], sizes = [8, 128], strides = [1, 1]} : vector<8x384xf32> to vector<8x128xf32>
    %542 = arith.addf %540, %541 : vector<8x128xf32>
    %cst_187 = arith.constant 5.000000e-01 : f32
    %543 = vector.broadcast %cst_187 : f32 to vector<8x128xf32>
    %544 = arith.mulf %543, %542 : vector<8x128xf32>
    %545 = math.tanh %544 : vector<8x128xf32>
    %cst_188 = arith.constant 1.000000e+00 : f32
    %546 = vector.broadcast %cst_188 : f32 to vector<8x128xf32>
    %547 = arith.addf %545, %546 : vector<8x128xf32>
    %cst_189 = arith.constant 5.000000e-01 : f32
    %548 = vector.broadcast %cst_189 : f32 to vector<8x128xf32>
    %549 = arith.mulf %548, %547 : vector<8x128xf32>
    %550 = vector.extract_strided_slice %526 {offsets = [0, 256], sizes = [8, 128], strides = [1, 1]} : vector<8x384xf32> to vector<8x128xf32>
    %551 = vector.extract_strided_slice %529 {offsets = [0, 256], sizes = [8, 128], strides = [1, 1]} : vector<8x384xf32> to vector<8x128xf32>
    %552 = arith.mulf %539, %551 : vector<8x128xf32>
    %553 = arith.addf %550, %552 : vector<8x128xf32>
    %554 = math.tanh %553 : vector<8x128xf32>
    %cst_190 = arith.constant 1.000000e+00 : f32
    %555 = vector.broadcast %cst_190 : f32 to vector<8x128xf32>
    %556 = arith.subf %555, %549 : vector<8x128xf32>
    %557 = arith.mulf %556, %554 : vector<8x128xf32>
    %558 = arith.mulf %549, %521 : vector<8x128xf32>
    %559 = arith.addf %557, %558 : vector<8x128xf32>
    %560 = arith.index_cast %524 : i32 to index
    %c0_191 = arith.constant 0 : index
    %561 = vector.load %arg10[%560, %c0_191] : memref<64x128xf32, #tpu.memory_space<vmem>>, vector<8x128xf32>
    tpu.vector_store %arg10[%560, %c0_191], %559 {strides = array<i32>} : memref<64x128xf32, #tpu.memory_space<vmem>>, vector<8x128xf32>,
    %c6_i32_192 = arith.constant 6 : i32
    %c8_i32_193 = arith.constant 8 : i32
    %562 = arith.muli %c6_i32_192, %c8_i32_193 : i32
    %563 = arith.index_cast %562 : i32 to index
    %c0_194 = arith.constant 0 : index
    %564 = vector.load %arg12[%563, %c0_194] : memref<64x384xf32, #tpu.memory_space<vmem>>, vector<8x384xf32>
    %cst_195 = arith.constant dense<0.000000e+00> : vector<8x384xf32>
    %565 = tpu.matmul %559, %326, %cst_195 {dimension_numbers = #tpu.dot_dimension_numbers<[1], [0], [0], [1], [0, 0, 1, 1], [], []>} : vector<8x128xf32>, vector<128x384xf32>, vector<8x384xf32> -> vector<8x384xf32>
    %566 = vector.broadcast %328 : vector<1x384xf32> to vector<8x384xf32>
    %567 = arith.addf %565, %566 : vector<8x384xf32>
    %568 = vector.extract_strided_slice %564 {offsets = [0, 0], sizes = [8, 128], strides = [1, 1]} : vector<8x384xf32> to vector<8x128xf32>
    %569 = vector.extract_strided_slice %567 {offsets = [0, 0], sizes = [8, 128], strides = [1, 1]} : vector<8x384xf32> to vector<8x128xf32>
    %570 = arith.addf %568, %569 : vector<8x128xf32>
    %cst_196 = arith.constant 5.000000e-01 : f32
    %571 = vector.broadcast %cst_196 : f32 to vector<8x128xf32>
    %572 = arith.mulf %571, %570 : vector<8x128xf32>
    %573 = math.tanh %572 : vector<8x128xf32>
    %cst_197 = arith.constant 1.000000e+00 : f32
    %574 = vector.broadcast %cst_197 : f32 to vector<8x128xf32>
    %575 = arith.addf %573, %574 : vector<8x128xf32>
    %cst_198 = arith.constant 5.000000e-01 : f32
    %576 = vector.broadcast %cst_198 : f32 to vector<8x128xf32>
    %577 = arith.mulf %576, %575 : vector<8x128xf32>
    %578 = vector.extract_strided_slice %564 {offsets = [0, 128], sizes = [8, 128], strides = [1, 1]} : vector<8x384xf32> to vector<8x128xf32>
    %579 = vector.extract_strided_slice %567 {offsets = [0, 128], sizes = [8, 128], strides = [1, 1]} : vector<8x384xf32> to vector<8x128xf32>
    %580 = arith.addf %578, %579 : vector<8x128xf32>
    %cst_199 = arith.constant 5.000000e-01 : f32
    %581 = vector.broadcast %cst_199 : f32 to vector<8x128xf32>
    %582 = arith.mulf %581, %580 : vector<8x128xf32>
    %583 = math.tanh %582 : vector<8x128xf32>
    %cst_200 = arith.constant 1.000000e+00 : f32
    %584 = vector.broadcast %cst_200 : f32 to vector<8x128xf32>
    %585 = arith.addf %583, %584 : vector<8x128xf32>
    %cst_201 = arith.constant 5.000000e-01 : f32
    %586 = vector.broadcast %cst_201 : f32 to vector<8x128xf32>
    %587 = arith.mulf %586, %585 : vector<8x128xf32>
    %588 = vector.extract_strided_slice %564 {offsets = [0, 256], sizes = [8, 128], strides = [1, 1]} : vector<8x384xf32> to vector<8x128xf32>
    %589 = vector.extract_strided_slice %567 {offsets = [0, 256], sizes = [8, 128], strides = [1, 1]} : vector<8x384xf32> to vector<8x128xf32>
    %590 = arith.mulf %577, %589 : vector<8x128xf32>
    %591 = arith.addf %588, %590 : vector<8x128xf32>
    %592 = math.tanh %591 : vector<8x128xf32>
    %cst_202 = arith.constant 1.000000e+00 : f32
    %593 = vector.broadcast %cst_202 : f32 to vector<8x128xf32>
    %594 = arith.subf %593, %587 : vector<8x128xf32>
    %595 = arith.mulf %594, %592 : vector<8x128xf32>
    %596 = arith.mulf %587, %559 : vector<8x128xf32>
    %597 = arith.addf %595, %596 : vector<8x128xf32>
    %598 = arith.index_cast %562 : i32 to index
    %c0_203 = arith.constant 0 : index
    %599 = vector.load %arg10[%598, %c0_203] : memref<64x128xf32, #tpu.memory_space<vmem>>, vector<8x128xf32>
    tpu.vector_store %arg10[%598, %c0_203], %597 {strides = array<i32>} : memref<64x128xf32, #tpu.memory_space<vmem>>, vector<8x128xf32>,
    %c7_i32_204 = arith.constant 7 : i32
    %c8_i32_205 = arith.constant 8 : i32
    %600 = arith.muli %c7_i32_204, %c8_i32_205 : i32
    %601 = arith.index_cast %600 : i32 to index
    %c0_206 = arith.constant 0 : index
    %602 = vector.load %arg12[%601, %c0_206] : memref<64x384xf32, #tpu.memory_space<vmem>>, vector<8x384xf32>
    %cst_207 = arith.constant dense<0.000000e+00> : vector<8x384xf32>
    %603 = tpu.matmul %597, %326, %cst_207 {dimension_numbers = #tpu.dot_dimension_numbers<[1], [0], [0], [1], [0, 0, 1, 1], [], []>} : vector<8x128xf32>, vector<128x384xf32>, vector<8x384xf32> -> vector<8x384xf32>
    %604 = vector.broadcast %328 : vector<1x384xf32> to vector<8x384xf32>
    %605 = arith.addf %603, %604 : vector<8x384xf32>
    %606 = vector.extract_strided_slice %602 {offsets = [0, 0], sizes = [8, 128], strides = [1, 1]} : vector<8x384xf32> to vector<8x128xf32>
    %607 = vector.extract_strided_slice %605 {offsets = [0, 0], sizes = [8, 128], strides = [1, 1]} : vector<8x384xf32> to vector<8x128xf32>
    %608 = arith.addf %606, %607 : vector<8x128xf32>
    %cst_208 = arith.constant 5.000000e-01 : f32
    %609 = vector.broadcast %cst_208 : f32 to vector<8x128xf32>
    %610 = arith.mulf %609, %608 : vector<8x128xf32>
    %611 = math.tanh %610 : vector<8x128xf32>
    %cst_209 = arith.constant 1.000000e+00 : f32
    %612 = vector.broadcast %cst_209 : f32 to vector<8x128xf32>
    %613 = arith.addf %611, %612 : vector<8x128xf32>
    %cst_210 = arith.constant 5.000000e-01 : f32
    %614 = vector.broadcast %cst_210 : f32 to vector<8x128xf32>
    %615 = arith.mulf %614, %613 : vector<8x128xf32>
    %616 = vector.extract_strided_slice %602 {offsets = [0, 128], sizes = [8, 128], strides = [1, 1]} : vector<8x384xf32> to vector<8x128xf32>
    %617 = vector.extract_strided_slice %605 {offsets = [0, 128], sizes = [8, 128], strides = [1, 1]} : vector<8x384xf32> to vector<8x128xf32>
    %618 = arith.addf %616, %617 : vector<8x128xf32>
    %cst_211 = arith.constant 5.000000e-01 : f32
    %619 = vector.broadcast %cst_211 : f32 to vector<8x128xf32>
    %620 = arith.mulf %619, %618 : vector<8x128xf32>
    %621 = math.tanh %620 : vector<8x128xf32>
    %cst_212 = arith.constant 1.000000e+00 : f32
    %622 = vector.broadcast %cst_212 : f32 to vector<8x128xf32>
    %623 = arith.addf %621, %622 : vector<8x128xf32>
    %cst_213 = arith.constant 5.000000e-01 : f32
    %624 = vector.broadcast %cst_213 : f32 to vector<8x128xf32>
    %625 = arith.mulf %624, %623 : vector<8x128xf32>
    %626 = vector.extract_strided_slice %602 {offsets = [0, 256], sizes = [8, 128], strides = [1, 1]} : vector<8x384xf32> to vector<8x128xf32>
    %627 = vector.extract_strided_slice %605 {offsets = [0, 256], sizes = [8, 128], strides = [1, 1]} : vector<8x384xf32> to vector<8x128xf32>
    %628 = arith.mulf %615, %627 : vector<8x128xf32>
    %629 = arith.addf %626, %628 : vector<8x128xf32>
    %630 = math.tanh %629 : vector<8x128xf32>
    %cst_214 = arith.constant 1.000000e+00 : f32
    %631 = vector.broadcast %cst_214 : f32 to vector<8x128xf32>
    %632 = arith.subf %631, %625 : vector<8x128xf32>
    %633 = arith.mulf %632, %630 : vector<8x128xf32>
    %634 = arith.mulf %625, %597 : vector<8x128xf32>
    %635 = arith.addf %633, %634 : vector<8x128xf32>
    %636 = arith.index_cast %600 : i32 to index
    %c0_215 = arith.constant 0 : index
    %637 = vector.load %arg10[%636, %c0_215] : memref<64x128xf32, #tpu.memory_space<vmem>>, vector<8x128xf32>
    tpu.vector_store %arg10[%636, %c0_215], %635 {strides = array<i32>} : memref<64x128xf32, #tpu.memory_space<vmem>>, vector<8x128xf32>,
    %c8_i32_216 = arith.constant 8 : i32
    %c1 = arith.constant 1 : index
    %c0_217 = arith.constant 0 : index
    %c0_218 = arith.constant 0 : index
    %638 = vector.load %arg11[%c1, %c0_217, %c0_218] : memref<2x8x128xf32, #tpu.memory_space<vmem>>, vector<1x8x128xf32>
    %639 = vector.shape_cast %638 : vector<1x8x128xf32> to vector<8x128xf32>
    %640 = vector.shape_cast %635 : vector<8x128xf32> to vector<1x8x128xf32>
    tpu.vector_store %arg11[%c1, %c0_217, %c0_218], %640 {strides = array<i32>} : memref<2x8x128xf32, #tpu.memory_space<vmem>>, vector<1x8x128xf32>,
    return
  }
}

</mosaic_0001>

<bundles_post_ra>
// kernel: tpu_custom_call.1
= control target key start
LH: loop header
LB: loop body
LE: loop exit
PB: predicated region body
PF: predicated region fallthrough
CT: control target
= control target key end

     0   :  { %17 = vsyncpa [#allocation5], 0  ;;  %s3990_s0 = inlined_call_operand.vmem [shape: s32[64,1], index: 0, kind: input, shape index: {}]   ;;  %s3991_s1 = inlined_call_operand.hbm [shape: f32[128,128], index: 1, kind: input, shape index: {}]   ;;  %s3992_s2 = inlined_call_operand.hbm [shape: f32[128,384], index: 2, kind: input, shape index: {}]   ;;  %s3993_s3 = inlined_call_operand.hbm [shape: f32[128,384], index: 3, kind: input, shape index: {}]   ;;  %s3994_s4 = inlined_call_operand.vmem [shape: f32[1,384], index: 4, kind: input, shape index: {}]   ;;  %s3995_s5 = inlined_call_operand.vmem [shape: f32[1,384], index: 5, kind: input, shape index: {}]   ;;  %s3996_s6 = inlined_call_operand.hbm [shape: f32[128,384], index: 6, kind: input, shape index: {}]   ;;  %s3997_s7 = inlined_call_operand.hbm [shape: f32[128,384], index: 7, kind: input, shape index: {}]   ;;  %s3998_s8 = inlined_call_operand.vmem [shape: f32[1,384], index: 8, kind: input, shape index: {}]   ;;  %s3999_s9 = inlined_call_operand.vmem [shape: f32[1,384], index: 9, kind: input, shape index: {}]   ;;  %s4000_s10 = inlined_call_operand.hbm [shape: f32[64,128], index: 10, kind: output, shape index: {0}]   ;;  %s4001_s11 = inlined_call_operand.hbm [shape: f32[2,8,128], index: 11, kind: output, shape index: {1}]  }
   0x1   :  { %18 = vsyncpa [#allocation8], 0 }
   0x2   :  { %19 = vsyncpa [#allocation11], 0 }
   0x3   :  { %20 = vsyncpa [#allocation6], 0  ;;  %s41_s19 = sshll.u32 %s3992_s2, 4  ;;  %s42_s19 = int_to_ptr.hbm [resolvable:$true] %s41_s19 }
   0x4   :  { %21 = vsyncpa [#allocation15], 0  ;;  %s2483_s20 = smov [#allocation7]   ;;  %s71_s24 = sshll.u32 %s3996_s6, 4  ;;  %s72_s24 = int_to_ptr.hbm [resolvable:$true] %s71_s24 }
   0x5   :  { %s43_s21 = sshll.u32 %s2483_s20, 4  ;;  %s2484_s25 = smov 384   ;;  %s44_s21 = int_to_ptr.vmem [resolvable:$true] %s43_s21 }
   0x6   :  { %s2485_s26 = smov 24   ;;  %s2486_s27 = smov [#allocation10]  }
   0x7   :  { %49 = dma.hbm_to_vmem [thread:$0]  %s42_s19, 6144, %s44_s21, [#allocation8], %s2484_s25, %s2484_s25, %s2485_s26  }
   0x8   :  { %s73_s28 = sshll.u32 %s2486_s27, 4  ;;  %s28_s30 = sshll.u32 %s3991_s1, 4  ;;  %s74_s28 = int_to_ptr.vmem [resolvable:$true] %s73_s28  ;;  %s29_s30 = int_to_ptr.hbm [resolvable:$true] %s28_s30 }
   0x9   :  { %79 = dma.hbm_to_vmem [thread:$0]  %s72_s24, 6144, %s74_s28, [#allocation11], %s2484_s25, %s2484_s25, %s2485_s26  }
   0xa   :  { %s2487_s6 = smov [#allocation4]   ;;  %s54_s15 = sshll.u32 %s3993_s3, 4  ;;  %s55_s15 = int_to_ptr.hbm [resolvable:$true] %s54_s15 }
   0xb   :  { %s30_s12 = sshll.u32 %s2487_s6, 4  ;;  %s2488_s16 = smov 128   ;;  %s31_s12 = int_to_ptr.vmem [resolvable:$true] %s30_s12 }
   0xc   :  { %s2489_s17 = smov 8   ;;  %s2490_s1 = smov [#allocation9]  }
   0xd   :  { %36 = dma.hbm_to_vmem [thread:$0]  %s29_s30, 2048, %s31_s12, [#allocation5], %s2488_s16, %s2488_s16, %s2489_s17  }
   0xe   :  { %s56_s18 = sshll.u32 %s2490_s1, 4  ;;  %s84_s21 = sshll.u32 %s3997_s7, 4  ;;  %s57_s18 = int_to_ptr.vmem [resolvable:$true] %s56_s18  ;;  %s85_s21 = int_to_ptr.hbm [resolvable:$true] %s84_s21 }
   0xf   :  { %62 = dma.hbm_to_vmem [thread:$0]  %s55_s15, 6144, %s57_s18, [#allocation8], %s2484_s25, %s2484_s25, %s2485_s26  }
  0x10   :  { %s2491_s3 = smov [#allocation12]  }
  0x11   :  { %s86_s22 = sshll.u32 %s2491_s3, 4  ;;  %s87_s22 = int_to_ptr.vmem [resolvable:$true] %s86_s22 }
  0x12   :  { %92 = dma.hbm_to_vmem [thread:$0]  %s85_s21, 6144, %s87_s22, [#allocation11], %s2484_s25, %s2484_s25, %s2485_s26  }
  0x13   :  { %2473 = dma.done.wait [#allocation5], 2048  }
  0x14   :  { %2474 = vsyncadd [#allocation5], 4294965248 }
  0x15   :  { %2475 = dma.done.wait [#allocation8], 12288  }
  0x16   :  { %2476 = vsyncadd [#allocation8], 4294955008 }
  0x17   :  { %2477 = dma.done.wait [#allocation11], 12288  }
  0x18   :  { %2478 = vsyncadd [#allocation11], 4294955008  ;;  %v2492_v0 = vmov 0   ;;  %v119_v1 = vld [vmem:[%s3990_s0 + $0x10] sm:$0xff]  ;;  %v117_v2 = vld [vmem:[%s3990_s0] sm:$0xff]  ;;  %v125_v25 = vlaneseq  ;;  %v2493_v28 = vmov 1.0  }
  0x19   :  { %2127 = vset.pattern.permute.xlu1 %v2492_v0  ;;  %2126 = vset.pattern.permute.xlu0 %v2492_v0  ;;  %v121_v3 = vld [vmem:[%s3990_s0 + $0x20] sm:$0xff]  ;;  %v190_v4 = vld [vmem:[#allocation4 + $0x78] sm:$0xff]  ;;  %v189_v5 = vld [vmem:[#allocation4 + $0x70] sm:$0xff]  ;;  %s2063_s23 = sshll.u32 %s4000_s10, 4  ;;  %s2496_s24 = smov [#allocation14]   ;;  %s2064_s23 = int_to_ptr.hbm [resolvable:$true] %s2063_s23 }
  0x1a   :  { %2128 = vset.pattern.permute.xlu2 %v2492_v0  ;;  %134 = vperm.xlu1 %2127, %v119_v1   ;;  %v188_v6 = vld [vmem:[#allocation4 + $0x68] sm:$0xff]  ;;  %v120_v7 = vld [vmem:[%s3990_s0 + $0x18] sm:$0xff]  ;;  %v187_v9 = vld [vmem:[#allocation4 + $0x60] sm:$0xff]  ;;  %v2611_v26 = vand.u32 127, %v125_v25  ;;  %s2074_s27 = sshll.u32 %s2496_s24, 4  ;;  %s2076_s28 = sshll.u32 %s4001_s11, 4  ;;  %s2075_s27 = int_to_ptr.vmem [resolvable:$true] %s2074_s27  ;;  %s2077_s28 = int_to_ptr.hbm [resolvable:$true] %s2076_s28 }
  0x1b   :  { %128 = vperm.xlu0 %2126, %v117_v2   ;;  %140 = vperm.xlu2 %2128, %v121_v3   ;;  %v118_v8 = vld [vmem:[%s3990_s0 + $0x8] sm:$0xff]  ;;  %v186_v11 = vld [vmem:[#allocation4 + $0x58] sm:$0xff]  ;;  %v185_v12 = vld [vmem:[#allocation4 + $0x50] sm:$0xff] }
  0x1c   :  { %191 = vmatpush.msra.mxu0 %v190_v4  ;;  %v122_v10 = vld [vmem:[%s3990_s0 + $0x28] sm:$0xff]  ;;  %v124_v14 = vld [vmem:[%s3990_s0 + $0x38] sm:$0xff]  ;;  %v123_v15 = vld [vmem:[%s3990_s0 + $0x30] sm:$0xff] }
  0x1d   :  { %v184_v13 = vld [vmem:[#allocation4 + $0x48] sm:$0xff]  ;;  %v183_v16 = vld [vmem:[#allocation4 + $0x40] sm:$0xff]  ;;  %v182_v17 = vld [vmem:[#allocation4 + $0x38] sm:$0xff] }
  0x1e   :  { %192 = vmatpush.msra.mxu0 %v189_v5  ;;  %v181_v18 = vld [vmem:[#allocation4 + $0x30] sm:$0xff]  ;;  %v180_v19 = vld [vmem:[#allocation4 + $0x28] sm:$0xff]  ;;  %v179_v20 = vld [vmem:[#allocation4 + $0x20] sm:$0xff] }
  0x1f   :  { %v178_v21 = vld [vmem:[#allocation4 + $0x18] sm:$0xff]  ;;  %v177_v22 = vld [vmem:[#allocation4 + $0x10] sm:$0xff]  ;;  %v176_v23 = vld [vmem:[#allocation4 + $0x8] sm:$0xff] }
  0x20   :  { %193 = vmatpush.msra.mxu0 %v188_v6  ;;  %v175_v24 = vld [vmem:[#allocation4] sm:$0xff]  ;;  %v277_v32 = vld [vmem:[#allocation7 + $0x168] sm:$0xff]  ;;  %v278_v33 = vld [vmem:[#allocation7 + $0x170] sm:$0xff] }
  0x21   :  { %v279_v34 = vld [vmem:[#allocation7 + $0x178] sm:$0xff]  ;;  %337 = vmatpush.msra.mxu1 %v277_v32  ;;  %378 = vmatpush.msra.mxu2 %v278_v33  ;;  %v2621_v35 = vld [vmem:[#allocation9 + $0x168] sm:$0xff]  ;;  %v274_v36 = vld [vmem:[#allocation7 + $0x150] sm:$0xff] }
  0x22   :  { %137 = vperm.xlu1 %2127, %v120_v7   ;;  %194 = vmatpush.msra.mxu0 %v187_v9  ;;  %v275_v37 = vld [vmem:[#allocation7 + $0x158] sm:$0xff]  ;;  %v276_v39 = vld [vmem:[#allocation7 + $0x160] sm:$0xff]  ;;  %v2624_v40 = vld [vmem:[#allocation9 + $0x150] sm:$0xff] }
  0x23   :  { %131 = vperm.xlu0 %2126, %v118_v8   ;;  %143 = vperm.xlu2 %2128, %v122_v10   ;;  %v271_v41 = vld [vmem:[#allocation7 + $0x138] sm:$0xff]  ;;  %v272_v42 = vld [vmem:[#allocation7 + $0x140] sm:$0xff]  ;;  %v273_v43 = vld [vmem:[#allocation7 + $0x148] sm:$0xff] }
  0x24   :  { %195 = vmatpush.msra.mxu0 %v186_v11  ;;  %419 = vmatpush.msra.mxu3 %v279_v34  ;;  %v2626_v44 = vld [vmem:[#allocation9 + $0x138] sm:$0xff]  ;;  %v268_v45 = vld [vmem:[#allocation7 + $0x120] sm:$0xff]  ;;  %v269_v46 = vld [vmem:[#allocation7 + $0x128] sm:$0xff] }
  0x25   :  { %338 = vmatpush.msra.mxu1 %v274_v36  ;;  %379 = vmatpush.msra.mxu2 %v275_v37  ;;  %v270_v47 = vld [vmem:[#allocation7 + $0x130] sm:$0xff]  ;;  %v2631_v48 = vld [vmem:[#allocation9 + $0x120] sm:$0xff]  ;;  %v265_v49 = vld [vmem:[#allocation7 + $0x108] sm:$0xff] }
  0x26   :  { %196 = vmatpush.msra.mxu0 %v185_v12  ;;  %420 = vmatpush.msra.mxu3 %v276_v39  ;;  %v266_v50 = vld [vmem:[#allocation7 + $0x110] sm:$0xff]  ;;  %v267_v51 = vld [vmem:[#allocation7 + $0x118] sm:$0xff]  ;;  %v2634_v52 = vld [vmem:[#allocation9 + $0x108] sm:$0xff]  ;;  %v4002_v39 = vmov 0.0  }
  0x27   :  { %339 = vmatpush.msra.mxu1 %v271_v41  ;;  %380 = vmatpush.msra.mxu2 %v272_v42  ;;  %v262_v53 = vld [vmem:[#allocation7 + $0xf0] sm:$0xff]  ;;  %v263_v54 = vld [vmem:[#allocation7 + $0xf8] sm:$0xff]  ;;  %v264_v55 = vld [vmem:[#allocation7 + $0x100] sm:$0xff] }
  0x28   :  { %197 = vmatpush.msra.mxu0 %v184_v13  ;;  %421 = vmatpush.msra.mxu3 %v273_v43  ;;  %v2637_v56 = vld [vmem:[#allocation9 + $0xf0] sm:$0xff]  ;;  %v259_v57 = vld [vmem:[#allocation7 + $0xd8] sm:$0xff]  ;;  %v260_v58 = vld [vmem:[#allocation7 + $0xe0] sm:$0xff] }
  0x29   :  { %340 = vmatpush.msra.mxu1 %v268_v45  ;;  %381 = vmatpush.msra.mxu2 %v269_v46  ;;  %v261_v59 = vld [vmem:[#allocation7 + $0xe8] sm:$0xff]  ;;  %v2640_v61 = vld [vmem:[#allocation9 + $0xd8] sm:$0xff]  ;;  %v256_v62 = vld [vmem:[#allocation7 + $0xc0] sm:$0xff] }
  0x2a   :  { %149 = vperm.xlu1 %2127, %v124_v14   ;;  %198 = vmatpush.msra.mxu0 %v183_v16  ;;  %v257_v63 = vld [vmem:[#allocation7 + $0xc8] sm:$0xff]  ;;  %v258_v0 = vld [vmem:[#allocation7 + $0xd0] sm:$0xff]  ;;  %v2643_v1 = vld [vmem:[#allocation9 + $0xc0] sm:$0xff] }
  0x2b   :  { %146 = vperm.xlu0 %2126, %v123_v15   ;;  %422 = vmatpush.msra.mxu3 %v270_v47  ;;  %v253_v2 = vld [vmem:[#allocation7 + $0xa8] sm:$0xff]  ;;  %v254_v3 = vld [vmem:[#allocation7 + $0xb0] sm:$0xff]  ;;  %v255_v4 = vld [vmem:[#allocation7 + $0xb8] sm:$0xff] }
  0x2c   :  { %199 = vmatpush.msra.mxu0 %v182_v17  ;;  %341 = vmatpush.msra.mxu1 %v265_v49  ;;  %v2648_v5 = vld [vmem:[#allocation9 + $0xa8] sm:$0xff]  ;;  %v250_v6 = vld [vmem:[#allocation7 + $0x90] sm:$0xff]  ;;  %v251_v7 = vld [vmem:[#allocation7 + $0x98] sm:$0xff] }
  0x2d   :  { %382 = vmatpush.msra.mxu2 %v266_v50  ;;  %423 = vmatpush.msra.mxu3 %v267_v51  ;;  %v252_v8 = vld [vmem:[#allocation7 + $0xa0] sm:$0xff]  ;;  %v2651_v9 = vld [vmem:[#allocation9 + $0x90] sm:$0xff]  ;;  %v247_v10 = vld [vmem:[#allocation7 + $0x78] sm:$0xff] }
  0x2e   :  { %200 = vmatpush.msra.mxu0 %v181_v18  ;;  %342 = vmatpush.msra.mxu1 %v262_v53  ;;  %v248_v11 = vld [vmem:[#allocation7 + $0x80] sm:$0xff]  ;;  %v249_v13 = vld [vmem:[#allocation7 + $0x88] sm:$0xff]  ;;  %v2654_v14 = vld [vmem:[#allocation9 + $0x78] sm:$0xff] }
  0x2f   :  { %383 = vmatpush.msra.mxu2 %v263_v54  ;;  %424 = vmatpush.msra.mxu3 %v264_v55  ;;  %v244_v15 = vld [vmem:[#allocation7 + $0x60] sm:$0xff]  ;;  %v245_v16 = vld [vmem:[#allocation7 + $0x68] sm:$0xff]  ;;  %v246_v17 = vld [vmem:[#allocation7 + $0x70] sm:$0xff] }
  0x30   :  { %201 = vmatpush.msra.mxu0 %v180_v19  ;;  %343 = vmatpush.msra.mxu1 %v259_v57  ;;  %v2659_v18 = vld [vmem:[#allocation9 + $0x60] sm:$0xff]  ;;  %v241_v19 = vld [vmem:[#allocation7 + $0x48] sm:$0xff]  ;;  %v2669_v33 = vld [vmem:[#allocation9 + $0x18] sm:$0xff] }
  0x31   :  { %384 = vmatpush.msra.mxu2 %v260_v58  ;;  %425 = vmatpush.msra.mxu3 %v261_v59  ;;  %v240_v25 = vld [vmem:[#allocation7 + $0x40] sm:$0xff]  ;;  %v237_v32 = vld [vmem:[#allocation7 + $0x28] sm:$0xff]  ;;  %4039 = vst [vmem:[#allocation21_spill] sm:$0xff] %v2669_v33  ;;  %v234_v37 = vld [vmem:[#allocation7 + $0x10] sm:$0xff] }
  0x32   :  { %202 = vmatpush.msra.mxu0 %v179_v20  ;;  %344 = vmatpush.msra.mxu1 %v256_v62  ;;  %v242_v20 = vld [vmem:[#allocation7 + $0x50] sm:$0xff]  ;;  %v232_v34 = vld [vmem:[#allocation7] sm:$0xff]  ;;  %v233_v36 = vld [vmem:[#allocation7 + $0x8] sm:$0xff] }
  0x33   :  { %385 = vmatpush.msra.mxu2 %v257_v63  ;;  %426 = vmatpush.msra.mxu3 %v258_v0  ;;  %v2680_v41 = vld [vmem:[#allocation9 + $0x178] sm:$0xff]  ;;  %v2687_v42 = vld [vmem:[#allocation9 + $0x160] sm:$0xff]  ;;  %v2698_v45 = vld [vmem:[#allocation9 + $0x148] sm:$0xff] }
  0x34   :  { %203 = vmatpush.msra.mxu0 %v178_v21  ;;  %345 = vmatpush.msra.mxu1 %v253_v2  ;;  %v243_v21 = vld [vmem:[#allocation7 + $0x58] sm:$0xff]  ;;  %v2696_v43 = vld [vmem:[#allocation9 + $0x140] sm:$0xff]  ;;  %v2700_v46 = vld [vmem:[#allocation9 + $0x128] sm:$0xff] }
  0x35   :  { %386 = vmatpush.msra.mxu2 %v254_v3  ;;  %427 = vmatpush.msra.mxu3 %v255_v4  ;;  %v2705_v47 = vld [vmem:[#allocation9 + $0x130] sm:$0xff]  ;;  %v2716_v50 = vld [vmem:[#allocation9 + $0x118] sm:$0xff]  ;;  %v2723_v53 = vld [vmem:[#allocation9 + $0x100] sm:$0xff] }
  0x36   :  { %204 = vmatpush.msra.mxu0 %v177_v22  ;;  %346 = vmatpush.msra.mxu1 %v250_v6  ;;  %v2662_v22 = vld [vmem:[#allocation9 + $0x48] sm:$0xff]  ;;  %v2714_v49 = vld [vmem:[#allocation9 + $0x110] sm:$0xff]  ;;  %v2718_v51 = vld [vmem:[#allocation9 + $0xf8] sm:$0xff] }
  0x37   :  { %387 = vmatpush.msra.mxu2 %v251_v7  ;;  %428 = vmatpush.msra.mxu3 %v252_v8  ;;  %v2732_v54 = vld [vmem:[#allocation9 + $0xe0] sm:$0xff]  ;;  %v2734_v55 = vld [vmem:[#allocation9 + $0xe8] sm:$0xff]  ;;  %v2741_v58 = vld [vmem:[#allocation9 + $0xd0] sm:$0xff] }
  0x38   :  { %205 = vmatpush.msra.mxu0 %v176_v23  ;;  %347 = vmatpush.msra.mxu1 %v247_v10  ;;  %v238_v23 = vld [vmem:[#allocation7 + $0x30] sm:$0xff]  ;;  %v2736_v57 = vld [vmem:[#allocation9 + $0xc8] sm:$0xff]  ;;  %v2752_v62 = vld [vmem:[#allocation9 + $0xb8] sm:$0xff] }
  0x39   :  { %388 = vmatpush.msra.mxu2 %v248_v11  ;;  %429 = vmatpush.msra.mxu3 %v249_v13  ;;  %v2754_v63 = vld [vmem:[#allocation9 + $0x98] sm:$0xff]  ;;  %v2758_v0 = vld [vmem:[#allocation9 + $0xa0] sm:$0xff]  ;;  %v2769_v4 = vld [vmem:[#allocation9 + $0x88] sm:$0xff] }
  0x3a   :  { %206 = vmatpush.msra.mxu0 %v175_v24  ;;  %348 = vmatpush.msra.mxu1 %v244_v15  ;;  %v239_v24 = vld [vmem:[#allocation7 + $0x38] sm:$0xff]  ;;  %v2767_v3 = vld [vmem:[#allocation9 + $0x80] sm:$0xff]  ;;  %v2771_v6 = vld [vmem:[#allocation9 + $0x68] sm:$0xff] }
  0x3b   :  { %389 = vmatpush.msra.mxu2 %v245_v16  ;;  %430 = vmatpush.msra.mxu3 %v246_v17  ;;  %v2775_v7 = vld [vmem:[#allocation9 + $0x70] sm:$0xff]  ;;  %v2786_v11 = vld [vmem:[#allocation9 + $0x58] sm:$0xff]  ;;  %v2792_v13 = vld [vmem:[#allocation9 + $0x40] sm:$0xff] }
  0x3c   :  { %494 = vmatpush.msrb.mxu0 %v2621_v35  ;;  %349 = vmatpush.msra.mxu1 %v241_v19  ;;  %v2784_v10 = vld [vmem:[#allocation9 + $0x50] sm:$0xff]  ;;  %v2801_v16 = vld [vmem:[#allocation9 + $0x20] sm:$0xff]  ;;  %v2803_v17 = vld [vmem:[#allocation9 + $0x28] sm:$0xff] }
  0x3d   :  { %390 = vmatpush.msra.mxu2 %v242_v20  ;;  %431 = vmatpush.msra.mxu3 %v243_v21  ;;  %4041 = vst [vmem:[#allocation23_spill] sm:$0xff] %v2801_v16  ;;  %v2805_v19 = vld [vmem:[#allocation9 + $0x8] sm:$0xff]  ;;  %v2809_v20 = vld [vmem:[#allocation9 + $0x10] sm:$0xff] }
  0x3e   :  { %495 = vmatpush.msrb.mxu0 %v2624_v40  ;;  %350 = vmatpush.msra.mxu1 %v238_v23  ;;  %4042 = vst [vmem:[#allocation24_spill] sm:$0xff] %v2803_v17 }
  0x3f   :  { %391 = vmatpush.msra.mxu2 %v239_v24  ;;  %432 = vmatpush.msra.mxu3 %v240_v25  ;;  %4043 = vst [vmem:[#allocation25_spill] sm:$0xff] %v2805_v19 }
  0x40   :  { %496 = vmatpush.msrb.mxu0 %v2626_v44  ;;  %4044 = vst [vmem:[#allocation26_spill] sm:$0xff] %v2809_v20 }
  0x41   :  { %433 = vmatpush.msra.mxu3 %v237_v32 }
  0x42   :  { %497 = vmatpush.msrb.mxu0 %v2631_v48 }
  0x43   :  { %434 = vmatpush.msra.mxu3 %v234_v37 }
  0x44   :  { %498 = vmatpush.msrb.mxu0 %v2634_v52 }
  0x45   :  { %575 = vmatpush.msrb.mxu3 %v2621_v35 }
  0x46   :  { %499 = vmatpush.msrb.mxu0 %v2637_v56 }
  0x47   :  { %576 = vmatpush.msrb.mxu3 %v2624_v40 }
  0x48   :  { %500 = vmatpush.msrb.mxu0 %v2640_v61 }
  0x49   :  { %577 = vmatpush.msrb.mxu3 %v2626_v44 }
  0x4a   :  { %501 = vmatpush.msrb.mxu0 %v2643_v1 }
  0x4b   :  { %578 = vmatpush.msrb.mxu3 %v2631_v48 }
  0x4c   :  { %502 = vmatpush.msrb.mxu0 %v2648_v5 }
  0x4d   :  { %579 = vmatpush.msrb.mxu3 %v2634_v52 }
  0x4e   :  { %503 = vmatpush.msrb.mxu0 %v2651_v9 }
  0x4f   :  { %580 = vmatpush.msrb.mxu3 %v2637_v56 }
  0x50   :  { %504 = vmatpush.msrb.mxu0 %v2654_v14 }
  0x51   :  { %581 = vmatpush.msrb.mxu3 %v2640_v61 }
  0x52   :  { %505 = vmatpush.msrb.mxu0 %v2659_v18 }
  0x53   :  { %582 = vmatpush.msrb.mxu3 %v2643_v1 }
  0x54   :  { %506 = vmatpush.msrb.mxu0 %v2662_v22 }
  0x55   :  { %583 = vmatpush.msrb.mxu3 %v2648_v5 }
  0x57   :  { %584 = vmatpush.msrb.mxu3 %v2651_v9 }
  0x59   :  { %585 = vmatpush.msrb.mxu3 %v2654_v14 }
  0x5b   :  { %586 = vmatpush.msrb.mxu3 %v2659_v18 }
  0x5d   :  { %587 = vmatpush.msrb.mxu3 %v2662_v22 }
  0x75   :  { %v141_v38 = vpop.permute.xlu2 %140 }
  0x76   :  { %vm155_vm4 = vcmp.eq.s32.totalorder %v2611_v26, %v141_v38  ;;  %v2674_v38 = vld [vmem:[#allocation9] sm:$0xff] }
  0x77   :  { %4040 = vst [vmem:[#allocation22_spill] sm:$0xff] %v2674_v38 }
  0x7d   :  { %v144_v60 = vpop.permute.xlu2 %143 }
  0x7e   :  { %vm156_vm5 = vcmp.eq.s32.totalorder %v2611_v26, %v144_v60  ;;  %v2750_v60 = vld [vmem:[#allocation9 + $0xb0] sm:$0xff] }
  0x8c   :  { %v135_v30 = vpop.permute.xlu1 %134 }
  0x8d   :  { %v129_v27 = vpop.permute.xlu0 %128  ;;  %vm153_vm2 = vcmp.eq.s32.totalorder %v2611_v26, %v135_v30 }
  0x8e   :  { %vm151_vm0 = vcmp.eq.s32.totalorder %v2611_v26, %v129_v27  ;;  %v2665_v27 = vld [vmem:[#allocation9 + $0x30] sm:$0xff] }
  0x8f   :  { %2104 = vmatmul.msk.f32.vlgmr.msra.gmra.mxu0 %vm151_vm0, %v2493_v28  ;;  %588 = vmatpush.msrb.mxu3 %v2665_v27 }
  0x90   :  { %507 = vmatpush.msrb.mxu0 %v2665_v27 }
  0x91   :  { %589 = vmatpush.msrb.mxu3 %v2669_v33 }
  0x92   :  { %508 = vmatpush.msrb.mxu0 %v2669_v33 }
  0x93   :  { %590 = vmatpush.msrb.mxu3 %v2674_v38 }
  0x94   :  { %v138_v31 = vpop.permute.xlu1 %137  ;;  %509 = vmatpush.msrb.mxu0 %v2674_v38 }
  0x95   :  { %v132_v29 = vpop.permute.xlu0 %131  ;;  %vm154_vm3 = vcmp.eq.s32.totalorder %v2611_v26, %v138_v31  ;;  %v236_v31 = vld [vmem:[#allocation7 + $0x20] sm:$0xff] }
  0x96   :  { %vm152_vm1 = vcmp.eq.s32.totalorder %v2611_v26, %v132_v29  ;;  %v235_v29 = vld [vmem:[#allocation7 + $0x18] sm:$0xff]  ;;  %392 = vmatpush.msra.mxu2 %v236_v31 }
  0x97   :  { %2105 = vmatmul.msk.f32.gmra.mxu0 %vm152_vm1, %v2493_v28  ;;  %351 = vmatpush.msra.mxu1 %v235_v29 }
  0x98   :  { %393 = vmatpush.msra.mxu2 %v233_v36 }
  0x99   :  { %352 = vmatpush.msra.mxu1 %v232_v34  ;;  %v328_v34 = vld [vmem:[%s3994_s4] sm:$0x7] }
  0x9a   :  { %534 = vmatpush.msrb.mxu2 %v2680_v41  ;;  %v2909_v36 = vperm.slane %v328_v34, 2 }
  0x9c   :  { %v150_v30 = vpop.permute.xlu1 %149  ;;  %535 = vmatpush.msrb.mxu2 %v2687_v42  ;;  %4046 = vst [vmem:[#allocation28_spill] sm:$0xff] %v2909_v36 }
  0x9d   :  { %v147_v12 = vpop.permute.xlu0 %146  ;;  %vm158_vm7 = vcmp.eq.s32.totalorder %v2611_v26, %v150_v30 }
  0x9e   :  { %vm157_vm6 = vcmp.eq.s32.totalorder %v2611_v26, %v147_v12  ;;  %v2678_v26 = vld [vmem:[#allocation9 + $0x170] sm:$0xff]  ;;  %536 = vmatpush.msrb.mxu2 %v2698_v45  ;;  %v2788_v12 = vld [vmem:[#allocation9 + $0x38] sm:$0xff] }
  0x9f   :  { %2106 = vmatmul.msk.f32.gmra.mxu0 %vm153_vm2, %v2493_v28  ;;  %514 = vmatpush.msrb.mxu1 %v2678_v26 }
  0xa0   :  { %595 = vmatpush.msra.mxu0 %v2678_v26  ;;  %537 = vmatpush.msrb.mxu2 %v2705_v47 }
  0xa2   :  { %538 = vmatpush.msrb.mxu2 %v2716_v50 }
  0xa4   :  { %539 = vmatpush.msrb.mxu2 %v2723_v53 }
  0xa6   :  { %540 = vmatpush.msrb.mxu2 %v2734_v55 }
  0xa7   :  { %2107 = vmatmul.msk.f32.gmra.mxu0 %vm154_vm3, %v2493_v28 }
  0xa8   :  { %541 = vmatpush.msrb.mxu2 %v2741_v58 }
  0xaa   :  { %542 = vmatpush.msrb.mxu2 %v2752_v62 }
  0xac   :  { %543 = vmatpush.msrb.mxu2 %v2758_v0 }
  0xae   :  { %544 = vmatpush.msrb.mxu2 %v2769_v4 }
  0xaf   :  { %2108 = vmatmul.msk.f32.gmra.mxu0 %vm155_vm4, %v2493_v28 }
  0xb0   :  { %545 = vmatpush.msrb.mxu2 %v2775_v7 }
  0xb2   :  { %546 = vmatpush.msrb.mxu2 %v2786_v11 }
  0xb4   :  { %547 = vmatpush.msrb.mxu2 %v2792_v13 }
  0xb6   :  { %548 = vmatpush.msrb.mxu2 %v2803_v17 }
  0xb7   :  { %2109 = vmatmul.msk.f32.gmra.mxu0 %vm156_vm5, %v2493_v28 }
  0xb8   :  { %549 = vmatpush.msrb.mxu2 %v2809_v20 }
  0xbf   :  { %2110 = vmatmul.msk.f32.gmra.mxu0 %vm157_vm6, %v2493_v28 }
  0xc7   :  { %2111 = vmatmul.msk.f32.gmra.mxu0 %vm158_vm7, %v2493_v28  ;;  %v2682_v28 = vld [vmem:[#allocation9 + $0x158] sm:$0xff] }
  0xc8   :  { %515 = vmatpush.msrb.mxu1 %v2682_v28  ;;  %596 = vmatpush.msra.mxu0 %v2682_v28 }
  0xca   :  { %516 = vmatpush.msrb.mxu1 %v2696_v43  ;;  %597 = vmatpush.msra.mxu0 %v2696_v43 }
  0xcc   :  { %517 = vmatpush.msrb.mxu1 %v2700_v46  ;;  %598 = vmatpush.msra.mxu0 %v2700_v46 }
  0xce   :  { %518 = vmatpush.msrb.mxu1 %v2714_v49  ;;  %599 = vmatpush.msra.mxu0 %v2714_v49 }
  0xcf   :  { %510 = vmatmul.f32.vlgmr.msrb.gmra.mxu0 %v4002_v39 }
  0xd0   :  { %519 = vmatpush.msrb.mxu1 %v2718_v51  ;;  %600 = vmatpush.msra.mxu0 %v2718_v51 }
  0xd2   :  { %520 = vmatpush.msrb.mxu1 %v2732_v54  ;;  %601 = vmatpush.msra.mxu0 %v2732_v54 }
  0xd4   :  { %521 = vmatpush.msrb.mxu1 %v2736_v57  ;;  %602 = vmatpush.msra.mxu0 %v2736_v57 }
  0xd6   :  { %522 = vmatpush.msrb.mxu1 %v2750_v60  ;;  %603 = vmatpush.msra.mxu0 %v2750_v60 }
  0xd8   :  { %523 = vmatpush.msrb.mxu1 %v2754_v63  ;;  %604 = vmatpush.msra.mxu0 %v2754_v63 }
  0xda   :  { %524 = vmatpush.msrb.mxu1 %v2767_v3  ;;  %605 = vmatpush.msra.mxu0 %v2767_v3 }
  0xdc   :  { %525 = vmatpush.msrb.mxu1 %v2771_v6  ;;  %606 = vmatpush.msra.mxu0 %v2771_v6 }
  0xde   :  { %526 = vmatpush.msrb.mxu1 %v2784_v10  ;;  %607 = vmatpush.msra.mxu0 %v2784_v10 }
  0xe0   :  { %527 = vmatpush.msrb.mxu1 %v2788_v12  ;;  %608 = vmatpush.msra.mxu0 %v2788_v12 }
  0xe2   :  { %528 = vmatpush.msrb.mxu1 %v2801_v16  ;;  %609 = vmatpush.msra.mxu0 %v2801_v16 }
  0xe4   :  { %529 = vmatpush.msrb.mxu1 %v2805_v19  ;;  %610 = vmatpush.msra.mxu0 %v2805_v19 }
  0xe6   :  { %696 = vmatpush.msrb.mxu0 %v2680_v41 }
  0xe8   :  { %697 = vmatpush.msrb.mxu0 %v2687_v42 }
  0xea   :  { %698 = vmatpush.msrb.mxu0 %v2698_v45 }
  0xec   :  { %699 = vmatpush.msrb.mxu0 %v2705_v47 }
  0xee   :  { %700 = vmatpush.msrb.mxu0 %v2716_v50 }
  0xf0   :  { %701 = vmatpush.msrb.mxu0 %v2723_v53 }
  0xf2   :  { %702 = vmatpush.msrb.mxu0 %v2734_v55 }
  0xf4   :  { %703 = vmatpush.msrb.mxu0 %v2741_v58 }
  0xf6   :  { %704 = vmatpush.msrb.mxu0 %v2752_v62 }
  0xf8   :  { %705 = vmatpush.msrb.mxu0 %v2758_v0 }
  0xfa   :  { %706 = vmatpush.msrb.mxu0 %v2769_v4 }
  0xfc   :  { %707 = vmatpush.msrb.mxu0 %v2775_v7 }
  0xfe   :  { %708 = vmatpush.msrb.mxu0 %v2786_v11 }
 0x100   :  { %709 = vmatpush.msrb.mxu0 %v2792_v13 }
 0x102   :  { %710 = vmatpush.msrb.mxu0 %v2803_v17 }
 0x104   :  { %711 = vmatpush.msrb.mxu0 %v2809_v20 }
 0x10c   :  { %v208_v59 = vpop.f32.mrf.mxu0 }
 0x10d   :  { %353 = vmatmul.f32.vlgmr.msra.gmra.mxu1 %v208_v59  ;;  %394 = vmatmul.f32.vlgmr.msra.gmra.mxu2 %v208_v59 }
 0x10e   :  { %435 = vmatmul.f32.vlgmr.msra.gmra.mxu3 %v208_v59  ;;  %615 = vmatpush.msra.mxu1 %v2680_v41 }
 0x10f   :  { %676 = vmatpush.msra.mxu3 %v2678_v26  ;;  %656 = vmatpush.msra.mxu2 %v2621_v35 }
 0x110   :  { %616 = vmatpush.msra.mxu1 %v2687_v42 }
 0x111   :  { %677 = vmatpush.msra.mxu3 %v2682_v28  ;;  %657 = vmatpush.msra.mxu2 %v2624_v40 }
 0x112   :  { %617 = vmatpush.msra.mxu1 %v2698_v45 }
 0x113   :  { %678 = vmatpush.msra.mxu3 %v2696_v43  ;;  %658 = vmatpush.msra.mxu2 %v2626_v44 }
 0x114   :  { %v211_v2 = vpop.f32.mrf.mxu0  ;;  %618 = vmatpush.msra.mxu1 %v2705_v47 }
 0x115   :  { %356 = vmatmul.f32.gmra.mxu1 %v211_v2  ;;  %397 = vmatmul.f32.gmra.mxu2 %v211_v2 }
 0x116   :  { %438 = vmatmul.f32.gmra.mxu3 %v211_v2  ;;  %619 = vmatpush.msra.mxu1 %v2716_v50 }
 0x117   :  { %679 = vmatpush.msra.mxu3 %v2700_v46  ;;  %659 = vmatpush.msra.mxu2 %v2631_v48 }
 0x118   :  { %620 = vmatpush.msra.mxu1 %v2723_v53 }
 0x119   :  { %680 = vmatpush.msra.mxu3 %v2714_v49  ;;  %660 = vmatpush.msra.mxu2 %v2634_v52 }
 0x11a   :  { %621 = vmatpush.msra.mxu1 %v2734_v55 }
 0x11b   :  { %681 = vmatpush.msra.mxu3 %v2718_v51  ;;  %661 = vmatpush.msra.mxu2 %v2637_v56 }
 0x11c   :  { %v214_v8 = vpop.f32.mrf.mxu0  ;;  %622 = vmatpush.msra.mxu1 %v2741_v58 }
 0x11d   :  { %359 = vmatmul.f32.gmra.mxu1 %v214_v8  ;;  %400 = vmatmul.f32.gmra.mxu2 %v214_v8 }
 0x11e   :  { %441 = vmatmul.f32.gmra.mxu3 %v214_v8  ;;  %623 = vmatpush.msra.mxu1 %v2752_v62 }
 0x11f   :  { %682 = vmatpush.msra.mxu3 %v2732_v54  ;;  %662 = vmatpush.msra.mxu2 %v2640_v61 }
 0x120   :  { %624 = vmatpush.msra.mxu1 %v2758_v0 }
 0x121   :  { %683 = vmatpush.msra.mxu3 %v2736_v57  ;;  %663 = vmatpush.msra.mxu2 %v2643_v1 }
 0x122   :  { %625 = vmatpush.msra.mxu1 %v2769_v4 }
 0x123   :  { %684 = vmatpush.msra.mxu3 %v2750_v60  ;;  %664 = vmatpush.msra.mxu2 %v2648_v5 }
 0x124   :  { %v217_v15 = vpop.f32.mrf.mxu0  ;;  %626 = vmatpush.msra.mxu1 %v2775_v7 }
 0x125   :  { %362 = vmatmul.f32.gmra.mxu1 %v217_v15  ;;  %403 = vmatmul.f32.gmra.mxu2 %v217_v15 }
 0x126   :  { %444 = vmatmul.f32.gmra.mxu3 %v217_v15  ;;  %627 = vmatpush.msra.mxu1 %v2786_v11 }
 0x127   :  { %685 = vmatpush.msra.mxu3 %v2754_v63  ;;  %665 = vmatpush.msra.mxu2 %v2651_v9 }
 0x128   :  { %628 = vmatpush.msra.mxu1 %v2792_v13 }
 0x129   :  { %686 = vmatpush.msra.mxu3 %v2767_v3  ;;  %666 = vmatpush.msra.mxu2 %v2654_v14 }
 0x12a   :  { %629 = vmatpush.msra.mxu1 %v2803_v17 }
 0x12b   :  { %687 = vmatpush.msra.mxu3 %v2771_v6  ;;  %667 = vmatpush.msra.mxu2 %v2659_v18 }
 0x12c   :  { %v220_v21 = vpop.f32.mrf.mxu0  ;;  %630 = vmatpush.msra.mxu1 %v2809_v20 }
 0x12d   :  { %365 = vmatmul.f32.gmra.mxu1 %v220_v21  ;;  %406 = vmatmul.f32.gmra.mxu2 %v220_v21 }
 0x12e   :  { %447 = vmatmul.f32.gmra.mxu3 %v220_v21  ;;  %668 = vmatpush.msra.mxu2 %v2662_v22 }
 0x12f   :  { %688 = vmatpush.msra.mxu3 %v2784_v10 }
 0x130   :  { %669 = vmatpush.msra.mxu2 %v2665_v27 }
 0x131   :  { %689 = vmatpush.msra.mxu3 %v2788_v12 }
 0x132   :  { %670 = vmatpush.msra.mxu2 %v2669_v33 }
 0x133   :  { %690 = vmatpush.msra.mxu3 %v2801_v16 }
 0x134   :  { %v223_v23 = vpop.f32.mrf.mxu0  ;;  %671 = vmatpush.msra.mxu2 %v2674_v38 }
 0x135   :  { %368 = vmatmul.f32.gmra.mxu1 %v223_v23  ;;  %409 = vmatmul.f32.gmra.mxu2 %v223_v23 }
 0x136   :  { %450 = vmatmul.f32.gmra.mxu3 %v223_v23 }
 0x137   :  { %691 = vmatpush.msra.mxu3 %v2805_v19 }
 0x13c   :  { %v226_v24 = vpop.f32.mrf.mxu0 }
 0x13d   :  { %371 = vmatmul.f32.gmra.mxu1 %v226_v24  ;;  %412 = vmatmul.f32.gmra.mxu2 %v226_v24 }
 0x13e   :  { %453 = vmatmul.f32.gmra.mxu3 %v226_v24 }
 0x144   :  { %v229_v25 = vpop.f32.mrf.mxu0 }
 0x145   :  { %374 = vmatmul.f32.gmra.mxu1 %v229_v25  ;;  %415 = vmatmul.f32.gmra.mxu2 %v229_v25 }
 0x146   :  { %456 = vmatmul.f32.gmra.mxu3 %v229_v25  ;;  %v2925_v25 = vperm.slane %v328_v34, 1 }
 0x148   :  { %4053 = vst [vmem:[#allocation35_spill] sm:$0xff] %v2925_v25 }
 0x14d   :  { %530 = vmatmul.f32.vlgmr.msrb.gmra.mxu1 %v4002_v39  ;;  %550 = vmatmul.f32.vlgmr.msrb.gmra.mxu2 %v4002_v39 }
 0x14e   :  { %737 = vmatpush.msrb.mxu1 %v2621_v35  ;;  %757 = vmatpush.msrb.mxu2 %v2678_v26 }
 0x150   :  { %738 = vmatpush.msrb.mxu1 %v2624_v40  ;;  %758 = vmatpush.msrb.mxu2 %v2682_v28 }
 0x152   :  { %739 = vmatpush.msrb.mxu1 %v2626_v44  ;;  %759 = vmatpush.msrb.mxu2 %v2696_v43 }
 0x154   :  { %740 = vmatpush.msrb.mxu1 %v2631_v48  ;;  %760 = vmatpush.msrb.mxu2 %v2700_v46 }
 0x156   :  { %741 = vmatpush.msrb.mxu1 %v2634_v52  ;;  %761 = vmatpush.msrb.mxu2 %v2714_v49 }
 0x158   :  { %742 = vmatpush.msrb.mxu1 %v2637_v56  ;;  %762 = vmatpush.msrb.mxu2 %v2718_v51 }
 0x15a   :  { %743 = vmatpush.msrb.mxu1 %v2640_v61  ;;  %763 = vmatpush.msrb.mxu2 %v2732_v54 }
 0x15c   :  { %744 = vmatpush.msrb.mxu1 %v2643_v1  ;;  %764 = vmatpush.msrb.mxu2 %v2736_v57 }
 0x15e   :  { %745 = vmatpush.msrb.mxu1 %v2648_v5  ;;  %765 = vmatpush.msrb.mxu2 %v2750_v60 }
 0x160   :  { %746 = vmatpush.msrb.mxu1 %v2651_v9  ;;  %766 = vmatpush.msrb.mxu2 %v2754_v63 }
 0x162   :  { %747 = vmatpush.msrb.mxu1 %v2654_v14  ;;  %767 = vmatpush.msrb.mxu2 %v2767_v3 }
 0x164   :  { %748 = vmatpush.msrb.mxu1 %v2659_v18  ;;  %768 = vmatpush.msrb.mxu2 %v2771_v6 }
 0x166   :  { %749 = vmatpush.msrb.mxu1 %v2662_v22  ;;  %769 = vmatpush.msrb.mxu2 %v2784_v10 }
 0x168   :  { %750 = vmatpush.msrb.mxu1 %v2665_v27  ;;  %770 = vmatpush.msrb.mxu2 %v2788_v12 }
 0x16a   :  { %751 = vmatpush.msrb.mxu1 %v2669_v33  ;;  %771 = vmatpush.msrb.mxu2 %v2801_v16 }
 0x16c   :  { %752 = vmatpush.msrb.mxu1 %v2674_v38  ;;  %772 = vmatpush.msrb.mxu2 %v2805_v19 }
 0x18a   :  { %v354_v29 = vpop.f32.mrf.mxu1 }
 0x190   :  { %v395_v30 = vpop.f32.mrf.mxu2 }
 0x191   :  { %v436_v31 = vpop.f32.mrf.mxu3 }
 0x192   :  { %v2904_v32 = vpop.f32.mrf.mxu1 }
 0x193   :  { %4045 = vst [vmem:[#allocation27_spill] sm:$0xff] %v2904_v32  ;;  %v2927_v32 = vperm.slane %v328_v34, 0 }
 0x195   :  { %4054 = vst [vmem:[#allocation36_spill] sm:$0xff] %v2927_v32 }
 0x198   :  { %v2911_v37 = vpop.f32.mrf.mxu2 }
 0x199   :  { %4047 = vst [vmem:[#allocation29_spill] sm:$0xff] %v2911_v37  ;;  %v439_v59 = vpop.f32.mrf.mxu3 }
 0x19a   :  { %v2914_v2 = vadd.f32 %v439_v59, %v2909_v36  ;;  %v2916_v8 = vpop.f32.mrf.mxu1 }
 0x19b   :  { %4049 = vst [vmem:[#allocation31_spill] sm:$0xff] %v2916_v8 }
 0x19c   :  { %4048 = vst [vmem:[#allocation30_spill] sm:$0xff] %v2914_v2 }
 0x1a0   :  { %v2918_v15 = vpop.f32.mrf.mxu2 }
 0x1a1   :  { %4050 = vst [vmem:[#allocation32_spill] sm:$0xff] %v2918_v15  ;;  %v442_v21 = vpop.f32.mrf.mxu3 }
 0x1a2   :  { %v2921_v23 = vadd.f32 %v442_v21, %v2909_v36  ;;  %v2923_v24 = vpop.f32.mrf.mxu1 }
 0x1a3   :  { %4052 = vst [vmem:[#allocation34_spill] sm:$0xff] %v2923_v24  ;;  %v329_v24 = vld [vmem:[%s3995_s5] sm:$0x7] }
 0x1a4   :  { %4051 = vst [vmem:[#allocation33_spill] sm:$0xff] %v2921_v23 }
 0x1a8   :  { %v404_v39 = vpop.f32.mrf.mxu2 }
 0x1a9   :  { %v2930_v37 = vadd.f32 %v404_v39, %v2925_v25  ;;  %v445_v59 = vpop.f32.mrf.mxu3 }
 0x1aa   :  { %v2933_v2 = vadd.f32 %v445_v59, %v2909_v36  ;;  %v366_v8 = vpop.f32.mrf.mxu1 }
 0x1ab   :  { %4055 = vst [vmem:[#allocation37_spill] sm:$0xff] %v2930_v37  ;;  %v2936_v15 = vadd.f32 %v366_v8, %v2927_v32  ;;  %v511_v8 = vpop.f32.mrf.mxu0 }
 0x1ac   :  { %4056 = vst [vmem:[#allocation38_spill] sm:$0xff] %v2933_v2  ;;  %v2950_v2 = vperm.slane %v329_v24, 0 }
 0x1ad   :  { %4057 = vst [vmem:[#allocation39_spill] sm:$0xff] %v2936_v15  ;;  %v355_v15 = vadd.f32 %v354_v29, %v2927_v32 }
 0x1ae   :  { %4061 = vst [vmem:[#allocation43_spill] sm:$0xff] %v2950_v2  ;;  %v512_v19 = vadd.f32 %v511_v8, %v2950_v2  ;;  %v437_v2 = vadd.f32 %v436_v31, %v2909_v36 }
 0x1b0   :  { %v407_v21 = vpop.f32.mrf.mxu2 }
 0x1b1   :  { %v2942_v23 = vadd.f32 %v407_v21, %v2925_v25  ;;  %v448_v34 = vpop.f32.mrf.mxu3 }
 0x1b2   :  { %v2945_v39 = vadd.f32 %v448_v34, %v2909_v36  ;;  %v369_v37 = vpop.f32.mrf.mxu1 }
 0x1b3   :  { %4058 = vst [vmem:[#allocation40_spill] sm:$0xff] %v2942_v23  ;;  %v2948_v59 = vadd.f32 %v369_v37, %v2927_v32  ;;  %v554_v37 = vadd.f32 %v512_v19, %v355_v15 }
 0x1b4   :  { %4059 = vst [vmem:[#allocation41_spill] sm:$0xff] %v2945_v39 }
 0x1b5   :  { %4060 = vst [vmem:[#allocation42_spill] sm:$0xff] %v2948_v59  ;;  %v555_v59 = vmul.f32 0.5, %v554_v37 }
 0x1b7   :  { %2129 = vtanh.f32 %v555_v59 }
 0x1b8   :  { %v410_v38 = vpop.f32.mrf.mxu2 }
 0x1b9   :  { %v2955_v20 = vadd.f32 %v410_v38, %v2925_v25  ;;  %v451_v21 = vpop.f32.mrf.mxu3 }
 0x1ba   :  { %v2958_v23 = vadd.f32 %v451_v21, %v2909_v36  ;;  %v372_v34 = vpop.f32.mrf.mxu1  ;;  %v2972_v21 = vperm.slane %v329_v24, 1 }
 0x1bb   :  { %4062 = vst [vmem:[#allocation44_spill] sm:$0xff] %v2955_v20  ;;  %v2961_v39 = vadd.f32 %v372_v34, %v2927_v32 }
 0x1bc   :  { %4063 = vst [vmem:[#allocation45_spill] sm:$0xff] %v2958_v23 }
 0x1bd   :  { %4064 = vst [vmem:[#allocation46_spill] sm:$0xff] %v2961_v39  ;;  %v2130_v19 = vpop.eup %2129 }
 0x1be   :  { %4068 = vst [vmem:[#allocation50_spill] sm:$0xff] %v2972_v21 }
 0x1c0   :  { %v413_v16 = vpop.f32.mrf.mxu2 }
 0x1c1   :  { %v2964_v33 = vadd.f32 %v413_v16, %v2925_v25  ;;  %v454_v29 = vpop.f32.mrf.mxu3  ;;  %v396_v16 = vadd.f32 %v395_v30, %v2925_v25 }
 0x1c2   :  { %v2967_v8 = vadd.f32 %v454_v29, %v2909_v36  ;;  %v375_v38 = vpop.f32.mrf.mxu1  ;;  %v2979_v29 = vperm.slane %v329_v24, 2 }
 0x1c3   :  { %4065 = vst [vmem:[#allocation47_spill] sm:$0xff] %v2964_v33  ;;  %v2970_v20 = vadd.f32 %v375_v38, %v2927_v32 }
 0x1c4   :  { %4066 = vst [vmem:[#allocation48_spill] sm:$0xff] %v2967_v8  ;;  %v557_v8 = vadd.f32 1.0, %v2130_v19  ;;  %v4079_v19 = vld [vmem:[#allocation36_spill] sm:$0xff] }
 0x1c5   :  { %4067 = vst [vmem:[#allocation49_spill] sm:$0xff] %v2970_v20 }
 0x1c6   :  { %v558_v20 = vmul.f32 0.5, %v557_v8 }
 0x1c8   :  { %v416_v23 = vpop.f32.mrf.mxu2 }
 0x1c9   :  { %v2975_v34 = vadd.f32 %v416_v23, %v2925_v25  ;;  %v3036_v31 = vpop.f32.mrf.mxu3 }
 0x1ca   :  { %v531_v15 = vpop.f32.mrf.mxu1 }
 0x1cb   :  { %4069 = vst [vmem:[#allocation51_spill] sm:$0xff] %v2975_v34  ;;  %v532_v37 = vadd.f32 %v531_v15, %v2972_v21 }
 0x1cd   :  { %v559_v33 = vadd.f32 %v532_v37, %v396_v16 }
 0x1cf   :  { %v560_v39 = vmul.f32 0.5, %v559_v33  ;;  %v4073_v33 = vld [vmem:[#allocation26_spill] sm:$0xff] }
 0x1d0   :  { %v551_v38 = vpop.f32.mrf.mxu2 }
 0x1d1   :  { %2131 = vtanh.f32 %v560_v39  ;;  %v552_v59 = vadd.f32 %v551_v38, %v2979_v29  ;;  %v4078_v39 = vld [vmem:[#allocation29_spill] sm:$0xff]  ;;  %v4080_v38 = vld [vmem:[#allocation27_spill] sm:$0xff] }
 0x1d3   :  { %v564_v23 = vmul.f32 %v558_v20, %v552_v59  ;;  %v4075_v20 = vld [vmem:[#allocation25_spill] sm:$0xff]  ;;  %v358_v59 = vadd.f32 %v4080_v38, %v4079_v19 }
 0x1d5   :  { %v565_v34 = vadd.f32 %v564_v23, %v437_v2  ;;  %v4081_v23 = vld [vmem:[#allocation43_spill] sm:$0xff] }
 0x1d7   :  { %v2132_v32 = vpop.eup %2131  ;;  %2133 = vtanh.f32 %v565_v34 }
 0x1d8   :  { %v562_v17 = vadd.f32 1.0, %v2132_v32 }
 0x1da   :  { %v563_v30 = vmul.f32 0.5, %v562_v17  ;;  %v4074_v17 = vld [vmem:[#allocation22_spill] sm:$0xff] }
 0x1dc   :  { %v567_v25 = vsub.f32 1.0, %v563_v30  ;;  %v569_v16 = vmul.f32 0.0, %v563_v30 }
 0x1dd   :  { %v2134_v15 = vpop.eup %2133 }
 0x1de   :  { %v568_v24 = vmul.f32 %v2134_v15, %v567_v25  ;;  %v4077_v25 = vld [vmem:[#allocation35_spill] sm:$0xff] }
 0x1df   :  { %v399_v8 = vadd.f32 %v4078_v39, %v4077_v25 }
 0x1e0   :  { %v2983_v37 = vadd.f32 %v569_v16, %v568_v24 }
 0x1e2   :  { %591 = vmatmul.f32.vlgmr.msrb.gmra.mxu3 %v2983_v37  ;;  %611 = vmatmul.f32.vlgmr.msra.gmra.mxu0 %v2983_v37 }
 0x1e3   :  { %631 = vmatmul.f32.vlgmr.msra.gmra.mxu1 %v2983_v37  ;;  %777 = vmatpush.msrb.mxu3 %v2680_v41 }
 0x1e4   :  { %818 = vmatpush.msra.mxu0 %v2621_v35  ;;  %838 = vmatpush.msra.mxu1 %v2678_v26  ;;  %v4070_v35 = vld [vmem:[#allocation24_spill] sm:$0xff] }
 0x1e5   :  { %778 = vmatpush.msrb.mxu3 %v2687_v42  ;;  %4076 = vst [vmem:[#allocation24_spill] sm:$0xff] %v3036_v31 }
 0x1e6   :  { %819 = vmatpush.msra.mxu0 %v2624_v40  ;;  %839 = vmatpush.msra.mxu1 %v2682_v28  ;;  %v4071_v40 = vld [vmem:[#allocation21_spill] sm:$0xff] }
 0x1e7   :  { %779 = vmatpush.msrb.mxu3 %v2698_v45 }
 0x1e8   :  { %820 = vmatpush.msra.mxu0 %v2626_v44  ;;  %840 = vmatpush.msra.mxu1 %v2696_v43  ;;  %v4072_v44 = vld [vmem:[#allocation23_spill] sm:$0xff] }
 0x1e9   :  { %780 = vmatpush.msrb.mxu3 %v2705_v47 }
 0x1ea   :  { %821 = vmatpush.msra.mxu0 %v2631_v48  ;;  %841 = vmatpush.msra.mxu1 %v2700_v46 }
 0x1eb   :  { %781 = vmatpush.msrb.mxu3 %v2716_v50 }
 0x1ec   :  { %822 = vmatpush.msra.mxu0 %v2634_v52  ;;  %842 = vmatpush.msra.mxu1 %v2714_v49 }
 0x1ed   :  { %782 = vmatpush.msrb.mxu3 %v2723_v53 }
 0x1ee   :  { %823 = vmatpush.msra.mxu0 %v2637_v56  ;;  %843 = vmatpush.msra.mxu1 %v2718_v51 }
 0x1ef   :  { %783 = vmatpush.msrb.mxu3 %v2734_v55 }
 0x1f0   :  { %824 = vmatpush.msra.mxu0 %v2640_v61  ;;  %844 = vmatpush.msra.mxu1 %v2732_v54 }
 0x1f1   :  { %784 = vmatpush.msrb.mxu3 %v2741_v58 }
 0x1f2   :  { %825 = vmatpush.msra.mxu0 %v2643_v1  ;;  %845 = vmatpush.msra.mxu1 %v2736_v57 }
 0x1f3   :  { %785 = vmatpush.msrb.mxu3 %v2752_v62 }
 0x1f4   :  { %826 = vmatpush.msra.mxu0 %v2648_v5  ;;  %846 = vmatpush.msra.mxu1 %v2750_v60 }
 0x1f5   :  { %786 = vmatpush.msrb.mxu3 %v2758_v0 }
 0x1f6   :  { %827 = vmatpush.msra.mxu0 %v2651_v9  ;;  %847 = vmatpush.msra.mxu1 %v2754_v63 }
 0x1f7   :  { %787 = vmatpush.msrb.mxu3 %v2769_v4 }
 0x1f8   :  { %828 = vmatpush.msra.mxu0 %v2654_v14  ;;  %848 = vmatpush.msra.mxu1 %v2767_v3 }
 0x1f9   :  { %788 = vmatpush.msrb.mxu3 %v2775_v7 }
 0x1fa   :  { %829 = vmatpush.msra.mxu0 %v2659_v18  ;;  %849 = vmatpush.msra.mxu1 %v2771_v6 }
 0x1fb   :  { %789 = vmatpush.msrb.mxu3 %v2786_v11 }
 0x1fc   :  { %830 = vmatpush.msra.mxu0 %v2662_v22  ;;  %850 = vmatpush.msra.mxu1 %v2784_v10 }
 0x1fd   :  { %790 = vmatpush.msrb.mxu3 %v2792_v13 }
 0x1fe   :  { %831 = vmatpush.msra.mxu0 %v2665_v27  ;;  %851 = vmatpush.msra.mxu1 %v2788_v12 }
 0x1ff   :  { %791 = vmatpush.msrb.mxu3 %v4070_v35 }
 0x200   :  { %832 = vmatpush.msra.mxu0 %v4071_v40  ;;  %852 = vmatpush.msra.mxu1 %v4072_v44  ;;  %v4082_v44 = vld [vmem:[#allocation30_spill] sm:$0xff] }
 0x201   :  { %792 = vmatpush.msrb.mxu3 %v4073_v33 }
 0x202   :  { %833 = vmatpush.msra.mxu0 %v4074_v17  ;;  %853 = vmatpush.msra.mxu1 %v4075_v20 }
 0x25f   :  { %v612_v32 = vpop.f32.mrf.mxu0 }
 0x260   :  { %v613_v2 = vadd.f32 %v612_v32, %v2972_v21  ;;  %v632_v31 = vpop.f32.mrf.mxu1 }
 0x261   :  { %v633_v32 = vadd.f32 %v632_v31, %v2979_v29 }
 0x262   :  { %v640_v15 = vadd.f32 %v613_v2, %v399_v8 }
 0x264   :  { %v641_v36 = vmul.f32 0.5, %v640_v15 }
 0x265   :  { %v592_v34 = vpop.f32.mrf.mxu3 }
 0x266   :  { %v593_v30 = vadd.f32 %v592_v34, %v4081_v23 }
 0x268   :  { %v635_v16 = vadd.f32 %v593_v30, %v358_v59 }
 0x26a   :  { %v636_v24 = vmul.f32 0.5, %v635_v16 }
 0x26c   :  { %2135 = vtanh.f32 %v636_v24 }
 0x26d   :  { %2137 = vtanh.f32 %v641_v36  ;;  %v3053_v36 = vld [vmem:[#allocation9 + $0x168] sm:$0xff] }
 0x272   :  { %v2136_v20 = vpop.eup %2135 }
 0x273   :  { %v638_v17 = vadd.f32 1.0, %v2136_v20  ;;  %v2138_v33 = vpop.eup %2137 }
 0x274   :  { %v643_v25 = vadd.f32 1.0, %v2138_v33 }
 0x275   :  { %v639_v21 = vmul.f32 0.5, %v638_v17  ;;  %v4091_v17 = vld [vmem:[#allocation50_spill] sm:$0xff] }
 0x276   :  { %v644_v38 = vmul.f32 0.5, %v643_v25 }
 0x277   :  { %v645_v39 = vmul.f32 %v639_v21, %v633_v32  ;;  %v3058_v21 = vld [vmem:[#allocation9 + $0x150] sm:$0xff] }
 0x278   :  { %v648_v34 = vsub.f32 1.0, %v644_v38  ;;  %v650_v8 = vmul.f32 %v644_v38, %v2983_v37 }
 0x279   :  { %v646_v40 = vadd.f32 %v645_v39, %v4082_v44 }
 0x27b   :  { %2139 = vtanh.f32 %v646_v40  ;;  %v3063_v40 = vld [vmem:[#allocation9 + $0x138] sm:$0xff] }
 0x281   :  { %v2140_v2 = vpop.eup %2139 }
 0x282   :  { %v649_v59 = vmul.f32 %v2140_v2, %v648_v34 }
 0x284   :  { %v3047_v30 = vadd.f32 %v650_v8, %v649_v59 }
 0x286   :  { %672 = vmatmul.f32.vlgmr.msra.gmra.mxu2 %v3047_v30  ;;  %692 = vmatmul.f32.vlgmr.msra.gmra.mxu3 %v3047_v30 }
 0x287   :  { %712 = vmatmul.f32.vlgmr.msrb.gmra.mxu0 %v3047_v30  ;;  %858 = vmatpush.msra.mxu2 %v2680_v41 }
 0x288   :  { %899 = vmatpush.msra.mxu3 %v3053_v36  ;;  %919 = vmatpush.msrb.mxu0 %v2678_v26 }
 0x289   :  { %859 = vmatpush.msra.mxu2 %v2687_v42 }
 0x28a   :  { %900 = vmatpush.msra.mxu3 %v3058_v21  ;;  %920 = vmatpush.msrb.mxu0 %v2682_v28 }
 0x28b   :  { %860 = vmatpush.msra.mxu2 %v2698_v45 }
 0x28c   :  { %901 = vmatpush.msra.mxu3 %v3063_v40  ;;  %921 = vmatpush.msrb.mxu0 %v2696_v43 }
 0x28d   :  { %861 = vmatpush.msra.mxu2 %v2705_v47 }
 0x28e   :  { %902 = vmatpush.msra.mxu3 %v2631_v48  ;;  %922 = vmatpush.msrb.mxu0 %v2700_v46  ;;  %v4083_v48 = vld [vmem:[#allocation21_spill] sm:$0xff] }
 0x28f   :  { %862 = vmatpush.msra.mxu2 %v2716_v50 }
 0x290   :  { %903 = vmatpush.msra.mxu3 %v2634_v52  ;;  %923 = vmatpush.msrb.mxu0 %v2714_v49  ;;  %v4084_v52 = vld [vmem:[#allocation23_spill] sm:$0xff] }
 0x291   :  { %863 = vmatpush.msra.mxu2 %v2723_v53 }
 0x292   :  { %904 = vmatpush.msra.mxu3 %v2637_v56  ;;  %924 = vmatpush.msrb.mxu0 %v2718_v51  ;;  %v4085_v56 = vld [vmem:[#allocation26_spill] sm:$0xff] }
 0x293   :  { %864 = vmatpush.msra.mxu2 %v2734_v55 }
 0x294   :  { %905 = vmatpush.msra.mxu3 %v2640_v61  ;;  %925 = vmatpush.msrb.mxu0 %v2732_v54  ;;  %v4086_v61 = vld [vmem:[#allocation22_spill] sm:$0xff] }
 0x295   :  { %865 = vmatpush.msra.mxu2 %v2741_v58 }
 0x296   :  { %906 = vmatpush.msra.mxu3 %v2643_v1  ;;  %926 = vmatpush.msrb.mxu0 %v2736_v57  ;;  %v4087_v1 = vld [vmem:[#allocation25_spill] sm:$0xff] }
 0x297   :  { %866 = vmatpush.msra.mxu2 %v2752_v62 }
 0x298   :  { %907 = vmatpush.msra.mxu3 %v2648_v5  ;;  %927 = vmatpush.msrb.mxu0 %v2750_v60 }
 0x299   :  { %867 = vmatpush.msra.mxu2 %v2758_v0 }
 0x29a   :  { %908 = vmatpush.msra.mxu3 %v2651_v9  ;;  %928 = vmatpush.msrb.mxu0 %v2754_v63 }
 0x29b   :  { %868 = vmatpush.msra.mxu2 %v2769_v4 }
 0x29c   :  { %909 = vmatpush.msra.mxu3 %v2654_v14  ;;  %929 = vmatpush.msrb.mxu0 %v2767_v3  ;;  %v4088_v14 = vld [vmem:[#allocation31_spill] sm:$0xff] }
 0x29d   :  { %869 = vmatpush.msra.mxu2 %v2775_v7 }
 0x29e   :  { %910 = vmatpush.msra.mxu3 %v2659_v18  ;;  %930 = vmatpush.msrb.mxu0 %v2771_v6  ;;  %v361_v18 = vadd.f32 %v4088_v14, %v4079_v19 }
 0x29f   :  { %870 = vmatpush.msra.mxu2 %v2786_v11 }
 0x2a0   :  { %911 = vmatpush.msra.mxu3 %v2662_v22  ;;  %931 = vmatpush.msrb.mxu0 %v2784_v10  ;;  %v4089_v22 = vld [vmem:[#allocation35_spill] sm:$0xff] }
 0x2a1   :  { %871 = vmatpush.msra.mxu2 %v2792_v13 }
 0x2a2   :  { %912 = vmatpush.msra.mxu3 %v2665_v27  ;;  %932 = vmatpush.msrb.mxu0 %v2788_v12  ;;  %v4090_v27 = vld [vmem:[#allocation32_spill] sm:$0xff] }
 0x2a3   :  { %872 = vmatpush.msra.mxu2 %v4070_v35  ;;  %v402_v44 = vadd.f32 %v4090_v27, %v4089_v22 }
 0x2a4   :  { %913 = vmatpush.msra.mxu3 %v4083_v48  ;;  %933 = vmatpush.msrb.mxu0 %v4084_v52  ;;  %v4092_v48 = vld [vmem:[#allocation33_spill] sm:$0xff] }
 0x2a5   :  { %873 = vmatpush.msra.mxu2 %v4085_v56 }
 0x2a6   :  { %914 = vmatpush.msra.mxu3 %v4086_v61  ;;  %934 = vmatpush.msrb.mxu0 %v4087_v1 }
 0x304   :  { %v713_v32 = vpop.f32.mrf.mxu0 }
 0x305   :  { %v714_v34 = vadd.f32 %v713_v32, %v2979_v29 }
 0x309   :  { %v673_v5 = vpop.f32.mrf.mxu2  ;;  %v693_v9 = vpop.f32.mrf.mxu3 }
 0x30a   :  { %v674_v33 = vadd.f32 %v673_v5, %v4081_v23  ;;  %v694_v20 = vadd.f32 %v693_v9, %v4091_v17 }
 0x30c   :  { %v716_v31 = vadd.f32 %v674_v33, %v361_v18  ;;  %v721_v25 = vadd.f32 %v694_v20, %v402_v44  ;;  %v3130_v44 = vld [vmem:[#allocation9 + $0x120] sm:$0xff] }
 0x30e   :  { %v717_v15 = vmul.f32 0.5, %v716_v31  ;;  %v722_v16 = vmul.f32 0.5, %v721_v25 }
 0x310   :  { %2141 = vtanh.f32 %v717_v15  ;;  %v4094_v15 = vld [vmem:[#allocation37_spill] sm:$0xff] }
 0x311   :  { %2143 = vtanh.f32 %v722_v16 }
 0x316   :  { %v2142_v24 = vpop.eup %2141 }
 0x317   :  { %v719_v39 = vadd.f32 1.0, %v2142_v24  ;;  %v2144_v38 = vpop.eup %2143 }
 0x318   :  { %v724_v59 = vadd.f32 1.0, %v2144_v38 }
 0x319   :  { %v720_v2 = vmul.f32 0.5, %v719_v39 }
 0x31a   :  { %v725_v5 = vmul.f32 0.5, %v724_v59 }
 0x31b   :  { %v726_v8 = vmul.f32 %v720_v2, %v714_v34 }
 0x31c   :  { %v729_v9 = vsub.f32 1.0, %v725_v5  ;;  %v731_v22 = vmul.f32 %v725_v5, %v3047_v30 }
 0x31d   :  { %v727_v61 = vadd.f32 %v726_v8, %v4092_v48  ;;  %v4095_v48 = vld [vmem:[#allocation38_spill] sm:$0xff] }
 0x31f   :  { %2145 = vtanh.f32 %v727_v61 }
 0x325   :  { %v2146_v14 = vpop.eup %2145 }
 0x326   :  { %v730_v18 = vmul.f32 %v2146_v14, %v729_v9 }
 0x328   :  { %v3115_v27 = vadd.f32 %v731_v22, %v730_v18 }
 0x32a   :  { %753 = vmatmul.f32.vlgmr.msrb.gmra.mxu1 %v3115_v27  ;;  %773 = vmatmul.f32.vlgmr.msrb.gmra.mxu2 %v3115_v27 }
 0x32b   :  { %793 = vmatmul.f32.vlgmr.msrb.gmra.mxu3 %v3115_v27  ;;  %939 = vmatpush.msrb.mxu1 %v2680_v41  ;;  %v3140_v41 = vld [vmem:[#allocation9 + $0xf0] sm:$0xff] }
 0x32c   :  { %980 = vmatpush.msrb.mxu2 %v3053_v36  ;;  %1000 = vmatpush.msrb.mxu3 %v2678_v26  ;;  %v3135_v26 = vld [vmem:[#allocation9 + $0x108] sm:$0xff] }
 0x32d   :  { %940 = vmatpush.msrb.mxu1 %v2687_v42  ;;  %v3150_v42 = vld [vmem:[#allocation9 + $0xc0] sm:$0xff] }
 0x32e   :  { %981 = vmatpush.msrb.mxu2 %v3058_v21  ;;  %1001 = vmatpush.msrb.mxu3 %v2682_v28  ;;  %v3145_v28 = vld [vmem:[#allocation9 + $0xd8] sm:$0xff] }
 0x32f   :  { %941 = vmatpush.msrb.mxu1 %v2698_v45  ;;  %v3160_v45 = vld [vmem:[#allocation9 + $0x90] sm:$0xff] }
 0x330   :  { %982 = vmatpush.msrb.mxu2 %v3063_v40  ;;  %1002 = vmatpush.msrb.mxu3 %v2696_v43  ;;  %v3155_v43 = vld [vmem:[#allocation9 + $0xa8] sm:$0xff] }
 0x331   :  { %942 = vmatpush.msrb.mxu1 %v2705_v47  ;;  %v3170_v47 = vld [vmem:[#allocation9 + $0x60] sm:$0xff] }
 0x332   :  { %983 = vmatpush.msrb.mxu2 %v3130_v44  ;;  %1003 = vmatpush.msrb.mxu3 %v2700_v46  ;;  %v3165_v46 = vld [vmem:[#allocation9 + $0x78] sm:$0xff] }
 0x333   :  { %943 = vmatpush.msrb.mxu1 %v2716_v50  ;;  %v3180_v50 = vld [vmem:[#allocation9 + $0x30] sm:$0xff] }
 0x334   :  { %984 = vmatpush.msrb.mxu2 %v3135_v26  ;;  %1004 = vmatpush.msrb.mxu3 %v2714_v49  ;;  %v3175_v49 = vld [vmem:[#allocation9 + $0x48] sm:$0xff] }
 0x335   :  { %944 = vmatpush.msrb.mxu1 %v2723_v53  ;;  %v3190_v53 = vld [vmem:[#allocation9] sm:$0xff] }
 0x336   :  { %985 = vmatpush.msrb.mxu2 %v3140_v41  ;;  %1005 = vmatpush.msrb.mxu3 %v2718_v51  ;;  %v3185_v51 = vld [vmem:[#allocation9 + $0x18] sm:$0xff] }
 0x337   :  { %945 = vmatpush.msrb.mxu1 %v2734_v55  ;;  %v4093_v55 = vld [vmem:[#allocation34_spill] sm:$0xff] }
 0x338   :  { %986 = vmatpush.msrb.mxu2 %v3145_v28  ;;  %1006 = vmatpush.msrb.mxu3 %v2732_v54 }
 0x339   :  { %946 = vmatpush.msrb.mxu1 %v2741_v58 }
 0x33a   :  { %987 = vmatpush.msrb.mxu2 %v3150_v42  ;;  %1007 = vmatpush.msrb.mxu3 %v2736_v57  ;;  %v364_v57 = vadd.f32 %v4093_v55, %v4079_v19  ;;  %v3207_v55 = vld [vmem:[#allocation9 + $0x178] sm:$0xff] }
 0x33b   :  { %947 = vmatpush.msrb.mxu1 %v2752_v62 }
 0x33c   :  { %988 = vmatpush.msrb.mxu2 %v3155_v43  ;;  %1008 = vmatpush.msrb.mxu3 %v2750_v60 }
 0x33d   :  { %948 = vmatpush.msrb.mxu1 %v2758_v0 }
 0x33e   :  { %989 = vmatpush.msrb.mxu2 %v3160_v45  ;;  %1009 = vmatpush.msrb.mxu3 %v2754_v63 }
 0x33f   :  { %949 = vmatpush.msrb.mxu1 %v2769_v4 }
 0x340   :  { %990 = vmatpush.msrb.mxu2 %v3165_v46  ;;  %1010 = vmatpush.msrb.mxu3 %v2767_v3 }
 0x341   :  { %950 = vmatpush.msrb.mxu1 %v2775_v7 }
 0x342   :  { %991 = vmatpush.msrb.mxu2 %v3170_v47  ;;  %1011 = vmatpush.msrb.mxu3 %v2771_v6 }
 0x343   :  { %951 = vmatpush.msrb.mxu1 %v2786_v11 }
 0x344   :  { %992 = vmatpush.msrb.mxu2 %v3175_v49  ;;  %1012 = vmatpush.msrb.mxu3 %v2784_v10 }
 0x345   :  { %952 = vmatpush.msrb.mxu1 %v2792_v13 }
 0x346   :  { %993 = vmatpush.msrb.mxu2 %v3180_v50  ;;  %1013 = vmatpush.msrb.mxu3 %v2788_v12 }
 0x347   :  { %953 = vmatpush.msrb.mxu1 %v4070_v35 }
 0x348   :  { %994 = vmatpush.msrb.mxu2 %v3185_v51  ;;  %1014 = vmatpush.msrb.mxu3 %v4084_v52 }
 0x349   :  { %954 = vmatpush.msrb.mxu1 %v4085_v56 }
 0x34a   :  { %995 = vmatpush.msrb.mxu2 %v3190_v53  ;;  %1015 = vmatpush.msrb.mxu3 %v4087_v1 }
 0x3a7   :  { %v754_v54 = vpop.f32.mrf.mxu1 }
 0x3a8   :  { %v755_v58 = vadd.f32 %v754_v54, %v4081_v23 }
 0x3aa   :  { %v797_v33 = vadd.f32 %v755_v58, %v364_v57  ;;  %v2242_v57 = vld [vmem:[#allocation9 + $0x170] sm:$0xff]  ;;  %v3211_v58 = vld [vmem:[#allocation9 + $0x160] sm:$0xff] }
 0x3ac   :  { %v798_v20 = vmul.f32 0.5, %v797_v33  ;;  %v2244_v33 = vld [vmem:[#allocation9 + $0x158] sm:$0xff] }
 0x3ad   :  { %v774_v31 = vpop.f32.mrf.mxu2 }
 0x3ae   :  { %2147 = vtanh.f32 %v798_v20  ;;  %v775_v25 = vadd.f32 %v774_v31, %v4091_v17  ;;  %v794_v39 = vpop.f32.mrf.mxu3  ;;  %v3215_v20 = vld [vmem:[#allocation9 + $0x148] sm:$0xff]  ;;  %v2246_v31 = vld [vmem:[#allocation9 + $0x140] sm:$0xff] }
 0x3af   :  { %v795_v34 = vadd.f32 %v794_v39, %v2979_v29  ;;  %v2258_v39 = vld [vmem:[#allocation9 + $0xa0] sm:$0xff] }
 0x3b0   :  { %v802_v16 = vadd.f32 %v775_v25, %v4094_v15  ;;  %v3219_v25 = vld [vmem:[#allocation9 + $0x130] sm:$0xff]  ;;  %v3223_v15 = vld [vmem:[#allocation9 + $0x118] sm:$0xff] }
 0x3b2   :  { %v803_v24 = vmul.f32 0.5, %v802_v16  ;;  %v3227_v16 = vld [vmem:[#allocation9 + $0x100] sm:$0xff] }
 0x3b4   :  { %v2148_v32 = vpop.eup %2147  ;;  %2149 = vtanh.f32 %v803_v24  ;;  %v3231_v24 = vld [vmem:[#allocation9 + $0xe8] sm:$0xff] }
 0x3b5   :  { %v800_v38 = vadd.f32 1.0, %v2148_v32  ;;  %v3235_v32 = vld [vmem:[#allocation9 + $0xd0] sm:$0xff] }
 0x3b7   :  { %v801_v2 = vmul.f32 0.5, %v800_v38  ;;  %v2259_v38 = vld [vmem:[#allocation9 + $0x88] sm:$0xff] }
 0x3b9   :  { %v807_v8 = vmul.f32 %v801_v2, %v795_v34  ;;  %v2260_v34 = vld [vmem:[#allocation9 + $0x70] sm:$0xff]  ;;  %v2261_v2 = vld [vmem:[#allocation9 + $0x58] sm:$0xff] }
 0x3ba   :  { %v2150_v19 = vpop.eup %2149 }
 0x3bb   :  { %v805_v59 = vadd.f32 1.0, %v2150_v19  ;;  %v808_v61 = vadd.f32 %v807_v8, %v4095_v48  ;;  %v2262_v8 = vld [vmem:[#allocation9 + $0x40] sm:$0xff]  ;;  %v2263_v19 = vld [vmem:[#allocation9 + $0x28] sm:$0xff] }
 0x3bc   :  { %v1193_v48 = vld [vmem:[#allocation10 + $0x168] sm:$0xff] }
 0x3bd   :  { %2151 = vtanh.f32 %v808_v61  ;;  %v806_v5 = vmul.f32 0.5, %v805_v59  ;;  %v2264_v59 = vld [vmem:[#allocation9 + $0x10] sm:$0xff] }
 0x3be   :  { %v1190_v61 = vld [vmem:[#allocation10 + $0x150] sm:$0xff] }
 0x3bf   :  { %v810_v9 = vsub.f32 1.0, %v806_v5  ;;  %v812_v18 = vmul.f32 %v806_v5, %v3115_v27  ;;  %v1187_v5 = vld [vmem:[#allocation10 + $0x138] sm:$0xff] }
 0x3c3   :  { %v2152_v14 = vpop.eup %2151 }
 0x3c4   :  { %v811_v22 = vmul.f32 %v2152_v14, %v810_v9  ;;  %v1184_v9 = vld [vmem:[#allocation10 + $0x120] sm:$0xff]  ;;  %v1181_v14 = vld [vmem:[#allocation10 + $0x108] sm:$0xff] }
 0x3c6   :  { %v3202_v54 = vadd.f32 %v812_v18, %v811_v22  ;;  %v1178_v18 = vld [vmem:[#allocation10 + $0xf0] sm:$0xff]  ;;  %v1175_v22 = vld [vmem:[#allocation10 + $0xd8] sm:$0xff] }
 0x3c8   :  { %834 = vmatmul.f32.vlgmr.msra.gmra.mxu0 %v3202_v54  ;;  %854 = vmatmul.f32.vlgmr.msra.gmra.mxu1 %v3202_v54 }
 0x3c9   :  { %874 = vmatmul.f32.vlgmr.msra.gmra.mxu2 %v3202_v54  ;;  %1020 = vmatpush.msra.mxu0 %v3207_v55 }
 0x3ca   :  { %1061 = vmatpush.msra.mxu1 %v3053_v36  ;;  %1081 = vmatpush.msra.mxu2 %v2242_v57  ;;  %v2248_v36 = vld [vmem:[#allocation9 + $0x128] sm:$0xff] }
 0x3cb   :  { %1021 = vmatpush.msra.mxu0 %v3211_v58  ;;  %v1169_v57 = vld [vmem:[#allocation10 + $0xa8] sm:$0xff] }
 0x3cc   :  { %1062 = vmatpush.msra.mxu1 %v3058_v21  ;;  %1082 = vmatpush.msra.mxu2 %v2244_v33  ;;  %v2250_v21 = vld [vmem:[#allocation9 + $0x110] sm:$0xff] }
 0x3cd   :  { %1022 = vmatpush.msra.mxu0 %v3215_v20  ;;  %v1166_v33 = vld [vmem:[#allocation10 + $0x90] sm:$0xff] }
 0x3ce   :  { %1063 = vmatpush.msra.mxu1 %v3063_v40  ;;  %1083 = vmatpush.msra.mxu2 %v2246_v31  ;;  %v2252_v40 = vld [vmem:[#allocation9 + $0xf8] sm:$0xff] }
 0x3cf   :  { %1023 = vmatpush.msra.mxu0 %v3219_v25  ;;  %v1163_v31 = vld [vmem:[#allocation10 + $0x78] sm:$0xff] }
 0x3d0   :  { %1064 = vmatpush.msra.mxu1 %v3130_v44  ;;  %1084 = vmatpush.msra.mxu2 %v2248_v36  ;;  %v2254_v44 = vld [vmem:[#allocation9 + $0xe0] sm:$0xff] }
 0x3d1   :  { %1024 = vmatpush.msra.mxu0 %v3223_v15 }
 0x3d2   :  { %1065 = vmatpush.msra.mxu1 %v3135_v26  ;;  %1085 = vmatpush.msra.mxu2 %v2250_v21  ;;  %v2256_v26 = vld [vmem:[#allocation9 + $0xc8] sm:$0xff] }
 0x3d3   :  { %1025 = vmatpush.msra.mxu0 %v3227_v16  ;;  %v4099_v21 = vld [vmem:[#allocation44_spill] sm:$0xff] }
 0x3d4   :  { %1066 = vmatpush.msra.mxu1 %v3140_v41  ;;  %1086 = vmatpush.msra.mxu2 %v2252_v40  ;;  %v1157_v40 = vld [vmem:[#allocation10 + $0x48] sm:$0xff] }
 0x3d5   :  { %1026 = vmatpush.msra.mxu0 %v3231_v24 }
 0x3d6   :  { %1067 = vmatpush.msra.mxu1 %v3145_v28  ;;  %1087 = vmatpush.msra.mxu2 %v2254_v44  ;;  %v4100_v44 = vld [vmem:[#allocation42_spill] sm:$0xff] }
 0x3d7   :  { %1027 = vmatpush.msra.mxu0 %v3235_v32 }
 0x3d8   :  { %1068 = vmatpush.msra.mxu1 %v3150_v42  ;;  %1088 = vmatpush.msra.mxu2 %v2256_v26  ;;  %v4098_v42 = vld [vmem:[#allocation41_spill] sm:$0xff]  ;;  %v1151_v26 = vld [vmem:[#allocation10 + $0x18] sm:$0xff] }
 0x3d9   :  { %1028 = vmatpush.msra.mxu0 %v2752_v62 }
 0x3da   :  { %1069 = vmatpush.msra.mxu1 %v3155_v43  ;;  %1089 = vmatpush.msra.mxu2 %v2750_v60 }
 0x3db   :  { %1029 = vmatpush.msra.mxu0 %v2758_v0 }
 0x3dc   :  { %1070 = vmatpush.msra.mxu1 %v3160_v45  ;;  %1090 = vmatpush.msra.mxu2 %v2754_v63 }
 0x3dd   :  { %1030 = vmatpush.msra.mxu0 %v2769_v4 }
 0x3de   :  { %1071 = vmatpush.msra.mxu1 %v3165_v46  ;;  %1091 = vmatpush.msra.mxu2 %v2767_v3  ;;  %v4096_v3 = vld [vmem:[#allocation39_spill] sm:$0xff] }
 0x3df   :  { %1031 = vmatpush.msra.mxu0 %v2775_v7 }
 0x3e0   :  { %1072 = vmatpush.msra.mxu1 %v3170_v47  ;;  %1092 = vmatpush.msra.mxu2 %v2771_v6  ;;  %v4097_v6 = vld [vmem:[#allocation40_spill] sm:$0xff] }
 0x3e1   :  { %1032 = vmatpush.msra.mxu0 %v2786_v11 }
 0x3e2   :  { %1073 = vmatpush.msra.mxu1 %v3175_v49  ;;  %1093 = vmatpush.msra.mxu2 %v2784_v10 }
 0x3e3   :  { %1033 = vmatpush.msra.mxu0 %v2792_v13 }
 0x3e4   :  { %1074 = vmatpush.msra.mxu1 %v3180_v50  ;;  %1094 = vmatpush.msra.mxu2 %v2788_v12 }
 0x3e5   :  { %1034 = vmatpush.msra.mxu0 %v4070_v35 }
 0x3e6   :  { %1075 = vmatpush.msra.mxu1 %v3185_v51  ;;  %1095 = vmatpush.msra.mxu2 %v4084_v52 }
 0x3e7   :  { %1035 = vmatpush.msra.mxu0 %v4085_v56 }
 0x3e8   :  { %1076 = vmatpush.msra.mxu1 %v3190_v53  ;;  %1096 = vmatpush.msra.mxu2 %v4087_v1  ;;  %v2257_v53 = vld [vmem:[#allocation9 + $0xb8] sm:$0xff] }
 0x445   :  { %v835_v60 = vpop.f32.mrf.mxu0  ;;  %v855_v62 = vpop.f32.mrf.mxu1 }
 0x446   :  { %v836_v63 = vadd.f32 %v835_v60, %v4081_v23  ;;  %v856_v0 = vadd.f32 %v855_v62, %v4091_v17 }
 0x448   :  { %v878_v4 = vadd.f32 %v836_v63, %v4096_v3  ;;  %v883_v7 = vadd.f32 %v856_v0, %v4097_v6  ;;  %v1148_v63 = vld [vmem:[#allocation10] sm:$0xff] }
 0x44a   :  { %v879_v10 = vmul.f32 0.5, %v878_v4  ;;  %v884_v11 = vmul.f32 0.5, %v883_v7 }
 0x44c   :  { %2153 = vtanh.f32 %v879_v10  ;;  %v875_v13 = vpop.f32.mrf.mxu2 }
 0x44d   :  { %2155 = vtanh.f32 %v884_v11  ;;  %v876_v56 = vadd.f32 %v875_v13, %v2979_v29  ;;  %v4101_v13 = vld [vmem:[#allocation45_spill] sm:$0xff] }
 0x452   :  { %v2154_v12 = vpop.eup %2153 }
 0x453   :  { %v881_v35 = vadd.f32 1.0, %v2154_v12  ;;  %v2156_v52 = vpop.eup %2155 }
 0x454   :  { %v886_v28 = vadd.f32 1.0, %v2156_v52 }
 0x455   :  { %v882_v1 = vmul.f32 0.5, %v881_v35 }
 0x456   :  { %v887_v45 = vmul.f32 0.5, %v886_v28 }
 0x457   :  { %v888_v41 = vmul.f32 %v882_v1, %v876_v56 }
 0x458   :  { %v891_v46 = vsub.f32 1.0, %v887_v45  ;;  %v893_v49 = vmul.f32 %v887_v45, %v3202_v54  ;;  %v3304_v45 = vld [vmem:[#allocation12 + $0x150] sm:$0xff] }
 0x459   :  { %v889_v43 = vadd.f32 %v888_v41, %v4098_v42 }
 0x45b   :  { %2157 = vtanh.f32 %v889_v43  ;;  %v3301_v43 = vld [vmem:[#allocation12 + $0x168] sm:$0xff] }
 0x461   :  { %v2158_v47 = vpop.eup %2157 }
 0x462   :  { %v892_v50 = vmul.f32 %v2158_v47, %v891_v46  ;;  %v3307_v46 = vld [vmem:[#allocation12 + $0x138] sm:$0xff]  ;;  %v3310_v47 = vld [vmem:[#allocation12 + $0x120] sm:$0xff] }
 0x464   :  { %v3270_v51 = vadd.f32 %v893_v49, %v892_v50  ;;  %v1194_v49 = vld [vmem:[#allocation10 + $0x170] sm:$0xff]  ;;  %v1195_v50 = vld [vmem:[#allocation10 + $0x178] sm:$0xff] }
 0x466   :  { %915 = vmatmul.f32.vlgmr.msra.gmra.mxu3 %v3270_v51  ;;  %935 = vmatmul.f32.vlgmr.msrb.gmra.mxu0 %v3270_v51 }
 0x467   :  { %955 = vmatmul.f32.vlgmr.msrb.gmra.mxu1 %v3270_v51  ;;  %1101 = vmatpush.msra.mxu3 %v3207_v55  ;;  %v1172_v55 = vld [vmem:[#allocation10 + $0xc0] sm:$0xff] }
 0x468   :  { %1253 = vmatpush.msrb.mxu0 %v1193_v48  ;;  %1294 = vmatpush.msrb.mxu1 %v1194_v49  ;;  %v1186_v48 = vld [vmem:[#allocation10 + $0x130] sm:$0xff]  ;;  %v1153_v49 = vld [vmem:[#allocation10 + $0x28] sm:$0xff] }
 0x469   :  { %1102 = vmatpush.msra.mxu3 %v3211_v58 }
 0x46a   :  { %1254 = vmatpush.msrb.mxu0 %v1190_v61  ;;  %v3322_v61 = vld [vmem:[#allocation12 + $0xc0] sm:$0xff] }
 0x46b   :  { %1103 = vmatpush.msra.mxu3 %v3215_v20 }
 0x46c   :  { %1255 = vmatpush.msrb.mxu0 %v1187_v5  ;;  %v1182_v5 = vld [vmem:[#allocation10 + $0x110] sm:$0xff] }
 0x46d   :  { %1104 = vmatpush.msra.mxu3 %v3219_v25  ;;  %v1160_v25 = vld [vmem:[#allocation10 + $0x60] sm:$0xff] }
 0x46e   :  { %1256 = vmatpush.msrb.mxu0 %v1184_v9  ;;  %v1183_v9 = vld [vmem:[#allocation10 + $0x118] sm:$0xff] }
 0x46f   :  { %1105 = vmatpush.msra.mxu3 %v3223_v15 }
 0x470   :  { %1257 = vmatpush.msrb.mxu0 %v1181_v14  ;;  %v3325_v14 = vld [vmem:[#allocation12 + $0xa8] sm:$0xff] }
 0x471   :  { %1106 = vmatpush.msra.mxu3 %v3227_v16 }
 0x472   :  { %1258 = vmatpush.msrb.mxu0 %v1178_v18  ;;  %v1179_v18 = vld [vmem:[#allocation10 + $0xf8] sm:$0xff] }
 0x473   :  { %1107 = vmatpush.msra.mxu3 %v3231_v24  ;;  %v1154_v24 = vld [vmem:[#allocation10 + $0x30] sm:$0xff] }
 0x474   :  { %1259 = vmatpush.msrb.mxu0 %v1175_v22  ;;  %v1180_v22 = vld [vmem:[#allocation10 + $0x100] sm:$0xff] }
 0x475   :  { %1108 = vmatpush.msra.mxu3 %v3235_v32 }
 0x476   :  { %1260 = vmatpush.msrb.mxu0 %v1172_v55  ;;  %v3328_v55 = vld [vmem:[#allocation12 + $0x90] sm:$0xff] }
 0x477   :  { %1109 = vmatpush.msra.mxu3 %v2257_v53  ;;  %v3313_v53 = vld [vmem:[#allocation12 + $0x108] sm:$0xff] }
 0x478   :  { %1261 = vmatpush.msrb.mxu0 %v1169_v57  ;;  %v1176_v57 = vld [vmem:[#allocation10 + $0xe0] sm:$0xff] }
 0x479   :  { %1110 = vmatpush.msra.mxu3 %v2258_v39  ;;  %v1191_v39 = vld [vmem:[#allocation10 + $0x158] sm:$0xff] }
 0x47a   :  { %1262 = vmatpush.msrb.mxu0 %v1166_v33  ;;  %1295 = vmatpush.msrb.mxu1 %v1191_v39  ;;  %v3331_v33 = vld [vmem:[#allocation12 + $0x78] sm:$0xff]  ;;  %v1150_v39 = vld [vmem:[#allocation10 + $0x10] sm:$0xff] }
 0x47b   :  { %1111 = vmatpush.msra.mxu3 %v2259_v38  ;;  %v1192_v38 = vld [vmem:[#allocation10 + $0x160] sm:$0xff] }
 0x47c   :  { %1263 = vmatpush.msrb.mxu0 %v1163_v31  ;;  %v1174_v31 = vld [vmem:[#allocation10 + $0xd0] sm:$0xff] }
 0x47d   :  { %1112 = vmatpush.msra.mxu3 %v2260_v34  ;;  %v3316_v34 = vld [vmem:[#allocation12 + $0xf0] sm:$0xff] }
 0x47e   :  { %1264 = vmatpush.msrb.mxu0 %v1160_v25  ;;  %v3334_v25 = vld [vmem:[#allocation12 + $0x60] sm:$0xff] }
 0x47f   :  { %1113 = vmatpush.msra.mxu3 %v2261_v2  ;;  %v1188_v2 = vld [vmem:[#allocation10 + $0x140] sm:$0xff] }
 0x480   :  { %1265 = vmatpush.msrb.mxu0 %v1157_v40  ;;  %1296 = vmatpush.msrb.mxu1 %v1188_v2  ;;  %v1168_v40 = vld [vmem:[#allocation10 + $0xa0] sm:$0xff] }
 0x481   :  { %1114 = vmatpush.msra.mxu3 %v2262_v8  ;;  %v1189_v8 = vld [vmem:[#allocation10 + $0x148] sm:$0xff] }
 0x482   :  { %1266 = vmatpush.msrb.mxu0 %v1154_v24  ;;  %v3340_v24 = vld [vmem:[#allocation12 + $0x30] sm:$0xff] }
 0x483   :  { %1115 = vmatpush.msra.mxu3 %v2263_v19  ;;  %v3319_v19 = vld [vmem:[#allocation12 + $0xd8] sm:$0xff] }
 0x484   :  { %1267 = vmatpush.msrb.mxu0 %v1151_v26  ;;  %v3343_v26 = vld [vmem:[#allocation12 + $0x18] sm:$0xff] }
 0x485   :  { %1116 = vmatpush.msra.mxu3 %v2264_v59  ;;  %v1185_v59 = vld [vmem:[#allocation10 + $0x128] sm:$0xff] }
 0x486   :  { %1268 = vmatpush.msrb.mxu0 %v1148_v63  ;;  %1297 = vmatpush.msrb.mxu1 %v1185_v59  ;;  %v3345_v63 = vld [vmem:[#allocation12] sm:$0xff] }
 0x487   :  { %4102 = vst [vmem:[#allocation29_spill] sm:$0xff] %v3345_v63 }
 0x488   :  { %1298 = vmatpush.msrb.mxu1 %v1182_v5 }
 0x48a   :  { %1299 = vmatpush.msrb.mxu1 %v1179_v18 }
 0x48c   :  { %1300 = vmatpush.msrb.mxu1 %v1176_v57 }
 0x4e3   :  { %v936_v58 = vpop.f32.mrf.mxu0 }
 0x4e4   :  { %v937_v20 = vadd.f32 %v936_v58, %v4091_v17  ;;  %v956_v3 = vpop.f32.mrf.mxu1  ;;  %v1177_v58 = vld [vmem:[#allocation10 + $0xe8] sm:$0xff] }
 0x4e5   :  { %v957_v7 = vadd.f32 %v956_v3, %v2979_v29 }
 0x4e6   :  { %v964_v16 = vadd.f32 %v937_v20, %v4099_v21  ;;  %v1173_v20 = vld [vmem:[#allocation10 + $0xc8] sm:$0xff] }
 0x4e7   :  { %1301 = vmatpush.msrb.mxu1 %v1173_v20  ;;  %v3337_v21 = vld [vmem:[#allocation12 + $0x48] sm:$0xff] }
 0x4e8   :  { %v965_v62 = vmul.f32 0.5, %v964_v16  ;;  %v1167_v16 = vld [vmem:[#allocation10 + $0x98] sm:$0xff] }
 0x4e9   :  { %v916_v36 = vpop.f32.mrf.mxu3 }
 0x4ea   :  { %v917_v15 = vadd.f32 %v916_v36, %v4081_v23  ;;  %v1170_v36 = vld [vmem:[#allocation10 + $0xb0] sm:$0xff] }
 0x4eb   :  { %1302 = vmatpush.msrb.mxu1 %v1170_v36 }
 0x4ec   :  { %v959_v32 = vadd.f32 %v917_v15, %v4100_v44  ;;  %v1171_v15 = vld [vmem:[#allocation10 + $0xb8] sm:$0xff]  ;;  %v1164_v44 = vld [vmem:[#allocation10 + $0x80] sm:$0xff] }
 0x4ed   :  { %1303 = vmatpush.msrb.mxu1 %v1167_v16 }
 0x4ee   :  { %v960_v60 = vmul.f32 0.5, %v959_v32  ;;  %v1165_v32 = vld [vmem:[#allocation10 + $0x88] sm:$0xff] }
 0x4ef   :  { %1304 = vmatpush.msrb.mxu1 %v1164_v44  ;;  %v3364_v44 = vld [vmem:[#allocation12 + $0x158] sm:$0xff] }
 0x4f0   :  { %2159 = vtanh.f32 %v960_v60  ;;  %v1161_v60 = vld [vmem:[#allocation10 + $0x68] sm:$0xff] }
 0x4f1   :  { %2161 = vtanh.f32 %v965_v62  ;;  %v1162_v62 = vld [vmem:[#allocation10 + $0x70] sm:$0xff]  ;;  %1305 = vmatpush.msrb.mxu1 %v1161_v60  ;;  %v3373_v60 = vld [vmem:[#allocation12 + $0x128] sm:$0xff] }
 0x4f6   :  { %v2160_v0 = vpop.eup %2159 }
 0x4f7   :  { %v962_v4 = vadd.f32 1.0, %v2160_v0  ;;  %v2162_v6 = vpop.eup %2161 }
 0x4f8   :  { %v967_v12 = vadd.f32 1.0, %v2162_v6 }
 0x4f9   :  { %v963_v10 = vmul.f32 0.5, %v962_v4 }
 0x4fa   :  { %v968_v52 = vmul.f32 0.5, %v967_v12 }
 0x4fb   :  { %v969_v11 = vmul.f32 %v963_v10, %v957_v7  ;;  %v4103_v7 = vld [vmem:[#allocation46_spill] sm:$0xff] }
 0x4fc   :  { %v972_v56 = vsub.f32 1.0, %v968_v52  ;;  %v974_v41 = vmul.f32 %v968_v52, %v3270_v51 }
 0x4fd   :  { %v970_v35 = vadd.f32 %v969_v11, %v4101_v13  ;;  %v4104_v11 = vld [vmem:[#allocation47_spill] sm:$0xff]  ;;  %v1158_v13 = vld [vmem:[#allocation10 + $0x50] sm:$0xff] }
 0x4fe   :  { %1306 = vmatpush.msrb.mxu1 %v1158_v13  ;;  %v3428_v13 = vld [vmem:[#allocation12 + $0x178] sm:$0xff] }
 0x4ff   :  { %2163 = vtanh.f32 %v970_v35  ;;  %v1159_v35 = vld [vmem:[#allocation10 + $0x58] sm:$0xff] }
 0x505   :  { %v2164_v1 = vpop.eup %2163 }
 0x506   :  { %v973_v28 = vmul.f32 %v2164_v1, %v972_v56  ;;  %v1155_v56 = vld [vmem:[#allocation10 + $0x38] sm:$0xff]  ;;  %v1156_v1 = vld [vmem:[#allocation10 + $0x40] sm:$0xff] }
 0x507   :  { %1307 = vmatpush.msrb.mxu1 %v1155_v56  ;;  %v3437_v56 = vld [vmem:[#allocation12 + $0x148] sm:$0xff] }
 0x508   :  { %v3290_v42 = vadd.f32 %v974_v41, %v973_v28  ;;  %v1152_v28 = vld [vmem:[#allocation10 + $0x20] sm:$0xff] }
 0x509   :  { %1308 = vmatpush.msrb.mxu1 %v1152_v28  ;;  %v3461_v28 = vld [vmem:[#allocation12 + $0x100] sm:$0xff] }
 0x50a   :  { %996 = vmatmul.f32.vlgmr.msrb.gmra.mxu2 %v3290_v42  ;;  %1016 = vmatmul.f32.vlgmr.msrb.gmra.mxu3 %v3290_v42 }
 0x50b   :  { %1036 = vmatmul.f32.vlgmr.msra.gmra.mxu0 %v3290_v42  ;;  %1410 = vmatpush.msrb.mxu3 %v3301_v43 }
 0x50c   :  { %1335 = vmatpush.msrb.mxu2 %v1195_v50  ;;  %v1149_v50 = vld [vmem:[#allocation10 + $0x8] sm:$0xff]  ;;  %1450 = vmatpush.msra.mxu0 %v3428_v13 }
 0x50d   :  { %1411 = vmatpush.msrb.mxu3 %v3304_v45  ;;  %1309 = vmatpush.msrb.mxu1 %v1149_v50  ;;  %v3520_v50 = vld [vmem:[#allocation12 + $0x88] sm:$0xff] }
 0x50e   :  { %1336 = vmatpush.msrb.mxu2 %v1192_v38 }
 0x50f   :  { %1412 = vmatpush.msrb.mxu3 %v3307_v46 }
 0x510   :  { %1337 = vmatpush.msrb.mxu2 %v1189_v8 }
 0x511   :  { %1413 = vmatpush.msrb.mxu3 %v3310_v47 }
 0x512   :  { %1338 = vmatpush.msrb.mxu2 %v1186_v48 }
 0x513   :  { %1269 = vmatmul.f32.vlgmr.msrb.gmra.mxu0 %v2983_v37  ;;  %1414 = vmatpush.msrb.mxu3 %v3313_v53 }
 0x514   :  { %1339 = vmatpush.msrb.mxu2 %v1183_v9 }
 0x515   :  { %1415 = vmatpush.msrb.mxu3 %v3316_v34 }
 0x516   :  { %1340 = vmatpush.msrb.mxu2 %v1180_v22  ;;  %v4105_v22 = vld [vmem:[#allocation48_spill] sm:$0xff] }
 0x517   :  { %1416 = vmatpush.msrb.mxu3 %v3319_v19 }
 0x518   :  { %1341 = vmatpush.msrb.mxu2 %v1177_v58 }
 0x519   :  { %1417 = vmatpush.msrb.mxu3 %v3322_v61 }
 0x51a   :  { %1342 = vmatpush.msrb.mxu2 %v1174_v31 }
 0x51b   :  { %1272 = vmatmul.f32.gmra.mxu0 %v3047_v30  ;;  %1418 = vmatpush.msrb.mxu3 %v3325_v14 }
 0x51c   :  { %1343 = vmatpush.msrb.mxu2 %v1171_v15 }
 0x51d   :  { %1419 = vmatpush.msrb.mxu3 %v3328_v55 }
 0x51e   :  { %1344 = vmatpush.msrb.mxu2 %v1168_v40  ;;  %v3358_v40 = vld [vmem:[#allocation12 + $0x170] sm:$0xff] }
 0x51f   :  { %1420 = vmatpush.msrb.mxu3 %v3331_v33 }
 0x520   :  { %1345 = vmatpush.msrb.mxu2 %v1165_v32  ;;  %v3368_v32 = vld [vmem:[#allocation12 + $0x140] sm:$0xff] }
 0x521   :  { %1421 = vmatpush.msrb.mxu3 %v3334_v25 }
 0x522   :  { %1346 = vmatpush.msrb.mxu2 %v1162_v62  ;;  %v3378_v62 = vld [vmem:[#allocation12 + $0x110] sm:$0xff] }
 0x523   :  { %1275 = vmatmul.f32.gmra.mxu0 %v3115_v27  ;;  %1422 = vmatpush.msrb.mxu3 %v3337_v21 }
 0x524   :  { %1347 = vmatpush.msrb.mxu2 %v1159_v35  ;;  %v3430_v35 = vld [vmem:[#allocation12 + $0x160] sm:$0xff] }
 0x525   :  { %1423 = vmatpush.msrb.mxu3 %v3340_v24  ;;  %1451 = vmatpush.msra.mxu0 %v3430_v35 }
 0x526   :  { %1348 = vmatpush.msrb.mxu2 %v1156_v1  ;;  %v3449_v1 = vld [vmem:[#allocation12 + $0x130] sm:$0xff] }
 0x527   :  { %1424 = vmatpush.msrb.mxu3 %v3343_v26  ;;  %1452 = vmatpush.msra.mxu0 %v3437_v56 }
 0x528   :  { %1349 = vmatpush.msrb.mxu2 %v1153_v49  ;;  %v3516_v49 = vld [vmem:[#allocation12 + $0xa0] sm:$0xff] }
 0x529   :  { %1425 = vmatpush.msrb.mxu3 %v3345_v63  ;;  %1453 = vmatpush.msra.mxu0 %v3449_v1 }
 0x52a   :  { %1350 = vmatpush.msrb.mxu2 %v1150_v39  ;;  %v3525_v39 = vld [vmem:[#allocation12 + $0x70] sm:$0xff] }
 0x52b   :  { %1278 = vmatmul.f32.gmra.mxu0 %v3202_v54 }
 0x533   :  { %1281 = vmatmul.f32.gmra.mxu0 %v3270_v51 }
 0x53b   :  { %1284 = vmatmul.f32.gmra.mxu0 %v3290_v42 }
 0x588   :  { %v1037_v2 = vpop.f32.mrf.mxu0 }
 0x589   :  { %v1038_v48 = vadd.f32 %v1037_v2, %v2979_v29 }
 0x58d   :  { %v997_v0 = vpop.f32.mrf.mxu2  ;;  %v1017_v3 = vpop.f32.mrf.mxu3 }
 0x58e   :  { %v998_v4 = vadd.f32 %v997_v0, %v4081_v23  ;;  %v1018_v6 = vadd.f32 %v1017_v3, %v4091_v17  ;;  %v4106_v0 = vmov 0.0   ;;  %v3385_v3 = vld [vmem:[#allocation12 + $0xf8] sm:$0xff] }
 0x590   :  { %v1040_v10 = vadd.f32 %v998_v4, %v4103_v7  ;;  %v1045_v12 = vadd.f32 %v1018_v6, %v4104_v11  ;;  %v3389_v4 = vld [vmem:[#allocation12 + $0xe0] sm:$0xff]  ;;  %v3394_v6 = vld [vmem:[#allocation12 + $0xc8] sm:$0xff]  ;;  %v3405_v7 = vld [vmem:[#allocation12 + $0x98] sm:$0xff] }
 0x591   :  { %v3415_v11 = vld [vmem:[#allocation12 + $0x68] sm:$0xff] }
 0x592   :  { %v1041_v52 = vmul.f32 0.5, %v1040_v10  ;;  %v1046_v41 = vmul.f32 0.5, %v1045_v12  ;;  %v3410_v10 = vld [vmem:[#allocation12 + $0x80] sm:$0xff]  ;;  %v3426_v12 = vld [vmem:[#allocation12 + $0x38] sm:$0xff] }
 0x594   :  { %2165 = vtanh.f32 %v1041_v52  ;;  %v3435_v52 = vld [vmem:[#allocation12 + $0x20] sm:$0xff] }
 0x595   :  { %2167 = vtanh.f32 %v1046_v41  ;;  %4107 = vst [vmem:[#allocation36_spill] sm:$0xff] %v3435_v52  ;;  %v3457_v41 = vld [vmem:[#allocation12 + $0x118] sm:$0xff] }
 0x596   :  { %1454 = vmatpush.msra.mxu0 %v3457_v41 }
 0x598   :  { %1455 = vmatpush.msra.mxu0 %v3461_v28 }
 0x59a   :  { %v2166_v38 = vpop.eup %2165 }
 0x59b   :  { %v1043_v8 = vadd.f32 1.0, %v2166_v38  ;;  %v2168_v59 = vpop.eup %2167  ;;  %v3530_v38 = vld [vmem:[#allocation12 + $0x58] sm:$0xff] }
 0x59c   :  { %v1048_v18 = vadd.f32 1.0, %v2168_v59 }
 0x59d   :  { %v1044_v5 = vmul.f32 0.5, %v1043_v8  ;;  %v3535_v8 = vld [vmem:[#allocation12 + $0x40] sm:$0xff] }
 0x59e   :  { %v1049_v58 = vmul.f32 0.5, %v1048_v18 }
 0x59f   :  { %v1050_v9 = vmul.f32 %v1044_v5, %v1038_v48  ;;  %v3541_v48 = vld [vmem:[#allocation12 + $0x28] sm:$0xff]  ;;  %v4109_v5 = vld [vmem:[#allocation49_spill] sm:$0xff] }
 0x5a0   :  { %v1053_v20 = vsub.f32 1.0, %v1049_v58  ;;  %v1055_v15 = vmul.f32 %v1049_v58, %v3290_v42 }
 0x5a1   :  { %v1051_v57 = vadd.f32 %v1050_v9, %v4105_v22 }
 0x5a3   :  { %2169 = vtanh.f32 %v1051_v57  ;;  %v4110_v57 = vld [vmem:[#allocation51_spill] sm:$0xff] }
 0x5a9   :  { %v2170_v31 = vpop.eup %2169 }
 0x5aa   :  { %v1054_v36 = vmul.f32 %v2170_v31, %v1053_v20  ;;  %v3553_v20 = vld [vmem:[#allocation12 + $0x10] sm:$0xff] }
 0x5ab   :  { %4111 = vst [vmem:[#allocation43_spill] sm:$0xff] %v3553_v20 }
 0x5ac   :  { %v3356_v16 = vadd.f32 %v1055_v15, %v1054_v36 }
 0x5ae   :  { %1077 = vmatmul.f32.vlgmr.msra.gmra.mxu1 %v3356_v16  ;;  %1097 = vmatmul.f32.vlgmr.msra.gmra.mxu2 %v3356_v16 }
 0x5af   :  { %1117 = vmatmul.f32.vlgmr.msra.gmra.mxu3 %v3356_v16  ;;  %1287 = vmatmul.f32.gmra.mxu0 %v3356_v16 }
 0x5b0   :  { %1430 = vmatpush.msra.mxu3 %v3358_v40  ;;  %1491 = vmatpush.msra.mxu1 %v3301_v43 }
 0x5b1   :  { %1511 = vmatpush.msra.mxu2 %v3358_v40 }
 0x5b2   :  { %1431 = vmatpush.msra.mxu3 %v3364_v44  ;;  %1492 = vmatpush.msra.mxu1 %v3304_v45 }
 0x5b3   :  { %1512 = vmatpush.msra.mxu2 %v3364_v44 }
 0x5b4   :  { %1432 = vmatpush.msra.mxu3 %v3368_v32  ;;  %1493 = vmatpush.msra.mxu1 %v3307_v46 }
 0x5b5   :  { %1513 = vmatpush.msra.mxu2 %v3368_v32 }
 0x5b6   :  { %1433 = vmatpush.msra.mxu3 %v3373_v60  ;;  %1310 = vmatmul.f32.vlgmr.msrb.gmra.mxu1 %v2983_v37 }
 0x5b7   :  { %1351 = vmatmul.f32.vlgmr.msrb.gmra.mxu2 %v2983_v37  ;;  %1426 = vmatmul.f32.vlgmr.msrb.gmra.mxu3 %v4106_v0  ;;  %v3399_v37 = vld [vmem:[#allocation12 + $0xb0] sm:$0xff] }
 0x5b8   :  { %1434 = vmatpush.msra.mxu3 %v3378_v62  ;;  %1494 = vmatpush.msra.mxu1 %v3310_v47 }
 0x5b9   :  { %1514 = vmatpush.msra.mxu2 %v3373_v60 }
 0x5ba   :  { %1435 = vmatpush.msra.mxu3 %v3385_v3  ;;  %1495 = vmatpush.msra.mxu1 %v3313_v53 }
 0x5bb   :  { %1515 = vmatpush.msra.mxu2 %v3378_v62 }
 0x5bc   :  { %1436 = vmatpush.msra.mxu3 %v3389_v4  ;;  %1496 = vmatpush.msra.mxu1 %v3316_v34 }
 0x5bd   :  { %1516 = vmatpush.msra.mxu2 %v3385_v3 }
 0x5be   :  { %1437 = vmatpush.msra.mxu3 %v3394_v6  ;;  %1313 = vmatmul.f32.gmra.mxu1 %v3047_v30 }
 0x5bf   :  { %1354 = vmatmul.f32.gmra.mxu2 %v3047_v30  ;;  %1497 = vmatpush.msra.mxu1 %v3319_v19  ;;  %v3420_v30 = vld [vmem:[#allocation12 + $0x50] sm:$0xff] }
 0x5c0   :  { %1438 = vmatpush.msra.mxu3 %v3399_v37  ;;  %1517 = vmatpush.msra.mxu2 %v3389_v4 }
 0x5c1   :  { %1498 = vmatpush.msra.mxu1 %v3322_v61 }
 0x5c2   :  { %1439 = vmatpush.msra.mxu3 %v3405_v7  ;;  %1518 = vmatpush.msra.mxu2 %v3394_v6 }
 0x5c3   :  { %1499 = vmatpush.msra.mxu1 %v3325_v14 }
 0x5c4   :  { %1440 = vmatpush.msra.mxu3 %v3410_v10  ;;  %1519 = vmatpush.msra.mxu2 %v3399_v37 }
 0x5c5   :  { %1500 = vmatpush.msra.mxu1 %v3328_v55 }
 0x5c6   :  { %1441 = vmatpush.msra.mxu3 %v3415_v11  ;;  %1316 = vmatmul.f32.gmra.mxu1 %v3115_v27 }
 0x5c7   :  { %1357 = vmatmul.f32.gmra.mxu2 %v3115_v27  ;;  %1501 = vmatpush.msra.mxu1 %v3331_v33  ;;  %v3443_v27 = vld [vmem:[#allocation12 + $0x8] sm:$0xff] }
 0x5c8   :  { %1442 = vmatpush.msra.mxu3 %v3420_v30  ;;  %1520 = vmatpush.msra.mxu2 %v3405_v7  ;;  %4108 = vst [vmem:[#allocation27_spill] sm:$0xff] %v3443_v27 }
 0x5c9   :  { %1502 = vmatpush.msra.mxu1 %v3334_v25 }
 0x5ca   :  { %1443 = vmatpush.msra.mxu3 %v3426_v12  ;;  %1521 = vmatpush.msra.mxu2 %v3410_v10 }
 0x5cb   :  { %1503 = vmatpush.msra.mxu1 %v3337_v21 }
 0x5cc   :  { %1444 = vmatpush.msra.mxu3 %v3435_v52  ;;  %1522 = vmatpush.msra.mxu2 %v3415_v11 }
 0x5cd   :  { %1504 = vmatpush.msra.mxu1 %v3340_v24 }
 0x5ce   :  { %1445 = vmatpush.msra.mxu3 %v3443_v27  ;;  %1319 = vmatmul.f32.gmra.mxu1 %v3202_v54 }
 0x5cf   :  { %1446 = vmatmul.f32.vlgmr.msra.gmra.mxu3 %v4106_v0  ;;  %1360 = vmatmul.f32.gmra.mxu2 %v3202_v54  ;;  %v3504_v54 = vld [vmem:[#allocation12 + $0xe8] sm:$0xff] }
 0x5d0   :  { %1531 = vmatpush.msrb.mxu3 %v3428_v13  ;;  %1523 = vmatpush.msra.mxu2 %v3420_v30 }
 0x5d1   :  { %1505 = vmatpush.msra.mxu1 %v3343_v26  ;;  %1456 = vmatpush.msra.mxu0 %v3504_v54 }
 0x5d2   :  { %1532 = vmatpush.msrb.mxu3 %v3430_v35  ;;  %1524 = vmatpush.msra.mxu2 %v3426_v12 }
 0x5d3   :  { %1506 = vmatpush.msra.mxu1 %v3345_v63 }
 0x5d4   :  { %1533 = vmatpush.msrb.mxu3 %v3437_v56  ;;  %1525 = vmatpush.msra.mxu2 %v3435_v52 }
 0x5d5   :  { %1592 = vmatpush.msrb.mxu1 %v3358_v40 }
 0x5d6   :  { %1322 = vmatmul.f32.gmra.mxu1 %v3270_v51  ;;  %1534 = vmatpush.msrb.mxu3 %v3449_v1 }
 0x5d7   :  { %1363 = vmatmul.f32.gmra.mxu2 %v3270_v51  ;;  %1593 = vmatpush.msrb.mxu1 %v3364_v44  ;;  %v3506_v51 = vld [vmem:[#allocation12 + $0xd0] sm:$0xff] }
 0x5d8   :  { %1535 = vmatpush.msrb.mxu3 %v3457_v41  ;;  %1526 = vmatpush.msra.mxu2 %v3443_v27 }
 0x5d9   :  { %1594 = vmatpush.msrb.mxu1 %v3368_v32  ;;  %1457 = vmatpush.msra.mxu0 %v3506_v51 }
 0x5da   :  { %1612 = vmatpush.msrb.mxu2 %v3428_v13  ;;  %1536 = vmatpush.msrb.mxu3 %v3461_v28 }
 0x5db   :  { %1595 = vmatpush.msrb.mxu1 %v3373_v60 }
 0x5dc   :  { %1613 = vmatpush.msrb.mxu2 %v3430_v35  ;;  %1537 = vmatpush.msrb.mxu3 %v3504_v54 }
 0x5dd   :  { %1596 = vmatpush.msrb.mxu1 %v3378_v62 }
 0x5de   :  { %1614 = vmatpush.msrb.mxu2 %v3437_v56  ;;  %1325 = vmatmul.f32.gmra.mxu1 %v3290_v42 }
 0x5df   :  { %1366 = vmatmul.f32.gmra.mxu2 %v3290_v42  ;;  %1597 = vmatpush.msrb.mxu1 %v3385_v3  ;;  %v3514_v42 = vld [vmem:[#allocation12 + $0xb8] sm:$0xff] }
 0x5e0   :  { %1615 = vmatpush.msrb.mxu2 %v3449_v1  ;;  %1538 = vmatpush.msrb.mxu3 %v3506_v51 }
 0x5e1   :  { %1598 = vmatpush.msrb.mxu1 %v3389_v4  ;;  %1458 = vmatpush.msra.mxu0 %v3514_v42 }
 0x5e2   :  { %1616 = vmatpush.msrb.mxu2 %v3457_v41  ;;  %1539 = vmatpush.msrb.mxu3 %v3514_v42 }
 0x5e3   :  { %1599 = vmatpush.msrb.mxu1 %v3394_v6  ;;  %1459 = vmatpush.msra.mxu0 %v3516_v49 }
 0x5e4   :  { %1617 = vmatpush.msrb.mxu2 %v3461_v28  ;;  %1540 = vmatpush.msrb.mxu3 %v3516_v49 }
 0x5e5   :  { %1600 = vmatpush.msrb.mxu1 %v3399_v37  ;;  %1460 = vmatpush.msra.mxu0 %v3520_v50 }
 0x5e6   :  { %1328 = vmatmul.f32.gmra.mxu1 %v3356_v16  ;;  %1618 = vmatpush.msrb.mxu2 %v3504_v54 }
 0x5e7   :  { %1369 = vmatmul.f32.gmra.mxu2 %v3356_v16  ;;  %1601 = vmatpush.msrb.mxu1 %v3405_v7 }
 0x5e8   :  { %1619 = vmatpush.msrb.mxu2 %v3506_v51  ;;  %1541 = vmatpush.msrb.mxu3 %v3520_v50 }
 0x5e9   :  { %1602 = vmatpush.msrb.mxu1 %v3410_v10  ;;  %1461 = vmatpush.msra.mxu0 %v3525_v39 }
 0x5ea   :  { %1620 = vmatpush.msrb.mxu2 %v3514_v42  ;;  %1542 = vmatpush.msrb.mxu3 %v3525_v39 }
 0x5eb   :  { %1603 = vmatpush.msrb.mxu1 %v3415_v11  ;;  %1462 = vmatpush.msra.mxu0 %v3530_v38 }
 0x5ec   :  { %1621 = vmatpush.msrb.mxu2 %v3516_v49  ;;  %1543 = vmatpush.msrb.mxu3 %v3530_v38 }
 0x5ed   :  { %1604 = vmatpush.msrb.mxu1 %v3420_v30  ;;  %1463 = vmatpush.msra.mxu0 %v3535_v8 }
 0x5ee   :  { %1622 = vmatpush.msrb.mxu2 %v3520_v50  ;;  %1544 = vmatpush.msrb.mxu3 %v3535_v8 }
 0x5ef   :  { %1605 = vmatpush.msrb.mxu1 %v3426_v12  ;;  %1464 = vmatpush.msra.mxu0 %v3541_v48 }
 0x5f0   :  { %1623 = vmatpush.msrb.mxu2 %v3525_v39  ;;  %1545 = vmatpush.msrb.mxu3 %v3541_v48 }
 0x5f1   :  { %1606 = vmatpush.msrb.mxu1 %v3435_v52  ;;  %1465 = vmatpush.msra.mxu0 %v3553_v20 }
 0x5f2   :  { %1624 = vmatpush.msrb.mxu2 %v3530_v38  ;;  %1546 = vmatpush.msrb.mxu3 %v3553_v20 }
 0x5f3   :  { %1607 = vmatpush.msrb.mxu1 %v3443_v27  ;;  %1572 = vmatpush.msrb.mxu0 %v3301_v43 }
 0x5f4   :  { %1625 = vmatpush.msrb.mxu2 %v3535_v8  ;;  %1653 = vmatpush.msra.mxu3 %v3301_v43 }
 0x5f5   :  { %1573 = vmatpush.msrb.mxu0 %v3304_v45 }
 0x5f6   :  { %1626 = vmatpush.msrb.mxu2 %v3541_v48  ;;  %1654 = vmatpush.msra.mxu3 %v3304_v45 }
 0x5f7   :  { %1574 = vmatpush.msrb.mxu0 %v3307_v46 }
 0x5f8   :  { %1627 = vmatpush.msrb.mxu2 %v3553_v20  ;;  %1655 = vmatpush.msra.mxu3 %v3307_v46 }
 0x5f9   :  { %1575 = vmatpush.msrb.mxu0 %v3310_v47 }
 0x5fa   :  { %1656 = vmatpush.msra.mxu3 %v3310_v47 }
 0x5fb   :  { %1576 = vmatpush.msrb.mxu0 %v3313_v53 }
 0x5fc   :  { %1657 = vmatpush.msra.mxu3 %v3313_v53 }
 0x5fd   :  { %1577 = vmatpush.msrb.mxu0 %v3316_v34 }
 0x5fe   :  { %1658 = vmatpush.msra.mxu3 %v3316_v34 }
 0x5ff   :  { %1578 = vmatpush.msrb.mxu0 %v3319_v19 }
 0x600   :  { %1659 = vmatpush.msra.mxu3 %v3319_v19 }
 0x601   :  { %1579 = vmatpush.msrb.mxu0 %v3322_v61 }
 0x602   :  { %1660 = vmatpush.msra.mxu3 %v3322_v61 }
 0x603   :  { %1580 = vmatpush.msrb.mxu0 %v3325_v14 }
 0x604   :  { %1661 = vmatpush.msra.mxu3 %v3325_v14 }
 0x605   :  { %1581 = vmatpush.msrb.mxu0 %v3328_v55 }
 0x606   :  { %1662 = vmatpush.msra.mxu3 %v3328_v55 }
 0x607   :  { %1582 = vmatpush.msrb.mxu0 %v3331_v33 }
 0x608   :  { %1663 = vmatpush.msra.mxu3 %v3331_v33 }
 0x609   :  { %1583 = vmatpush.msrb.mxu0 %v3334_v25 }
 0x60a   :  { %1664 = vmatpush.msra.mxu3 %v3334_v25 }
 0x60b   :  { %1584 = vmatpush.msrb.mxu0 %v3337_v21 }
 0x60c   :  { %1665 = vmatpush.msra.mxu3 %v3337_v21 }
 0x60d   :  { %1585 = vmatpush.msrb.mxu0 %v3340_v24 }
 0x60e   :  { %1666 = vmatpush.msra.mxu3 %v3340_v24 }
 0x60f   :  { %1586 = vmatpush.msrb.mxu0 %v3343_v26 }
 0x610   :  { %1667 = vmatpush.msra.mxu3 %v3343_v26 }
 0x611   :  { %1587 = vmatpush.msrb.mxu0 %v3345_v63 }
 0x612   :  { %1668 = vmatpush.msra.mxu3 %v3345_v63 }
 0x62b   :  { %v1078_v2 = vpop.f32.mrf.mxu1 }
 0x62c   :  { %v1079_v59 = vadd.f32 %v1078_v2, %v4081_v23 }
 0x62e   :  { %v1121_v9 = vadd.f32 %v1079_v59, %v4109_v5  ;;  %v4112_v5 = vld [vmem:[#allocation28_spill] sm:$0xff] }
 0x630   :  { %v1122_v18 = vmul.f32 0.5, %v1121_v9  ;;  %v4113_v9 = vld [vmem:[#allocation24_spill] sm:$0xff] }
 0x631   :  { %v1098_v23 = vpop.f32.mrf.mxu2 }
 0x632   :  { %2171 = vtanh.f32 %v1122_v18  ;;  %v1099_v22 = vadd.f32 %v1098_v23, %v4091_v17  ;;  %v1118_v15 = vpop.f32.mrf.mxu3  ;;  %v458_v18 = vadd.f32 %v4113_v9, %v4112_v5 }
 0x633   :  { %v1119_v2 = vadd.f32 %v1118_v15, %v2979_v29 }
 0x634   :  { %v1126_v58 = vadd.f32 %v1099_v22, %v4110_v57 }
 0x636   :  { %v1127_v31 = vmul.f32 0.5, %v1126_v58 }
 0x638   :  { %v2172_v36 = vpop.eup %2171  ;;  %2173 = vtanh.f32 %v1127_v31 }
 0x639   :  { %v1124_v17 = vadd.f32 1.0, %v2172_v36 }
 0x63b   :  { %v1125_v59 = vmul.f32 0.5, %v1124_v17 }
 0x63d   :  { %v1131_v23 = vmul.f32 %v1125_v59, %v1119_v2 }
 0x63e   :  { %v2174_v22 = vpop.eup %2173 }
 0x63f   :  { %v1129_v57 = vadd.f32 1.0, %v2174_v22  ;;  %v1132_v58 = vadd.f32 %v1131_v23, %v458_v18  ;;  %v1245_v18 = vld [vmem:[%s3999_s9] sm:$0x7] }
 0x640   :  { %v1244_v23 = vld [vmem:[%s3998_s8] sm:$0x7]  ;;  %v3625_v22 = vperm.slane %v1245_v18, 0  ;;  %s2495_s8 = smov [#allocation13]  }
 0x641   :  { %2175 = vtanh.f32 %v1132_v58  ;;  %v1130_v29 = vmul.f32 0.5, %v1129_v57  ;;  %v1427_v57 = vpop.f32.mrf.mxu3  ;;  %v3627_v58 = vperm.slane %v1244_v23, 0  ;;  %s2061_s9 = sshll.u32 %s2495_s8, 4  ;;  %s2062_s9 = int_to_ptr.vmem [resolvable:$true] %s2061_s9 }
 0x642   :  { %4118 = vst [vmem:[#allocation22_spill] sm:$0xff] %v3625_v22 }
 0x643   :  { %v1134_v31 = vsub.f32 1.0, %v1130_v29  ;;  %v1136_v15 = vmul.f32 %v1130_v29, %v3356_v16  ;;  %v1270_v16 = vpop.f32.mrf.mxu0  ;;  %4119 = vst [vmem:[#allocation25_spill] sm:$0xff] %v3627_v58 }
 0x647   :  { %v2176_v36 = vpop.eup %2175 }
 0x648   :  { %v1135_v17 = vmul.f32 %v2176_v36, %v1134_v31  ;;  %v1428_v31 = vadd.f32 %v1427_v57, %v3625_v22  ;;  %v1271_v36 = vadd.f32 %v1270_v16, %v3627_v58  ;;  %v3643_v22 = vperm.slane %v1245_v18, 2  ;;  %v1352_v58 = vpop.f32.mrf.mxu2 }
 0x64a   :  { %v1137_v2 = vadd.f32 %v1136_v15, %v1135_v17  ;;  %v3633_v15 = vperm.slane %v1245_v18, 1  ;;  %v1470_v17 = vadd.f32 %v1428_v31, %v1271_v36  ;;  %v3645_v36 = vperm.slane %v1244_v23, 2 }
 0x64c   :  { %1290 = vmatmul.f32.gmra.mxu0 %v1137_v2  ;;  %1139 = vst [vmem:[#allocation14] sm:$0xff] %v1137_v2  ;;  %1331 = vmatmul.f32.gmra.mxu1 %v1137_v2 }
 0x64d   :  { %1372 = vmatmul.f32.gmra.mxu2 %v1137_v2  ;;  %4121 = vst [vmem:[#allocation35_spill] sm:$0xff] %v3633_v15 }
 0x652   :  { %v1447_v2 = vpop.f32.mrf.mxu3 }
 0x654   :  { %1466 = vmatmul.f32.vlgmr.msra.gmra.mxu0 %v4106_v0  ;;  %v3611_v0 = vpop.f32.mrf.mxu0 }
 0x655   :  { %1673 = vmatpush.msra.mxu0 %v3358_v40  ;;  %4114 = vst [vmem:[#allocation30_spill] sm:$0xff] %v3611_v0 }
 0x657   :  { %1674 = vmatpush.msra.mxu0 %v3364_v44 }
 0x659   :  { %1675 = vmatpush.msra.mxu0 %v3368_v32 }
 0x65b   :  { %1676 = vmatpush.msra.mxu0 %v3373_v60 }
 0x65c   :  { %v3613_v59 = vpop.f32.mrf.mxu0 }
 0x65d   :  { %1677 = vmatpush.msra.mxu0 %v3378_v62  ;;  %4115 = vst [vmem:[#allocation21_spill] sm:$0xff] %v3613_v59  ;;  %v1448_v59 = vadd.f32 %v1447_v2, %v3633_v15 }
 0x65f   :  { %1678 = vmatpush.msra.mxu0 %v3385_v3 }
 0x661   :  { %1679 = vmatpush.msra.mxu0 %v3389_v4 }
 0x663   :  { %1680 = vmatpush.msra.mxu0 %v3394_v6 }
 0x664   :  { %v3615_v5 = vpop.f32.mrf.mxu0 }
 0x665   :  { %1681 = vmatpush.msra.mxu0 %v3399_v37  ;;  %4116 = vst [vmem:[#allocation23_spill] sm:$0xff] %v3615_v5  ;;  %v1311_v5 = vpop.f32.mrf.mxu1 }
 0x667   :  { %1682 = vmatpush.msra.mxu0 %v3405_v7 }
 0x669   :  { %1683 = vmatpush.msra.mxu0 %v3410_v10 }
 0x66b   :  { %1684 = vmatpush.msra.mxu0 %v3415_v11 }
 0x66c   :  { %v3617_v9 = vpop.f32.mrf.mxu0 }
 0x66d   :  { %1685 = vmatpush.msra.mxu0 %v3420_v30  ;;  %4117 = vst [vmem:[#allocation26_spill] sm:$0xff] %v3617_v9  ;;  %v3635_v9 = vperm.slane %v1244_v23, 1 }
 0x66f   :  { %1686 = vmatpush.msra.mxu0 %v3426_v12  ;;  %v1312_v63 = vadd.f32 %v1311_v5, %v3635_v9  ;;  %v1353_v5 = vadd.f32 %v1352_v58, %v3645_v36 }
 0x671   :  { %1687 = vmatpush.msra.mxu0 %v3435_v52  ;;  %v1475_v20 = vadd.f32 %v1448_v59, %v1312_v63 }
 0x673   :  { %1688 = vmatpush.msra.mxu0 %v3443_v27  ;;  %v1471_v27 = vmul.f32 0.5, %v1470_v17 }
 0x674   :  { %v3629_v29 = vpop.f32.mrf.mxu0 }
 0x675   :  { %4120 = vst [vmem:[#allocation31_spill] sm:$0xff] %v3629_v29  ;;  %2177 = vtanh.f32 %v1471_v27  ;;  %v1476_v29 = vmul.f32 0.5, %v1475_v20 }
 0x677   :  { %2179 = vtanh.f32 %v1476_v29 }
 0x67b   :  { %v2178_v16 = vpop.eup %2177 }
 0x67c   :  { %v3638_v0 = vpop.f32.mrf.mxu0  ;;  %v1473_v31 = vadd.f32 1.0, %v2178_v16 }
 0x67d   :  { %4122 = vst [vmem:[#allocation32_spill] sm:$0xff] %v3638_v0  ;;  %v2180_v2 = vpop.eup %2179 }
 0x67e   :  { %v1474_v17 = vmul.f32 0.5, %v1473_v31  ;;  %v1478_v27 = vadd.f32 1.0, %v2180_v2 }
 0x680   :  { %v1479_v59 = vmul.f32 0.5, %v1478_v27 }
 0x682   :  { %v1485_v18 = vmul.f32 0.0, %v1479_v59 }
 0x6c9   :  { %v3641_v57 = vpop.f32.mrf.mxu0 }
 0x6ca   :  { %4123 = vst [vmem:[#allocation50_spill] sm:$0xff] %v3641_v57  ;;  %v1483_v57 = vsub.f32 1.0, %v1479_v59  ;;  %v4140_v59 = vld [vmem:[#allocation25_spill] sm:$0xff] }
 0x6d1   :  { %v1467_v52 = vpop.f32.mrf.mxu0 }
 0x6d2   :  { %v1468_v0 = vadd.f32 %v1467_v52, %v3643_v22 }
 0x6d4   :  { %v1480_v63 = vmul.f32 %v1474_v17, %v1468_v0 }
 0x6d6   :  { %v1481_v20 = vadd.f32 %v1480_v63, %v1353_v5 }
 0x6d8   :  { %2181 = vtanh.f32 %v1481_v20 }
 0x6de   :  { %v2182_v29 = vpop.eup %2181 }
 0x6df   :  { %v1484_v15 = vmul.f32 %v2182_v29, %v1483_v57  ;;  %v4141_v29 = vld [vmem:[#allocation30_spill] sm:$0xff] }
 0x6e1   :  { %v3649_v16 = vadd.f32 %v1485_v18, %v1484_v15  ;;  %v1274_v18 = vadd.f32 %v4141_v29, %v4140_v59 }
 0x6e3   :  { %1487 = vst [vmem:[#allocation13] sm:$0xff] %v3649_v16  ;;  %1507 = vmatmul.f32.vlgmr.msra.gmra.mxu1 %v3649_v16  ;;  %1527 = vmatmul.f32.vlgmr.msra.gmra.mxu2 %v3649_v16 }
 0x6e4   :  { %1547 = vmatmul.f32.vlgmr.msrb.gmra.mxu3 %v3649_v16  ;;  %1693 = vmatpush.msra.mxu1 %v3428_v13 }
 0x6e5   :  { %1734 = vmatpush.msra.mxu2 %v3301_v43  ;;  %1754 = vmatpush.msrb.mxu3 %v3358_v40  ;;  %v4124_v43 = vld [vmem:[#allocation36_spill] sm:$0xff] }
 0x6e6   :  { %1694 = vmatpush.msra.mxu1 %v3430_v35 }
 0x6e7   :  { %1735 = vmatpush.msra.mxu2 %v3304_v45  ;;  %1755 = vmatpush.msrb.mxu3 %v3364_v44  ;;  %v4125_v45 = vld [vmem:[#allocation43_spill] sm:$0xff] }
 0x6e8   :  { %1695 = vmatpush.msra.mxu1 %v3437_v56 }
 0x6e9   :  { %1736 = vmatpush.msra.mxu2 %v3307_v46  ;;  %1756 = vmatpush.msrb.mxu3 %v3368_v32  ;;  %v4126_v46 = vld [vmem:[#allocation29_spill] sm:$0xff] }
 0x6ea   :  { %1696 = vmatpush.msra.mxu1 %v3449_v1 }
 0x6eb   :  { %1737 = vmatpush.msra.mxu2 %v3310_v47  ;;  %1757 = vmatpush.msrb.mxu3 %v3373_v60  ;;  %v4127_v47 = vld [vmem:[#allocation27_spill] sm:$0xff] }
 0x6ec   :  { %1697 = vmatpush.msra.mxu1 %v3457_v41 }
 0x6ed   :  { %1738 = vmatpush.msra.mxu2 %v3313_v53  ;;  %1758 = vmatpush.msrb.mxu3 %v3378_v62  ;;  %v1314_v53 = vpop.f32.mrf.mxu1 }
 0x6ee   :  { %1698 = vmatpush.msra.mxu1 %v3461_v28 }
 0x6ef   :  { %1739 = vmatpush.msra.mxu2 %v3316_v34  ;;  %1759 = vmatpush.msrb.mxu3 %v3385_v3  ;;  %v1355_v34 = vpop.f32.mrf.mxu2 }
 0x6f0   :  { %1699 = vmatpush.msra.mxu1 %v3504_v54  ;;  %v1356_v29 = vadd.f32 %v1355_v34, %v3645_v36  ;;  %v3762_v34 = vld [vmem:[#allocation12 + $0x108] sm:$0xff] }
 0x6f1   :  { %1740 = vmatpush.msra.mxu2 %v3319_v19  ;;  %1760 = vmatpush.msrb.mxu3 %v3389_v4 }
 0x6f2   :  { %1700 = vmatpush.msra.mxu1 %v3506_v51 }
 0x6f3   :  { %1741 = vmatpush.msra.mxu2 %v3322_v61  ;;  %1761 = vmatpush.msrb.mxu3 %v3394_v6 }
 0x6f4   :  { %1701 = vmatpush.msra.mxu1 %v3514_v42 }
 0x6f5   :  { %1742 = vmatpush.msra.mxu2 %v3325_v14  ;;  %1762 = vmatpush.msrb.mxu3 %v3399_v37  ;;  %v3703_v52 = vpop.f32.mrf.mxu1 }
 0x6f6   :  { %1702 = vmatpush.msra.mxu1 %v3516_v49  ;;  %4128 = vst [vmem:[#allocation33_spill] sm:$0xff] %v3703_v52 }
 0x6f7   :  { %1743 = vmatpush.msra.mxu2 %v3328_v55  ;;  %1763 = vmatpush.msrb.mxu3 %v3405_v7  ;;  %v3705_v0 = vpop.f32.mrf.mxu2 }
 0x6f8   :  { %1703 = vmatpush.msra.mxu1 %v3520_v50  ;;  %4129 = vst [vmem:[#allocation34_spill] sm:$0xff] %v3705_v0 }
 0x6f9   :  { %1744 = vmatpush.msra.mxu2 %v3331_v33  ;;  %1764 = vmatpush.msrb.mxu3 %v3410_v10 }
 0x6fa   :  { %1704 = vmatpush.msra.mxu1 %v3525_v39 }
 0x6fb   :  { %1745 = vmatpush.msra.mxu2 %v3334_v25  ;;  %1765 = vmatpush.msrb.mxu3 %v3415_v11 }
 0x6fc   :  { %1705 = vmatpush.msra.mxu1 %v3530_v38 }
 0x6fd   :  { %1746 = vmatpush.msra.mxu2 %v3337_v21  ;;  %1766 = vmatpush.msrb.mxu3 %v3420_v30  ;;  %v3707_v23 = vpop.f32.mrf.mxu1 }
 0x6fe   :  { %1706 = vmatpush.msra.mxu1 %v3535_v8  ;;  %4130 = vst [vmem:[#allocation37_spill] sm:$0xff] %v3707_v23 }
 0x6ff   :  { %1747 = vmatpush.msra.mxu2 %v3340_v24  ;;  %1767 = vmatpush.msrb.mxu3 %v3426_v12  ;;  %v3709_v58 = vpop.f32.mrf.mxu2 }
 0x700   :  { %1707 = vmatpush.msra.mxu1 %v3541_v48  ;;  %4131 = vst [vmem:[#allocation38_spill] sm:$0xff] %v3709_v58  ;;  %v4142_v58 = vld [vmem:[#allocation22_spill] sm:$0xff] }
 0x701   :  { %1748 = vmatpush.msra.mxu2 %v3343_v26  ;;  %1768 = vmatpush.msrb.mxu3 %v4124_v43 }
 0x702   :  { %1708 = vmatpush.msra.mxu1 %v4125_v45 }
 0x703   :  { %1749 = vmatpush.msra.mxu2 %v4126_v46  ;;  %1769 = vmatpush.msrb.mxu3 %v4127_v47 }
 0x705   :  { %v3711_v15 = vpop.f32.mrf.mxu1 }
 0x706   :  { %4132 = vst [vmem:[#allocation39_spill] sm:$0xff] %v3711_v15 }
 0x707   :  { %v3713_v57 = vpop.f32.mrf.mxu2 }
 0x708   :  { %4133 = vst [vmem:[#allocation40_spill] sm:$0xff] %v3713_v57 }
 0x70d   :  { %v3715_v31 = vpop.f32.mrf.mxu1 }
 0x70e   :  { %4134 = vst [vmem:[#allocation41_spill] sm:$0xff] %v3715_v31  ;;  %v1315_v31 = vadd.f32 %v1314_v53, %v3635_v9 }
 0x70f   :  { %v3717_v2 = vpop.f32.mrf.mxu2 }
 0x710   :  { %4135 = vst [vmem:[#allocation44_spill] sm:$0xff] %v3717_v2  ;;  %v4143_v2 = vld [vmem:[#allocation35_spill] sm:$0xff] }
 0x715   :  { %v3719_v17 = vpop.f32.mrf.mxu1 }
 0x716   :  { %4136 = vst [vmem:[#allocation42_spill] sm:$0xff] %v3719_v17 }
 0x717   :  { %v3721_v5 = vpop.f32.mrf.mxu2 }
 0x718   :  { %4137 = vst [vmem:[#allocation45_spill] sm:$0xff] %v3721_v5 }
 0x71d   :  { %v3723_v63 = vpop.f32.mrf.mxu1 }
 0x71e   :  { %4138 = vst [vmem:[#allocation46_spill] sm:$0xff] %v3723_v63 }
 0x71f   :  { %v3725_v27 = vpop.f32.mrf.mxu2 }
 0x720   :  { %4139 = vst [vmem:[#allocation47_spill] sm:$0xff] %v3725_v27 }
 0x760   :  { %v1508_v20 = vpop.f32.mrf.mxu1 }
 0x761   :  { %v1509_v15 = vadd.f32 %v1508_v20, %v4142_v58 }
 0x763   :  { %v1551_v23 = vadd.f32 %v1509_v15, %v1274_v18 }
 0x765   :  { %v1552_v57 = vmul.f32 0.5, %v1551_v23 }
 0x766   :  { %v1528_v0 = vpop.f32.mrf.mxu2 }
 0x767   :  { %2183 = vtanh.f32 %v1552_v57  ;;  %v1529_v17 = vadd.f32 %v1528_v0, %v4143_v2  ;;  %v1548_v63 = vpop.f32.mrf.mxu3 }
 0x768   :  { %v1549_v46 = vadd.f32 %v1548_v63, %v3643_v22 }
 0x769   :  { %v1556_v52 = vadd.f32 %v1529_v17, %v1315_v31 }
 0x76b   :  { %v1557_v5 = vmul.f32 0.5, %v1556_v52 }
 0x76d   :  { %v2184_v47 = vpop.eup %2183  ;;  %2185 = vtanh.f32 %v1557_v5  ;;  %v4149_v5 = vld [vmem:[#allocation22_spill] sm:$0xff] }
 0x76e   :  { %v1554_v27 = vadd.f32 1.0, %v2184_v47  ;;  %v3757_v47 = vld [vmem:[#allocation12 + $0x120] sm:$0xff] }
 0x770   :  { %v1555_v45 = vmul.f32 0.5, %v1554_v27 }
 0x772   :  { %v1561_v20 = vmul.f32 %v1555_v45, %v1549_v46  ;;  %v3742_v45 = vld [vmem:[#allocation12 + $0x168] sm:$0xff]  ;;  %v3752_v46 = vld [vmem:[#allocation12 + $0x138] sm:$0xff] }
 0x773   :  { %v2186_v15 = vpop.eup %2185 }
 0x774   :  { %v1559_v23 = vadd.f32 1.0, %v2186_v15  ;;  %v1562_v18 = vadd.f32 %v1561_v20, %v1356_v29 }
 0x776   :  { %2187 = vtanh.f32 %v1562_v18  ;;  %v1560_v53 = vmul.f32 0.5, %v1559_v23 }
 0x778   :  { %v1564_v57 = vsub.f32 1.0, %v1560_v53  ;;  %v1566_v0 = vmul.f32 %v1560_v53, %v3649_v16  ;;  %v3747_v16 = vld [vmem:[#allocation12 + $0x150] sm:$0xff] }
 0x77c   :  { %v2188_v58 = vpop.eup %2187 }
 0x77d   :  { %v1565_v52 = vmul.f32 %v2188_v58, %v1564_v57  ;;  %v3767_v58 = vld [vmem:[#allocation12 + $0xf0] sm:$0xff] }
 0x77f   :  { %v3735_v31 = vadd.f32 %v1566_v0, %v1565_v52 }
 0x781   :  { %1568 = vst [vmem:[#allocation13 + $0x8] sm:$0xff] %v3735_v31  ;;  %1588 = vmatmul.f32.vlgmr.msrb.gmra.mxu0 %v3735_v31  ;;  %1608 = vmatmul.f32.vlgmr.msrb.gmra.mxu1 %v3735_v31 }
 0x782   :  { %1628 = vmatmul.f32.vlgmr.msrb.gmra.mxu2 %v3735_v31  ;;  %1774 = vmatpush.msrb.mxu0 %v3428_v13 }
 0x783   :  { %1815 = vmatpush.msrb.mxu1 %v3742_v45  ;;  %1835 = vmatpush.msrb.mxu2 %v3358_v40 }
 0x784   :  { %1775 = vmatpush.msrb.mxu0 %v3430_v35 }
 0x785   :  { %1816 = vmatpush.msrb.mxu1 %v3747_v16  ;;  %1836 = vmatpush.msrb.mxu2 %v3364_v44 }
 0x786   :  { %1776 = vmatpush.msrb.mxu0 %v3437_v56 }
 0x787   :  { %1817 = vmatpush.msrb.mxu1 %v3752_v46  ;;  %1837 = vmatpush.msrb.mxu2 %v3368_v32 }
 0x788   :  { %1777 = vmatpush.msrb.mxu0 %v3449_v1 }
 0x789   :  { %1818 = vmatpush.msrb.mxu1 %v3757_v47  ;;  %1838 = vmatpush.msrb.mxu2 %v3373_v60 }
 0x78a   :  { %1778 = vmatpush.msrb.mxu0 %v3457_v41 }
 0x78b   :  { %1819 = vmatpush.msrb.mxu1 %v3762_v34  ;;  %1839 = vmatpush.msrb.mxu2 %v3378_v62 }
 0x78c   :  { %1779 = vmatpush.msrb.mxu0 %v3461_v28 }
 0x78d   :  { %1820 = vmatpush.msrb.mxu1 %v3767_v58  ;;  %1840 = vmatpush.msrb.mxu2 %v3385_v3 }
 0x78e   :  { %1780 = vmatpush.msrb.mxu0 %v3504_v54 }
 0x78f   :  { %1821 = vmatpush.msrb.mxu1 %v3319_v19  ;;  %1841 = vmatpush.msrb.mxu2 %v3389_v4  ;;  %v4144_v19 = vld [vmem:[#allocation43_spill] sm:$0xff] }
 0x790   :  { %1781 = vmatpush.msrb.mxu0 %v3506_v51 }
 0x791   :  { %1822 = vmatpush.msrb.mxu1 %v3322_v61  ;;  %1842 = vmatpush.msrb.mxu2 %v3394_v6  ;;  %v4145_v61 = vld [vmem:[#allocation29_spill] sm:$0xff] }
 0x792   :  { %1782 = vmatpush.msrb.mxu0 %v3514_v42 }
 0x793   :  { %1823 = vmatpush.msrb.mxu1 %v3325_v14  ;;  %1843 = vmatpush.msrb.mxu2 %v3399_v37  ;;  %v4146_v14 = vld [vmem:[#allocation27_spill] sm:$0xff] }
 0x794   :  { %1783 = vmatpush.msrb.mxu0 %v3516_v49 }
 0x795   :  { %1824 = vmatpush.msrb.mxu1 %v3328_v55  ;;  %1844 = vmatpush.msrb.mxu2 %v3405_v7 }
 0x796   :  { %1784 = vmatpush.msrb.mxu0 %v3520_v50 }
 0x797   :  { %1825 = vmatpush.msrb.mxu1 %v3331_v33  ;;  %1845 = vmatpush.msrb.mxu2 %v3410_v10 }
 0x798   :  { %1785 = vmatpush.msrb.mxu0 %v3525_v39 }
 0x799   :  { %1826 = vmatpush.msrb.mxu1 %v3334_v25  ;;  %1846 = vmatpush.msrb.mxu2 %v3415_v11  ;;  %v4147_v25 = vld [vmem:[#allocation21_spill] sm:$0xff] }
 0x79a   :  { %1786 = vmatpush.msrb.mxu0 %v3530_v38 }
 0x79b   :  { %1827 = vmatpush.msrb.mxu1 %v3337_v21  ;;  %1847 = vmatpush.msrb.mxu2 %v3420_v30  ;;  %v1277_v21 = vadd.f32 %v4147_v25, %v4140_v59 }
 0x79c   :  { %1787 = vmatpush.msrb.mxu0 %v3535_v8 }
 0x79d   :  { %1828 = vmatpush.msrb.mxu1 %v3340_v24  ;;  %1848 = vmatpush.msrb.mxu2 %v3426_v12  ;;  %v4148_v24 = vld [vmem:[#allocation33_spill] sm:$0xff] }
 0x79e   :  { %1788 = vmatpush.msrb.mxu0 %v3541_v48  ;;  %v1318_v17 = vadd.f32 %v4148_v24, %v3635_v9 }
 0x79f   :  { %1829 = vmatpush.msrb.mxu1 %v3343_v26  ;;  %1849 = vmatpush.msrb.mxu2 %v4124_v43 }
 0x7a0   :  { %1789 = vmatpush.msrb.mxu0 %v4144_v19 }
 0x7a1   :  { %1830 = vmatpush.msrb.mxu1 %v4145_v61  ;;  %1850 = vmatpush.msrb.mxu2 %v4146_v14  ;;  %v4150_v61 = vld [vmem:[#allocation34_spill] sm:$0xff] }
 0x7a2   :  { %v1359_v25 = vadd.f32 %v4150_v61, %v3645_v36 }
 0x7fe   :  { %v1589_v55 = vpop.f32.mrf.mxu0  ;;  %v1609_v33 = vpop.f32.mrf.mxu1 }
 0x7ff   :  { %v1590_v63 = vadd.f32 %v1589_v55, %v4149_v5  ;;  %v1610_v26 = vadd.f32 %v1609_v33, %v4143_v2 }
 0x801   :  { %v1632_v27 = vadd.f32 %v1590_v63, %v1277_v21  ;;  %v1637_v29 = vadd.f32 %v1610_v26, %v1318_v17 }
 0x803   :  { %v1633_v20 = vmul.f32 0.5, %v1632_v27  ;;  %v1638_v15 = vmul.f32 0.5, %v1637_v29 }
 0x805   :  { %2189 = vtanh.f32 %v1633_v20  ;;  %v1629_v18 = vpop.f32.mrf.mxu2  ;;  %v4153_v20 = vld [vmem:[#allocation22_spill] sm:$0xff] }
 0x806   :  { %2191 = vtanh.f32 %v1638_v15  ;;  %v1630_v0 = vadd.f32 %v1629_v18, %v3643_v22 }
 0x80b   :  { %v2190_v23 = vpop.eup %2189 }
 0x80c   :  { %v1635_v53 = vadd.f32 1.0, %v2190_v23  ;;  %v2192_v57 = vpop.eup %2191 }
 0x80d   :  { %v1640_v55 = vadd.f32 1.0, %v2192_v57 }
 0x80e   :  { %v1636_v52 = vmul.f32 0.5, %v1635_v53 }
 0x80f   :  { %v1641_v33 = vmul.f32 0.5, %v1640_v55 }
 0x810   :  { %v1642_v24 = vmul.f32 %v1636_v52, %v1630_v0 }
 0x811   :  { %v1645_v21 = vsub.f32 1.0, %v1641_v33  ;;  %v1647_v63 = vmul.f32 %v1641_v33, %v3735_v31 }
 0x812   :  { %v1643_v5 = vadd.f32 %v1642_v24, %v1359_v25  ;;  %v4154_v24 = vld [vmem:[#allocation38_spill] sm:$0xff] }
 0x813   :  { %v1362_v55 = vadd.f32 %v4154_v24, %v3645_v36 }
 0x814   :  { %2193 = vtanh.f32 %v1643_v5  ;;  %v4152_v5 = vld [vmem:[#allocation23_spill] sm:$0xff] }
 0x815   :  { %v1280_v29 = vadd.f32 %v4152_v5, %v4140_v59  ;;  %v2283_v5 = vld [vmem:[#allocation12 + $0x140] sm:$0xff] }
 0x81a   :  { %v2194_v17 = vpop.eup %2193 }
 0x81b   :  { %v1646_v26 = vmul.f32 %v2194_v17, %v1645_v21 }
 0x81d   :  { %v3811_v27 = vadd.f32 %v1647_v63, %v1646_v26 }
 0x81f   :  { %1649 = vst [vmem:[#allocation13 + $0x10] sm:$0xff] %v3811_v27  ;;  %1669 = vmatmul.f32.vlgmr.msra.gmra.mxu3 %v3811_v27  ;;  %1689 = vmatmul.f32.vlgmr.msra.gmra.mxu0 %v3811_v27 }
 0x820   :  { %1709 = vmatmul.f32.vlgmr.msra.gmra.mxu1 %v3811_v27  ;;  %1855 = vmatpush.msra.mxu3 %v3428_v13 }
 0x821   :  { %1896 = vmatpush.msra.mxu0 %v3742_v45  ;;  %1916 = vmatpush.msra.mxu1 %v3358_v40  ;;  %v3836_v40 = vld [vmem:[#allocation12 + $0xd8] sm:$0xff] }
 0x822   :  { %1856 = vmatpush.msra.mxu3 %v3430_v35 }
 0x823   :  { %1897 = vmatpush.msra.mxu0 %v3747_v16  ;;  %1917 = vmatpush.msra.mxu1 %v3364_v44  ;;  %v3841_v44 = vld [vmem:[#allocation12 + $0xc0] sm:$0xff] }
 0x824   :  { %1857 = vmatpush.msra.mxu3 %v3437_v56 }
 0x825   :  { %1898 = vmatpush.msra.mxu0 %v3752_v46  ;;  %1918 = vmatpush.msra.mxu1 %v3368_v32  ;;  %v3846_v32 = vld [vmem:[#allocation12 + $0xa8] sm:$0xff] }
 0x826   :  { %1858 = vmatpush.msra.mxu3 %v3449_v1 }
 0x827   :  { %1899 = vmatpush.msra.mxu0 %v3757_v47  ;;  %1919 = vmatpush.msra.mxu1 %v3373_v60  ;;  %v3851_v60 = vld [vmem:[#allocation12 + $0x90] sm:$0xff] }
 0x828   :  { %1859 = vmatpush.msra.mxu3 %v3457_v41 }
 0x829   :  { %1900 = vmatpush.msra.mxu0 %v3762_v34  ;;  %1920 = vmatpush.msra.mxu1 %v3378_v62  ;;  %v3856_v62 = vld [vmem:[#allocation12 + $0x78] sm:$0xff] }
 0x82a   :  { %1860 = vmatpush.msra.mxu3 %v3461_v28 }
 0x82b   :  { %1901 = vmatpush.msra.mxu0 %v3767_v58  ;;  %1921 = vmatpush.msra.mxu1 %v3385_v3  ;;  %v3861_v3 = vld [vmem:[#allocation12 + $0x60] sm:$0xff] }
 0x82c   :  { %1861 = vmatpush.msra.mxu3 %v3504_v54 }
 0x82d   :  { %1902 = vmatpush.msra.mxu0 %v3836_v40  ;;  %1922 = vmatpush.msra.mxu1 %v3389_v4  ;;  %v3866_v4 = vld [vmem:[#allocation12 + $0x48] sm:$0xff] }
 0x82e   :  { %1862 = vmatpush.msra.mxu3 %v3506_v51 }
 0x82f   :  { %1903 = vmatpush.msra.mxu0 %v3841_v44  ;;  %1923 = vmatpush.msra.mxu1 %v3394_v6  ;;  %v3871_v6 = vld [vmem:[#allocation12 + $0x30] sm:$0xff] }
 0x830   :  { %1863 = vmatpush.msra.mxu3 %v3514_v42 }
 0x831   :  { %1904 = vmatpush.msra.mxu0 %v3846_v32  ;;  %1924 = vmatpush.msra.mxu1 %v3399_v37  ;;  %v3876_v37 = vld [vmem:[#allocation12 + $0x18] sm:$0xff] }
 0x832   :  { %1864 = vmatpush.msra.mxu3 %v3516_v49 }
 0x833   :  { %1905 = vmatpush.msra.mxu0 %v3851_v60  ;;  %1925 = vmatpush.msra.mxu1 %v3405_v7  ;;  %v3881_v7 = vld [vmem:[#allocation12] sm:$0xff] }
 0x834   :  { %1865 = vmatpush.msra.mxu3 %v3520_v50 }
 0x835   :  { %1906 = vmatpush.msra.mxu0 %v3856_v62  ;;  %1926 = vmatpush.msra.mxu1 %v3410_v10 }
 0x836   :  { %1866 = vmatpush.msra.mxu3 %v3525_v39 }
 0x837   :  { %1907 = vmatpush.msra.mxu0 %v3861_v3  ;;  %1927 = vmatpush.msra.mxu1 %v3415_v11 }
 0x838   :  { %1867 = vmatpush.msra.mxu3 %v3530_v38 }
 0x839   :  { %1908 = vmatpush.msra.mxu0 %v3866_v4  ;;  %1928 = vmatpush.msra.mxu1 %v3420_v30  ;;  %v4151_v30 = vld [vmem:[#allocation37_spill] sm:$0xff] }
 0x83a   :  { %1868 = vmatpush.msra.mxu3 %v3535_v8 }
 0x83b   :  { %1909 = vmatpush.msra.mxu0 %v3871_v6  ;;  %1929 = vmatpush.msra.mxu1 %v3426_v12  ;;  %v1321_v12 = vadd.f32 %v4151_v30, %v3635_v9 }
 0x83c   :  { %1869 = vmatpush.msra.mxu3 %v3541_v48 }
 0x83d   :  { %1910 = vmatpush.msra.mxu0 %v3876_v37  ;;  %1930 = vmatpush.msra.mxu1 %v4124_v43 }
 0x83e   :  { %1870 = vmatpush.msra.mxu3 %v4144_v19 }
 0x83f   :  { %1911 = vmatpush.msra.mxu0 %v3881_v7  ;;  %1931 = vmatpush.msra.mxu1 %v4146_v14 }
 0x89c   :  { %v1690_v10 = vpop.f32.mrf.mxu0 }
 0x89d   :  { %v1691_v11 = vadd.f32 %v1690_v10, %v4143_v2  ;;  %v1710_v14 = vpop.f32.mrf.mxu1 }
 0x89e   :  { %v1711_v61 = vadd.f32 %v1710_v14, %v3643_v22  ;;  %v4157_v14 = vld [vmem:[#allocation40_spill] sm:$0xff] }
 0x89f   :  { %v1718_v15 = vadd.f32 %v1691_v11, %v1321_v12 }
 0x8a1   :  { %v1719_v53 = vmul.f32 0.5, %v1718_v15 }
 0x8a2   :  { %v1670_v31 = vpop.f32.mrf.mxu3 }
 0x8a3   :  { %v1671_v43 = vadd.f32 %v1670_v31, %v4153_v20  ;;  %v2281_v31 = vld [vmem:[#allocation12 + $0x170] sm:$0xff] }
 0x8a5   :  { %v1713_v23 = vadd.f32 %v1671_v43, %v1280_v29 }
 0x8a7   :  { %v1714_v18 = vmul.f32 0.5, %v1713_v23 }
 0x8a9   :  { %2195 = vtanh.f32 %v1714_v18 }
 0x8aa   :  { %2197 = vtanh.f32 %v1719_v53 }
 0x8af   :  { %v2196_v57 = vpop.eup %2195 }
 0x8b0   :  { %v1716_v0 = vadd.f32 1.0, %v2196_v57  ;;  %v2198_v52 = vpop.eup %2197 }
 0x8b1   :  { %v1721_v21 = vadd.f32 1.0, %v2198_v52 }
 0x8b2   :  { %v1717_v25 = vmul.f32 0.5, %v1716_v0  ;;  %v1365_v0 = vadd.f32 %v4157_v14, %v3645_v36 }
 0x8b3   :  { %v1722_v63 = vmul.f32 0.5, %v1721_v21 }
 0x8b4   :  { %v1723_v33 = vmul.f32 %v1717_v25, %v1711_v61 }
 0x8b5   :  { %v1726_v26 = vsub.f32 1.0, %v1722_v63  ;;  %v1728_v11 = vmul.f32 %v1722_v63, %v3811_v27  ;;  %v2282_v27 = vld [vmem:[#allocation12 + $0x158] sm:$0xff] }
 0x8b6   :  { %v1724_v17 = vadd.f32 %v1723_v33, %v1362_v55 }
 0x8b8   :  { %2199 = vtanh.f32 %v1724_v17 }
 0x8be   :  { %v2200_v10 = vpop.eup %2199 }
 0x8bf   :  { %v1727_v30 = vmul.f32 %v2200_v10, %v1726_v26  ;;  %v2297_v26 = vld [vmem:[#allocation12 + $0x178] sm:$0xff]  ;;  %v2298_v10 = vld [vmem:[#allocation12 + $0x160] sm:$0xff] }
 0x8c1   :  { %v3895_v12 = vadd.f32 %v1728_v11, %v1727_v30  ;;  %v2299_v11 = vld [vmem:[#allocation12 + $0x148] sm:$0xff]  ;;  %v2300_v30 = vld [vmem:[#allocation12 + $0x130] sm:$0xff] }
 0x8c3   :  { %1730 = vst [vmem:[#allocation13 + $0x18] sm:$0xff] %v3895_v12  ;;  %1750 = vmatmul.f32.vlgmr.msra.gmra.mxu2 %v3895_v12  ;;  %1770 = vmatmul.f32.vlgmr.msrb.gmra.mxu3 %v3895_v12 }
 0x8c4   :  { %1790 = vmatmul.f32.vlgmr.msrb.gmra.mxu0 %v3895_v12  ;;  %1936 = vmatpush.msra.mxu2 %v3428_v13  ;;  %v2284_v13 = vld [vmem:[#allocation12 + $0x128] sm:$0xff] }
 0x8c5   :  { %1977 = vmatpush.msrb.mxu3 %v3742_v45  ;;  %1997 = vmatpush.msrb.mxu0 %v2281_v31  ;;  %v2292_v45 = vld [vmem:[#allocation12 + $0x68] sm:$0xff]  ;;  %v2301_v31 = vld [vmem:[#allocation12 + $0x118] sm:$0xff] }
 0x8c6   :  { %1937 = vmatpush.msra.mxu2 %v3430_v35  ;;  %v2285_v35 = vld [vmem:[#allocation12 + $0x110] sm:$0xff] }
 0x8c7   :  { %1978 = vmatpush.msrb.mxu3 %v3747_v16  ;;  %1998 = vmatpush.msrb.mxu0 %v2282_v27  ;;  %v2293_v16 = vld [vmem:[#allocation12 + $0x50] sm:$0xff]  ;;  %v2302_v27 = vld [vmem:[#allocation12 + $0x100] sm:$0xff] }
 0x8c8   :  { %1938 = vmatpush.msra.mxu2 %v3437_v56  ;;  %v2286_v56 = vld [vmem:[#allocation12 + $0xf8] sm:$0xff] }
 0x8c9   :  { %1979 = vmatpush.msrb.mxu3 %v3752_v46  ;;  %1999 = vmatpush.msrb.mxu0 %v2283_v5  ;;  %v2294_v46 = vld [vmem:[#allocation12 + $0x38] sm:$0xff]  ;;  %v2303_v5 = vld [vmem:[#allocation12 + $0xe8] sm:$0xff] }
 0x8ca   :  { %1939 = vmatpush.msra.mxu2 %v3449_v1  ;;  %v2287_v1 = vld [vmem:[#allocation12 + $0xe0] sm:$0xff] }
 0x8cb   :  { %1980 = vmatpush.msrb.mxu3 %v3757_v47  ;;  %2000 = vmatpush.msrb.mxu0 %v2284_v13  ;;  %v2295_v47 = vld [vmem:[#allocation12 + $0x20] sm:$0xff] }
 0x8cc   :  { %1940 = vmatpush.msra.mxu2 %v3457_v41  ;;  %v2288_v41 = vld [vmem:[#allocation12 + $0xc8] sm:$0xff] }
 0x8cd   :  { %1981 = vmatpush.msrb.mxu3 %v3762_v34  ;;  %2001 = vmatpush.msrb.mxu0 %v2285_v35  ;;  %v2296_v34 = vld [vmem:[#allocation12 + $0x8] sm:$0xff]  ;;  %v4158_v35 = vld [vmem:[#allocation31_spill] sm:$0xff] }
 0x8ce   :  { %1941 = vmatpush.msra.mxu2 %v3461_v28  ;;  %v2289_v28 = vld [vmem:[#allocation12 + $0xb0] sm:$0xff] }
 0x8cf   :  { %1982 = vmatpush.msrb.mxu3 %v3767_v58  ;;  %2002 = vmatpush.msrb.mxu0 %v2286_v56  ;;  %v1286_v56 = vadd.f32 %v4158_v35, %v4140_v59 }
 0x8d0   :  { %1942 = vmatpush.msra.mxu2 %v3504_v54  ;;  %v2290_v54 = vld [vmem:[#allocation12 + $0x98] sm:$0xff] }
 0x8d1   :  { %1983 = vmatpush.msrb.mxu3 %v3836_v40  ;;  %2003 = vmatpush.msrb.mxu0 %v2287_v1 }
 0x8d2   :  { %1943 = vmatpush.msra.mxu2 %v3506_v51  ;;  %v2291_v51 = vld [vmem:[#allocation12 + $0x80] sm:$0xff] }
 0x8d3   :  { %1984 = vmatpush.msrb.mxu3 %v3841_v44  ;;  %2004 = vmatpush.msrb.mxu0 %v2288_v41  ;;  %v4155_v44 = vld [vmem:[#allocation26_spill] sm:$0xff] }
 0x8d4   :  { %1944 = vmatpush.msra.mxu2 %v3514_v42 }
 0x8d5   :  { %1985 = vmatpush.msrb.mxu3 %v3846_v32  ;;  %2005 = vmatpush.msrb.mxu0 %v2289_v28  ;;  %v1283_v32 = vadd.f32 %v4155_v44, %v4140_v59 }
 0x8d6   :  { %1945 = vmatpush.msra.mxu2 %v3516_v49 }
 0x8d7   :  { %1986 = vmatpush.msrb.mxu3 %v3851_v60  ;;  %2006 = vmatpush.msrb.mxu0 %v2290_v54  ;;  %v4156_v60 = vld [vmem:[#allocation39_spill] sm:$0xff] }
 0x8d8   :  { %1946 = vmatpush.msra.mxu2 %v3520_v50 }
 0x8d9   :  { %1987 = vmatpush.msrb.mxu3 %v3856_v62  ;;  %2007 = vmatpush.msrb.mxu0 %v2291_v51  ;;  %v1324_v62 = vadd.f32 %v4156_v60, %v3635_v9 }
 0x8da   :  { %1947 = vmatpush.msra.mxu2 %v3525_v39 }
 0x8db   :  { %1988 = vmatpush.msrb.mxu3 %v3861_v3  ;;  %2008 = vmatpush.msrb.mxu0 %v2292_v45 }
 0x8dc   :  { %1948 = vmatpush.msra.mxu2 %v3530_v38 }
 0x8dd   :  { %1989 = vmatpush.msrb.mxu3 %v3866_v4  ;;  %2009 = vmatpush.msrb.mxu0 %v2293_v16  ;;  %v4160_v16 = vld [vmem:[#allocation44_spill] sm:$0xff] }
 0x8de   :  { %1949 = vmatpush.msra.mxu2 %v3535_v8 }
 0x8df   :  { %1990 = vmatpush.msrb.mxu3 %v3871_v6  ;;  %2010 = vmatpush.msrb.mxu0 %v2294_v46  ;;  %v1368_v46 = vadd.f32 %v4160_v16, %v3645_v36 }
 0x8e0   :  { %1950 = vmatpush.msra.mxu2 %v3541_v48 }
 0x8e1   :  { %1991 = vmatpush.msrb.mxu3 %v3876_v37  ;;  %2011 = vmatpush.msrb.mxu0 %v2295_v47 }
 0x8e2   :  { %1951 = vmatpush.msra.mxu2 %v4144_v19 }
 0x8e3   :  { %1992 = vmatpush.msrb.mxu3 %v3881_v7  ;;  %2012 = vmatpush.msrb.mxu0 %v2296_v34 }
 0x941   :  { %v1791_v15 = vpop.f32.mrf.mxu0 }
 0x942   :  { %v1792_v53 = vadd.f32 %v1791_v15, %v3643_v22 }
 0x946   :  { %v1751_v58 = vpop.f32.mrf.mxu2  ;;  %v1771_v40 = vpop.f32.mrf.mxu3 }
 0x947   :  { %v1752_v3 = vadd.f32 %v1751_v58, %v4153_v20  ;;  %v1772_v4 = vadd.f32 %v1771_v40, %v4143_v2 }
 0x949   :  { %v1794_v6 = vadd.f32 %v1752_v3, %v1283_v32  ;;  %v1799_v37 = vadd.f32 %v1772_v4, %v1324_v62 }
 0x94b   :  { %v1795_v29 = vmul.f32 0.5, %v1794_v6  ;;  %v1800_v43 = vmul.f32 0.5, %v1799_v37 }
 0x94d   :  { %2201 = vtanh.f32 %v1795_v29  ;;  %v4161_v29 = vld [vmem:[#allocation32_spill] sm:$0xff] }
 0x94e   :  { %2203 = vtanh.f32 %v1800_v43  ;;  %v1289_v43 = vadd.f32 %v4161_v29, %v4140_v59 }
 0x953   :  { %v2202_v7 = vpop.eup %2201 }
 0x954   :  { %v1797_v23 = vadd.f32 1.0, %v2202_v7  ;;  %v2204_v18 = vpop.eup %2203  ;;  %v4162_v7 = vld [vmem:[#allocation42_spill] sm:$0xff] }
 0x955   :  { %v1802_v61 = vadd.f32 1.0, %v2204_v18  ;;  %v1330_v15 = vadd.f32 %v4162_v7, %v3635_v9 }
 0x956   :  { %v1798_v57 = vmul.f32 0.5, %v1797_v23 }
 0x957   :  { %v1803_v24 = vmul.f32 0.5, %v1802_v61 }
 0x958   :  { %v1804_v52 = vmul.f32 %v1798_v57, %v1792_v53 }
 0x959   :  { %v1807_v55 = vsub.f32 1.0, %v1803_v24  ;;  %v1809_v17 = vmul.f32 %v1803_v24, %v3895_v12  ;;  %v2304_v12 = vld [vmem:[#allocation12 + $0xd0] sm:$0xff] }
 0x95a   :  { %v1805_v25 = vadd.f32 %v1804_v52, %v1365_v0 }
 0x95c   :  { %2205 = vtanh.f32 %v1805_v25 }
 0x962   :  { %v2206_v33 = vpop.eup %2205 }
 0x963   :  { %v1808_v21 = vmul.f32 %v2206_v33, %v1807_v55 }
 0x965   :  { %v1810_v63 = vadd.f32 %v1809_v17, %v1808_v21  ;;  %v4163_v21 = vld [vmem:[#allocation45_spill] sm:$0xff] }
 0x966   :  { %v1371_v17 = vadd.f32 %v4163_v21, %v3645_v36 }
 0x967   :  { %1811 = vst [vmem:[#allocation13 + $0x20] sm:$0xff] %v1810_v63  ;;  %1831 = vmatmul.f32.vlgmr.msrb.gmra.mxu1 %v1810_v63  ;;  %1851 = vmatmul.f32.vlgmr.msrb.gmra.mxu2 %v1810_v63 }
 0x968   :  { %1871 = vmatmul.f32.vlgmr.msra.gmra.mxu3 %v1810_v63  ;;  %2017 = vmatpush.msrb.mxu1 %v2297_v26 }
 0x96a   :  { %2018 = vmatpush.msrb.mxu1 %v2298_v10 }
 0x96c   :  { %2019 = vmatpush.msrb.mxu1 %v2299_v11 }
 0x96e   :  { %2020 = vmatpush.msrb.mxu1 %v2300_v30 }
 0x970   :  { %2021 = vmatpush.msrb.mxu1 %v2301_v31 }
 0x972   :  { %2022 = vmatpush.msrb.mxu1 %v2302_v27 }
 0x974   :  { %2023 = vmatpush.msrb.mxu1 %v2303_v5 }
 0x976   :  { %2024 = vmatpush.msrb.mxu1 %v2304_v12 }
 0x978   :  { %2025 = vmatpush.msrb.mxu1 %v3514_v42 }
 0x97a   :  { %2026 = vmatpush.msrb.mxu1 %v3516_v49 }
 0x97c   :  { %2027 = vmatpush.msrb.mxu1 %v3520_v50  ;;  %v4159_v50 = vld [vmem:[#allocation41_spill] sm:$0xff] }
 0x97e   :  { %2028 = vmatpush.msrb.mxu1 %v3525_v39  ;;  %v1327_v39 = vadd.f32 %v4159_v50, %v3635_v9 }
 0x980   :  { %2029 = vmatpush.msrb.mxu1 %v3530_v38 }
 0x982   :  { %2030 = vmatpush.msrb.mxu1 %v3535_v8 }
 0x984   :  { %2031 = vmatpush.msrb.mxu1 %v3541_v48 }
 0x986   :  { %2032 = vmatpush.msrb.mxu1 %v4144_v19 }
 0x9e4   :  { %v1832_v13 = vpop.f32.mrf.mxu1 }
 0x9e5   :  { %v1833_v42 = vadd.f32 %v1832_v13, %v4153_v20 }
 0x9e7   :  { %v1875_v1 = vadd.f32 %v1833_v42, %v1286_v56  ;;  %v4164_v56 = vld [vmem:[#allocation46_spill] sm:$0xff] }
 0x9e8   :  { %v1333_v42 = vadd.f32 %v4164_v56, %v3635_v9  ;;  %v4166_v9 = vld [vmem:[#allocation47_spill] sm:$0xff] }
 0x9e9   :  { %v1876_v49 = vmul.f32 0.5, %v1875_v1  ;;  %v1374_v16 = vadd.f32 %v4166_v9, %v3645_v36 }
 0x9ea   :  { %v1852_v41 = vpop.f32.mrf.mxu2 }
 0x9eb   :  { %2207 = vtanh.f32 %v1876_v49  ;;  %v1853_v38 = vadd.f32 %v1852_v41, %v4143_v2  ;;  %v1872_v19 = vpop.f32.mrf.mxu3  ;;  %v4165_v49 = vld [vmem:[#allocation50_spill] sm:$0xff] }
 0x9ec   :  { %v1873_v51 = vadd.f32 %v1872_v19, %v3643_v22  ;;  %v1292_v41 = vadd.f32 %v4165_v49, %v4140_v59 }
 0x9ed   :  { %v1880_v8 = vadd.f32 %v1853_v38, %v1327_v39 }
 0x9ef   :  { %v1881_v28 = vmul.f32 0.5, %v1880_v8 }
 0x9f1   :  { %v2208_v48 = vpop.eup %2207  ;;  %2209 = vtanh.f32 %v1881_v28 }
 0x9f2   :  { %v1878_v54 = vadd.f32 1.0, %v2208_v48 }
 0x9f4   :  { %v1879_v45 = vmul.f32 0.5, %v1878_v54 }
 0x9f6   :  { %v1885_v47 = vmul.f32 %v1879_v45, %v1873_v51 }
 0x9f7   :  { %v2210_v34 = vpop.eup %2209 }
 0x9f8   :  { %v1883_v58 = vadd.f32 1.0, %v2210_v34  ;;  %v1886_v40 = vadd.f32 %v1885_v47, %v1368_v46 }
 0x9fa   :  { %2211 = vtanh.f32 %v1886_v40  ;;  %v1884_v44 = vmul.f32 0.5, %v1883_v58 }
 0x9fc   :  { %v1888_v32 = vsub.f32 1.0, %v1884_v44  ;;  %v1890_v62 = vmul.f32 %v1884_v44, %v1810_v63 }
 0xa00   :  { %v2212_v60 = vpop.eup %2211 }
 0xa01   :  { %v1889_v3 = vmul.f32 %v2212_v60, %v1888_v32 }
 0xa03   :  { %v1891_v4 = vadd.f32 %v1890_v62, %v1889_v3 }
 0xa05   :  { %1892 = vst [vmem:[#allocation13 + $0x28] sm:$0xff] %v1891_v4  ;;  %1912 = vmatmul.f32.vlgmr.msra.gmra.mxu0 %v1891_v4  ;;  %1932 = vmatmul.f32.vlgmr.msra.gmra.mxu1 %v1891_v4 }
 0xa06   :  { %1952 = vmatmul.f32.vlgmr.msra.gmra.mxu2 %v1891_v4 }
 0xa82   :  { %v1913_v6 = vpop.f32.mrf.mxu0  ;;  %v1933_v37 = vpop.f32.mrf.mxu1 }
 0xa83   :  { %v1914_v23 = vadd.f32 %v1913_v6, %v4153_v20  ;;  %v1934_v18 = vadd.f32 %v1933_v37, %v4143_v2 }
 0xa85   :  { %v1956_v53 = vadd.f32 %v1914_v23, %v1289_v43  ;;  %v1961_v57 = vadd.f32 %v1934_v18, %v1330_v15 }
 0xa87   :  { %v1957_v14 = vmul.f32 0.5, %v1956_v53  ;;  %v1962_v0 = vmul.f32 0.5, %v1961_v57 }
 0xa89   :  { %2213 = vtanh.f32 %v1957_v14  ;;  %v1953_v61 = vpop.f32.mrf.mxu2 }
 0xa8a   :  { %2215 = vtanh.f32 %v1962_v0  ;;  %v1954_v55 = vadd.f32 %v1953_v61, %v3643_v22 }
 0xa8f   :  { %v2214_v52 = vpop.eup %2213 }
 0xa90   :  { %v1959_v25 = vadd.f32 1.0, %v2214_v52  ;;  %v2216_v24 = vpop.eup %2215 }
 0xa91   :  { %v1964_v26 = vadd.f32 1.0, %v2216_v24 }
 0xa92   :  { %v1960_v33 = vmul.f32 0.5, %v1959_v25 }
 0xa93   :  { %v1965_v11 = vmul.f32 0.5, %v1964_v26 }
 0xa94   :  { %v1966_v63 = vmul.f32 %v1960_v33, %v1954_v55 }
 0xa95   :  { %v1969_v30 = vsub.f32 1.0, %v1965_v11  ;;  %v1971_v27 = vmul.f32 %v1965_v11, %v1891_v4 }
 0xa96   :  { %v1967_v10 = vadd.f32 %v1966_v63, %v1371_v17 }
 0xa98   :  { %2217 = vtanh.f32 %v1967_v10 }
 0xa9e   :  { %v2218_v31 = vpop.eup %2217 }
 0xa9f   :  { %v1970_v5 = vmul.f32 %v2218_v31, %v1969_v30 }
 0xaa1   :  { %v1972_v12 = vadd.f32 %v1971_v27, %v1970_v5 }
 0xaa3   :  { %1973 = vst [vmem:[#allocation13 + $0x30] sm:$0xff] %v1972_v12  ;;  %1993 = vmatmul.f32.vlgmr.msrb.gmra.mxu3 %v1972_v12  ;;  %2013 = vmatmul.f32.vlgmr.msrb.gmra.mxu0 %v1972_v12 }
 0xaa4   :  { %2033 = vmatmul.f32.vlgmr.msrb.gmra.mxu1 %v1972_v12 }
 0xb20   :  { %v2014_v13 = vpop.f32.mrf.mxu0 }
 0xb21   :  { %v2015_v35 = vadd.f32 %v2014_v13, %v4143_v2  ;;  %v2034_v19 = vpop.f32.mrf.mxu1 }
 0xb22   :  { %v2035_v2 = vadd.f32 %v2034_v19, %v3643_v22 }
 0xb23   :  { %v2042_v39 = vadd.f32 %v2015_v35, %v1333_v42 }
 0xb25   :  { %v2043_v28 = vmul.f32 0.5, %v2042_v39 }
 0xb26   :  { %v1994_v1 = vpop.f32.mrf.mxu3 }
 0xb27   :  { %v1995_v50 = vadd.f32 %v1994_v1, %v4153_v20 }
 0xb29   :  { %v2037_v38 = vadd.f32 %v1995_v50, %v1292_v41 }
 0xb2b   :  { %v2038_v8 = vmul.f32 0.5, %v2037_v38 }
 0xb2d   :  { %2219 = vtanh.f32 %v2038_v8 }
 0xb2e   :  { %2221 = vtanh.f32 %v2043_v28 }
 0xb33   :  { %v2220_v48 = vpop.eup %2219 }
 0xb34   :  { %v2040_v54 = vadd.f32 1.0, %v2220_v48  ;;  %v2222_v51 = vpop.eup %2221 }
 0xb35   :  { %v2045_v59 = vadd.f32 1.0, %v2222_v51 }
 0xb36   :  { %v2041_v45 = vmul.f32 0.5, %v2040_v54 }
 0xb37   :  { %v2046_v20 = vmul.f32 0.5, %v2045_v59 }
 0xb38   :  { %v2047_v46 = vmul.f32 %v2041_v45, %v2035_v2 }
 0xb39   :  { %v2050_v34 = vsub.f32 1.0, %v2046_v20  ;;  %v2052_v40 = vmul.f32 %v2046_v20, %v1972_v12 }
 0xb3a   :  { %v2048_v47 = vadd.f32 %v2047_v46, %v1374_v16 }
 0xb3c   :  { %2223 = vtanh.f32 %v2048_v47 }
 0xb42   :  { %v2224_v58 = vpop.eup %2223 }
 0xb43   :  { %v2051_v44 = vmul.f32 %v2224_v58, %v2050_v34 }
 0xb45   :  { %v2053_v22 = vadd.f32 %v2052_v40, %v2051_v44 }
 0xb47   :  { %2054 = vst [vmem:[#allocation13 + $0x38] sm:$0xff] %v2053_v22 }
 0xb48   :  { %2056 = vst [vmem:[#allocation14 + $0x8] sm:$0xff] %v2053_v22  ;;  %2069 = dma.vmem_to_hbm [thread:$0]  %s2062_s9, 1024, %s2064_s23, [#allocation6], %s2488_s16, %s2488_s16, %s2489_s17  }
 0xb49   :  { %2082 = dma.vmem_to_hbm [thread:$0]  %s2075_s27, 256, %s2077_s28, [#allocation15], %s2488_s16, %s2488_s16, %s2489_s17  }
 0xb4a   :  { %2479 = dma.done.wait [#allocation6], 1024  }
 0xb4b   :  { %2480 = vsyncadd [#allocation6], 4294966272 }
 0xb4c   :  { %2481 = dma.done.wait [#allocation15], 256  }
 0xb4d   :  { %2482 = vsyncadd [#allocation15], 4294967040 }
 0xb4e   :  { %2091 = vsyncpa [#allocation5], 1 }
 0xb4f   :  { %2092 = vsyncpa [#allocation8], 1 }
 0xb50   :  { %2093 = vsyncpa [#allocation11], 1 }
 0xb51   :  { %2094 = vsyncpa [#allocation6], 1 }
 0xb52   :  { %2095 = vsyncpa [#allocation15], 1 }

</bundles_post_ra>
